<compile_context>
chip_gen: v5e
topology: v5e:2x2
jax: 0.10.0
libtpu: 0.0.40
codegen_flags: <defaults>
</compile_context>

<pallas_src>
import jax
import jax.numpy as jnp
from jax import lax
from jax.experimental import pallas as pl
from jax.experimental.pallas import tpu as pltpu


def _round_up(x, m):
    return (x + m - 1) // m * m


def _make_kernel(T, TT, TB, E, Hp, need_mask):
    """Build the fused (input-projection + recurrence + FC) kernel."""

    def kernel(emb_ref,      # [TT, TB, E]   bf16 (streamed chunk)
               w_ih_ref,     # [E, 4Hp]      bf16 (resident)
               w_hh_ref,     # [Hp, 4Hp]     bf16 (resident)
               b_ref,        # [1, 4Hp]      f32  (b_ih + b_hh, padded)
               w_fc_ref,     # [Hp, Op]      bf16 (resident)
               b_fc_ref,     # [1, Op]       f32
               out_ref,      # [TB, Op]      f32
               h_sc,         # scratch [TB, Hp] f32 (persistent over t axis)
               c_sc,         # scratch [TB, Hp] f32
               gx_sc):       # scratch [TT*TB, 4Hp] f32 (chunk input projection)
        t_blk = pl.program_id(1)

        @pl.when(t_blk == 0)
        def _init():
            h_sc[...] = jnp.zeros_like(h_sc)
            c_sc[...] = jnp.zeros_like(c_sc)

        # Chunk pre-pass: one big MXU matmul for TT timesteps at once, with the
        # bias folded in.  This is off the per-step serial path.
        x_chunk = emb_ref[...].reshape(TT * TB, E)
        gx_sc[...] = (
            jnp.dot(x_chunk, w_ih_ref[...], preferred_element_type=jnp.float32)
            + b_ref[...])

        def step(i, carry):
            row0 = pl.multiple_of(i * TB, TB)
            gx_t = gx_sc[pl.ds(row0, TB), :]                        # [TB, 4Hp]
            gates = gx_t + jnp.dot(h_sc[...].astype(w_hh_ref.dtype),
                                   w_hh_ref[...],
                                   preferred_element_type=jnp.float32)
            # Lane-aligned gate slices (Hp is a multiple of 128).
            i_g = jax.nn.sigmoid(gates[:, 0 * Hp:1 * Hp])
            f_g = jax.nn.sigmoid(gates[:, 1 * Hp:2 * Hp])
            g_g = jnp.tanh(gates[:, 2 * Hp:3 * Hp])
            o_g = jax.nn.sigmoid(gates[:, 3 * Hp:4 * Hp])
            c_new = f_g * c_sc[...] + i_g * g_g
            h_new = o_g * jnp.tanh(c_new)
            if need_mask:
                valid = (t_blk * TT + i) < T
                c_new = jnp.where(valid, c_new, c_sc[...])
                h_new = jnp.where(valid, h_new, h_sc[...])
            c_sc[...] = c_new
            h_sc[...] = h_new
            return carry

        lax.fori_loop(0, TT, step, 0, unroll=min(TT, 8))

        @pl.when(t_blk == pl.num_programs(1) - 1)
        def _finalize():
            out_ref[...] = (
                jnp.dot(h_sc[...].astype(w_fc_ref.dtype), w_fc_ref[...],
                        preferred_element_type=jnp.float32)
                + b_fc_ref[...])

    return kernel


def lstm_classifier_forward(x_ids, params):
    """x_ids: int32 [B, T] token ids.  Returns logits [B, output_dim] (f32)."""
    emb_table = params["embedding"]            # [V, E]  f32
    w_ih = params["w_ih"]                      # [4H, E] (PyTorch layout)
    w_hh = params["w_hh"]                      # [4H, H]
    b_ih = params["b_ih"]                      # [4H]
    b_hh = params["b_hh"]                      # [4H]
    w_fc = params["w_fc"]                      # [O, H]
    b_fc = params["b_fc"]                      # [O]

    B, T = x_ids.shape
    E = emb_table.shape[1]
    H = w_hh.shape[1]
    O = w_fc.shape[0]

    # ---- padded / tiled sizes -------------------------------------------
    Hp = _round_up(H, 128)                     # lane-aligned gate blocks
    Op = _round_up(O, 128)                     # lane-dense output store
    Bp = _round_up(B, 16)                      # bf16-sublane-friendly batch
    # batch tile (megacore "parallel" axis); largest aligned divisor of Bp
    TB = next(tb for tb in (128, 64, 32, 16) if Bp % tb == 0)
    n_btiles = Bp // TB
    # timestep chunk: sized against a modest VMEM budget (safe on v7x 64 MiB)
    gx_row_bytes = TB * 4 * Hp * 4
    TT = max(1, min(T, 64, (4 * 1024 * 1024) // gx_row_bytes))
    Tpad = _round_up(T, TT)
    n_tblk = Tpad // TT
    need_mask = (Tpad != T)

    # ---- glue: gather time-major, pad, pre-transpose, bf16 --------------
    # TODO(synk): embedding gather stays a plain jnp.take in the wrapper
    # (data-dependent gather; not worth a manual DMA-gather kernel here).
    emb_bf = emb_table.astype(jnp.bfloat16)
    embedded = jnp.take(emb_bf, x_ids.T, axis=0)            # [T, B, E] bf16
    embedded = jnp.pad(embedded, ((0, Tpad - T), (0, Bp - B), (0, 0)))

    def pad_gates_rows(w):                                   # [4H, X] -> [4Hp, X]
        w4 = w.reshape(4, H, w.shape[1])
        w4 = jnp.pad(w4, ((0, 0), (0, Hp - H), (0, 0)))
        return w4.reshape(4 * Hp, w.shape[1])

    w_ih_t = pad_gates_rows(w_ih).T.astype(jnp.bfloat16)               # [E, 4Hp]
    w_hh_p = pad_gates_rows(w_hh)                                      # [4Hp, H]
    w_hh_t = jnp.pad(w_hh_p, ((0, 0), (0, Hp - H))).T.astype(jnp.bfloat16)  # [Hp,4Hp]
    b_all = (b_ih + b_hh).reshape(4, H)
    b_all = jnp.pad(b_all, ((0, 0), (0, Hp - H))).reshape(1, 4 * Hp)   # f32
    b_all = b_all.astype(jnp.float32)
    w_fc_t = jnp.pad(w_fc, ((0, Op - O), (0, Hp - H))).T.astype(jnp.bfloat16)  # [Hp,Op]
    b_fc_r = jnp.pad(b_fc, (0, Op - O)).reshape(1, Op).astype(jnp.float32)

    # ---- VMEM budget estimate (double-buffered streamed input) ----------
    est = (2 * TT * TB * E * 2                     # emb chunk (bf16, 2 bufs)
           + E * 4 * Hp * 2 + Hp * 4 * Hp * 2 + Hp * Op * 2   # resident weights
           + 4 * Hp * 4 + Op * 4                   # biases
           + 2 * TB * Hp * 4                       # h, c scratch
           + TT * TB * 4 * Hp * 4                  # gx scratch
           + 2 * TB * Op * 4)                      # output (2 bufs)
    vmem_limit = int(min(48 * 1024 * 1024, max(2 * est, 16 * 1024 * 1024)))

    kernel = _make_kernel(T, TT, TB, E, Hp, need_mask)

    out_padded = pl.pallas_call(
        kernel,
        out_shape=jax.ShapeDtypeStruct((Bp, Op), jnp.float32),
        grid=(n_btiles, n_tblk),
        in_specs=[
            pl.BlockSpec((TT, TB, E), lambda b, t: (t, b, 0)),     # emb chunk
            pl.BlockSpec((E, 4 * Hp), lambda b, t: (0, 0)),        # W_ih^T
            pl.BlockSpec((Hp, 4 * Hp), lambda b, t: (0, 0)),       # W_hh^T
            pl.BlockSpec((1, 4 * Hp), lambda b, t: (0, 0)),        # bias
            pl.BlockSpec((Hp, Op), lambda b, t: (0, 0)),           # W_fc^T
            pl.BlockSpec((1, Op), lambda b, t: (0, 0)),            # b_fc
        ],
        out_specs=pl.BlockSpec((TB, Op), lambda b, t: (b, 0)),
        scratch_shapes=[
            pltpu.VMEM((TB, Hp), jnp.float32),                     # h
            pltpu.VMEM((TB, Hp), jnp.float32),                     # c
            pltpu.VMEM((TT * TB, 4 * Hp), jnp.float32),            # gates_x chunk
        ],
        compiler_params=pltpu.CompilerParams(
            dimension_semantics=("parallel", "arbitrary"),
            vmem_limit_bytes=vmem_limit),
    )(embedded, w_ih_t, w_hh_t, b_all, w_fc_t, b_fc_r)

    return out_padded[:B, :O]


def lstm_classifier_reference(x_ids, params):
    """Pure-JAX f32 reference matching the PyTorch module."""
    emb = jnp.take(params["embedding"], x_ids, axis=0)        # [B, T, E]
    B = emb.shape[0]
    H = params["w_hh"].shape[1]
    w_ih, w_hh = params["w_ih"], params["w_hh"]
    b = params["b_ih"] + params["b_hh"]

    def step(carry, x_t):
        h, c = carry
        gates = x_t @ w_ih.T + h @ w_hh.T + b
        i_g = jax.nn.sigmoid(gates[:, 0 * H:1 * H])
        f_g = jax.nn.sigmoid(gates[:, 1 * H:2 * H])
        g_g = jnp.tanh(gates[:, 2 * H:3 * H])
        o_g = jax.nn.sigmoid(gates[:, 3 * H:4 * H])
        c = f_g * c + i_g * g_g
        h = o_g * jnp.tanh(c)
        return (h, c), None

    h0 = jnp.zeros((B, H), jnp.float32)
    c0 = jnp.zeros((B, H), jnp.float32)
    (hT, _), _ = lax.scan(step, (h0, c0), jnp.swapaxes(emb, 0, 1))
    return hT @ params["w_fc"].T + params["b_fc"]


def init_params(key, vocab_size, embed_dim, hidden_dim, output_dim):
    ks = jax.random.split(key, 7)
    bound = 1.0 / jnp.sqrt(hidden_dim)
    emb = jax.random.normal(ks[0], (vocab_size, embed_dim), jnp.float32)
    emb = emb.at[0].set(0.0)  # padding_idx = vocab['<pad>'] = 0
    return {
        "embedding": emb,
        "w_ih": jax.random.uniform(ks[1], (4 * hidden_dim, embed_dim),
                                   jnp.float32, -bound, bound),
        "w_hh": jax.random.uniform(ks[2], (4 * hidden_dim, hidden_dim),
                                   jnp.float32, -bound, bound),
        "b_ih": jax.random.uniform(ks[3], (4 * hidden_dim,),
                                   jnp.float32, -bound, bound),
        "b_hh": jax.random.uniform(ks[4], (4 * hidden_dim,),
                                   jnp.float32, -bound, bound),
        "w_fc": jax.random.uniform(ks[5], (output_dim, hidden_dim),
                                   jnp.float32, -bound, bound),
        "b_fc": jax.random.uniform(ks[6], (output_dim,),
                                   jnp.float32, -bound, bound),
    }


if __name__ == "__main__":
    # Small, deterministic shapes consistent with the module's forward.
    vocab_size, embed_dim, hidden_dim, output_dim = 100, 16, 32, 2
    batch, seq = 2, 8

    key = jax.random.PRNGKey(0)
    k_param, k_data = jax.random.split(key)
    params = init_params(k_param, vocab_size, embed_dim, hidden_dim, output_dim)

    x_ids = jax.random.randint(k_data, (batch, seq), 0, vocab_size, jnp.int32)

    logits = lstm_classifier_forward(x_ids, params)
    jax.block_until_ready(logits)
    assert logits.shape == (batch, output_dim)

    # Loose-tolerance check against the f32 reference (kernel uses bf16 weights).
    ref = lstm_classifier_reference(x_ids, params)
    assert jnp.max(jnp.abs(logits - ref)) < 0.1

    print("KERNEL_OK")
</pallas_src>

<mosaic_0001>
module attributes {stable_mosaic.version = 11 : i64} {
  func.func @kernel(%arg0: i32, %arg1: i32, %arg2: memref<8x16x16xbf16, #tpu.memory_space<vmem>>, %arg3: memref<16x512xbf16, #tpu.memory_space<vmem>>, %arg4: memref<128x512xbf16, #tpu.memory_space<vmem>>, %arg5: memref<1x512xf32, #tpu.memory_space<vmem>>, %arg6: memref<128x128xbf16, #tpu.memory_space<vmem>>, %arg7: memref<1x128xf32, #tpu.memory_space<vmem>>, %arg8: memref<16x128xf32, #tpu.memory_space<vmem>>, %arg9: memref<16x128xf32, #tpu.memory_space<vmem>>, %arg10: memref<16x128xf32, #tpu.memory_space<vmem>>, %arg11: memref<128x512xf32, #tpu.memory_space<vmem>>) attributes {dimension_semantics = [#tpu.dimension_semantics<parallel>, #tpu.dimension_semantics<arbitrary>], iteration_bounds = array<i64: 1, 1>, scalar_prefetch = 0 : i64, scratch_operands = 3 : i64, tpu.core_type = #tpu.core_type<tc>, window_params = [{transform_indices = @transform_0, window_bounds = array<i64: 8, 16, 16>}, {pipeline_mode = #tpu.pipeline_mode<synchronous>, transform_indices = @transform_1, window_bounds = array<i64: 16, 512>}, {pipeline_mode = #tpu.pipeline_mode<synchronous>, transform_indices = @transform_2, window_bounds = array<i64: 128, 512>}, {pipeline_mode = #tpu.pipeline_mode<synchronous>, transform_indices = @transform_3, window_bounds = array<i64: 1, 512>}, {pipeline_mode = #tpu.pipeline_mode<synchronous>, transform_indices = @transform_4, window_bounds = array<i64: 128, 128>}, {pipeline_mode = #tpu.pipeline_mode<synchronous>, transform_indices = @transform_5, window_bounds = array<i64: 1, 128>}, {transform_indices = @transform_6, window_bounds = array<i64: 16, 128>}]} {
    %c0_i32 = arith.constant 0 : i32
    %0 = arith.cmpi eq, %arg1, %c0_i32 : i32
    %1 = arith.extui %0 : i1 to i32
    %c0_i32_0 = arith.constant 0 : i32
    %2 = arith.cmpi ne, %1, %c0_i32_0 : i32
    scf.if %2 {
      %cst_139 = arith.constant 0.000000e+00 : f32
      %310 = vector.broadcast %cst_139 : f32 to vector<16x128xf32>
      %c0_140 = arith.constant 0 : index
      %c0_141 = arith.constant 0 : index
      %311 = vector.load %arg9[%c0_140, %c0_141] : memref<16x128xf32, #tpu.memory_space<vmem>>, vector<16x128xf32>
      tpu.vector_store %arg9[%c0_140, %c0_141], %310 {strides = array<i32>} : memref<16x128xf32, #tpu.memory_space<vmem>>, vector<16x128xf32>,
      %cst_142 = arith.constant 0.000000e+00 : f32
      %312 = vector.broadcast %cst_142 : f32 to vector<16x128xf32>
      %c0_143 = arith.constant 0 : index
      %c0_144 = arith.constant 0 : index
      %313 = vector.load %arg10[%c0_143, %c0_144] : memref<16x128xf32, #tpu.memory_space<vmem>>, vector<16x128xf32>
      tpu.vector_store %arg10[%c0_143, %c0_144], %312 {strides = array<i32>} : memref<16x128xf32, #tpu.memory_space<vmem>>, vector<16x128xf32>,
    } else {
    }
    %c0 = arith.constant 0 : index
    %c0_1 = arith.constant 0 : index
    %c0_2 = arith.constant 0 : index
    %3 = vector.load %arg2[%c0, %c0_1, %c0_2] : memref<8x16x16xbf16, #tpu.memory_space<vmem>>, vector<8x16x16xbf16>
    %4 = vector.shape_cast %3 : vector<8x16x16xbf16> to vector<128x16xbf16>
    %c0_3 = arith.constant 0 : index
    %c0_4 = arith.constant 0 : index
    %5 = vector.load %arg3[%c0_3, %c0_4] : memref<16x512xbf16, #tpu.memory_space<vmem>>, vector<16x512xbf16>
    %cst = arith.constant dense<0.000000e+00> : vector<128x512xf32>
    %6 = tpu.matmul %4, %5, %cst {dimension_numbers = #tpu.dot_dimension_numbers<[1], [0], [0], [1], [0, 0, 1, 1], [], []>} : vector<128x16xbf16>, vector<16x512xbf16>, vector<128x512xf32> -> vector<128x512xf32>
    %c0_5 = arith.constant 0 : index
    %c0_6 = arith.constant 0 : index
    %7 = vector.load %arg5[%c0_5, %c0_6] : memref<1x512xf32, #tpu.memory_space<vmem>>, vector<1x512xf32>
    %8 = vector.broadcast %7 : vector<1x512xf32> to vector<128x512xf32>
    %9 = arith.addf %6, %8 : vector<128x512xf32>
    %c0_7 = arith.constant 0 : index
    %c0_8 = arith.constant 0 : index
    %10 = vector.load %arg11[%c0_7, %c0_8] : memref<128x512xf32, #tpu.memory_space<vmem>>, vector<128x512xf32>
    tpu.vector_store %arg11[%c0_7, %c0_8], %9 {strides = array<i32>} : memref<128x512xf32, #tpu.memory_space<vmem>>, vector<128x512xf32>,
    %c0_i32_9 = arith.constant 0 : i32
    %c16_i32 = arith.constant 16 : i32
    %11 = arith.muli %c0_i32_9, %c16_i32 : i32
    %12 = tpu.assume_multiple %11, 16 : i32
    %13 = arith.index_cast %12 : i32 to index
    %c0_10 = arith.constant 0 : index
    %14 = vector.load %arg11[%13, %c0_10] : memref<128x512xf32, #tpu.memory_space<vmem>>, vector<16x512xf32>
    %c0_11 = arith.constant 0 : index
    %c0_12 = arith.constant 0 : index
    %15 = vector.load %arg9[%c0_11, %c0_12] : memref<16x128xf32, #tpu.memory_space<vmem>>, vector<16x128xf32>
    %16 = arith.truncf %15 : vector<16x128xf32> to vector<16x128xbf16>
    %c0_13 = arith.constant 0 : index
    %c0_14 = arith.constant 0 : index
    %17 = vector.load %arg4[%c0_13, %c0_14] : memref<128x512xbf16, #tpu.memory_space<vmem>>, vector<128x512xbf16>
    %cst_15 = arith.constant dense<0.000000e+00> : vector<16x512xf32>
    %18 = tpu.matmul %16, %17, %cst_15 {dimension_numbers = #tpu.dot_dimension_numbers<[1], [0], [0], [1], [0, 0, 1, 1], [], []>} : vector<16x128xbf16>, vector<128x512xbf16>, vector<16x512xf32> -> vector<16x512xf32>
    %19 = arith.addf %14, %18 : vector<16x512xf32>
    %20 = vector.extract_strided_slice %19 {offsets = [0, 0], sizes = [16, 128], strides = [1, 1]} : vector<16x512xf32> to vector<16x128xf32>
    %21 = arith.negf %20 : vector<16x128xf32>
    %22 = math.exp %21 : vector<16x128xf32>
    %cst_16 = arith.constant 1.000000e+00 : f32
    %23 = vector.broadcast %cst_16 : f32 to vector<16x128xf32>
    %24 = arith.addf %23, %22 : vector<16x128xf32>
    %25 = arith.divf %23, %24 : vector<16x128xf32>
    %26 = vector.extract_strided_slice %19 {offsets = [0, 128], sizes = [16, 128], strides = [1, 1]} : vector<16x512xf32> to vector<16x128xf32>
    %27 = arith.negf %26 : vector<16x128xf32>
    %28 = math.exp %27 : vector<16x128xf32>
    %cst_17 = arith.constant 1.000000e+00 : f32
    %29 = vector.broadcast %cst_17 : f32 to vector<16x128xf32>
    %30 = arith.addf %29, %28 : vector<16x128xf32>
    %31 = arith.divf %29, %30 : vector<16x128xf32>
    %32 = vector.extract_strided_slice %19 {offsets = [0, 256], sizes = [16, 128], strides = [1, 1]} : vector<16x512xf32> to vector<16x128xf32>
    %33 = math.tanh %32 : vector<16x128xf32>
    %34 = vector.extract_strided_slice %19 {offsets = [0, 384], sizes = [16, 128], strides = [1, 1]} : vector<16x512xf32> to vector<16x128xf32>
    %35 = arith.negf %34 : vector<16x128xf32>
    %36 = math.exp %35 : vector<16x128xf32>
    %cst_18 = arith.constant 1.000000e+00 : f32
    %37 = vector.broadcast %cst_18 : f32 to vector<16x128xf32>
    %38 = arith.addf %37, %36 : vector<16x128xf32>
    %39 = arith.divf %37, %38 : vector<16x128xf32>
    %c0_19 = arith.constant 0 : index
    %c0_20 = arith.constant 0 : index
    %40 = vector.load %arg10[%c0_19, %c0_20] : memref<16x128xf32, #tpu.memory_space<vmem>>, vector<16x128xf32>
    %41 = arith.mulf %31, %40 : vector<16x128xf32>
    %42 = arith.mulf %25, %33 : vector<16x128xf32>
    %43 = arith.addf %41, %42 : vector<16x128xf32>
    %44 = math.tanh %43 : vector<16x128xf32>
    %45 = arith.mulf %39, %44 : vector<16x128xf32>
    %c0_21 = arith.constant 0 : index
    %c0_22 = arith.constant 0 : index
    %46 = vector.load %arg10[%c0_21, %c0_22] : memref<16x128xf32, #tpu.memory_space<vmem>>, vector<16x128xf32>
    tpu.vector_store %arg10[%c0_21, %c0_22], %43 {strides = array<i32>} : memref<16x128xf32, #tpu.memory_space<vmem>>, vector<16x128xf32>,
    %c0_23 = arith.constant 0 : index
    %c0_24 = arith.constant 0 : index
    %47 = vector.load %arg9[%c0_23, %c0_24] : memref<16x128xf32, #tpu.memory_space<vmem>>, vector<16x128xf32>
    tpu.vector_store %arg9[%c0_23, %c0_24], %45 {strides = array<i32>} : memref<16x128xf32, #tpu.memory_space<vmem>>, vector<16x128xf32>,
    %c1_i32 = arith.constant 1 : i32
    %c16_i32_25 = arith.constant 16 : i32
    %48 = arith.muli %c1_i32, %c16_i32_25 : i32
    %49 = tpu.assume_multiple %48, 16 : i32
    %50 = arith.index_cast %49 : i32 to index
    %c0_26 = arith.constant 0 : index
    %51 = vector.load %arg11[%50, %c0_26] : memref<128x512xf32, #tpu.memory_space<vmem>>, vector<16x512xf32>
    %c0_27 = arith.constant 0 : index
    %c0_28 = arith.constant 0 : index
    %52 = vector.load %arg9[%c0_27, %c0_28] : memref<16x128xf32, #tpu.memory_space<vmem>>, vector<16x128xf32>
    %53 = arith.truncf %52 : vector<16x128xf32> to vector<16x128xbf16>
    %c0_29 = arith.constant 0 : index
    %c0_30 = arith.constant 0 : index
    %54 = vector.load %arg4[%c0_29, %c0_30] : memref<128x512xbf16, #tpu.memory_space<vmem>>, vector<128x512xbf16>
    %cst_31 = arith.constant dense<0.000000e+00> : vector<16x512xf32>
    %55 = tpu.matmul %53, %54, %cst_31 {dimension_numbers = #tpu.dot_dimension_numbers<[1], [0], [0], [1], [0, 0, 1, 1], [], []>} : vector<16x128xbf16>, vector<128x512xbf16>, vector<16x512xf32> -> vector<16x512xf32>
    %56 = arith.addf %51, %55 : vector<16x512xf32>
    %57 = vector.extract_strided_slice %56 {offsets = [0, 0], sizes = [16, 128], strides = [1, 1]} : vector<16x512xf32> to vector<16x128xf32>
    %58 = arith.negf %57 : vector<16x128xf32>
    %59 = math.exp %58 : vector<16x128xf32>
    %cst_32 = arith.constant 1.000000e+00 : f32
    %60 = vector.broadcast %cst_32 : f32 to vector<16x128xf32>
    %61 = arith.addf %60, %59 : vector<16x128xf32>
    %62 = arith.divf %60, %61 : vector<16x128xf32>
    %63 = vector.extract_strided_slice %56 {offsets = [0, 128], sizes = [16, 128], strides = [1, 1]} : vector<16x512xf32> to vector<16x128xf32>
    %64 = arith.negf %63 : vector<16x128xf32>
    %65 = math.exp %64 : vector<16x128xf32>
    %cst_33 = arith.constant 1.000000e+00 : f32
    %66 = vector.broadcast %cst_33 : f32 to vector<16x128xf32>
    %67 = arith.addf %66, %65 : vector<16x128xf32>
    %68 = arith.divf %66, %67 : vector<16x128xf32>
    %69 = vector.extract_strided_slice %56 {offsets = [0, 256], sizes = [16, 128], strides = [1, 1]} : vector<16x512xf32> to vector<16x128xf32>
    %70 = math.tanh %69 : vector<16x128xf32>
    %71 = vector.extract_strided_slice %56 {offsets = [0, 384], sizes = [16, 128], strides = [1, 1]} : vector<16x512xf32> to vector<16x128xf32>
    %72 = arith.negf %71 : vector<16x128xf32>
    %73 = math.exp %72 : vector<16x128xf32>
    %cst_34 = arith.constant 1.000000e+00 : f32
    %74 = vector.broadcast %cst_34 : f32 to vector<16x128xf32>
    %75 = arith.addf %74, %73 : vector<16x128xf32>
    %76 = arith.divf %74, %75 : vector<16x128xf32>
    %c0_35 = arith.constant 0 : index
    %c0_36 = arith.constant 0 : index
    %77 = vector.load %arg10[%c0_35, %c0_36] : memref<16x128xf32, #tpu.memory_space<vmem>>, vector<16x128xf32>
    %78 = arith.mulf %68, %77 : vector<16x128xf32>
    %79 = arith.mulf %62, %70 : vector<16x128xf32>
    %80 = arith.addf %78, %79 : vector<16x128xf32>
    %81 = math.tanh %80 : vector<16x128xf32>
    %82 = arith.mulf %76, %81 : vector<16x128xf32>
    %c0_37 = arith.constant 0 : index
    %c0_38 = arith.constant 0 : index
    %83 = vector.load %arg10[%c0_37, %c0_38] : memref<16x128xf32, #tpu.memory_space<vmem>>, vector<16x128xf32>
    tpu.vector_store %arg10[%c0_37, %c0_38], %80 {strides = array<i32>} : memref<16x128xf32, #tpu.memory_space<vmem>>, vector<16x128xf32>,
    %c0_39 = arith.constant 0 : index
    %c0_40 = arith.constant 0 : index
    %84 = vector.load %arg9[%c0_39, %c0_40] : memref<16x128xf32, #tpu.memory_space<vmem>>, vector<16x128xf32>
    tpu.vector_store %arg9[%c0_39, %c0_40], %82 {strides = array<i32>} : memref<16x128xf32, #tpu.memory_space<vmem>>, vector<16x128xf32>,
    %c2_i32 = arith.constant 2 : i32
    %c16_i32_41 = arith.constant 16 : i32
    %85 = arith.muli %c2_i32, %c16_i32_41 : i32
    %86 = tpu.assume_multiple %85, 16 : i32
    %87 = arith.index_cast %86 : i32 to index
    %c0_42 = arith.constant 0 : index
    %88 = vector.load %arg11[%87, %c0_42] : memref<128x512xf32, #tpu.memory_space<vmem>>, vector<16x512xf32>
    %c0_43 = arith.constant 0 : index
    %c0_44 = arith.constant 0 : index
    %89 = vector.load %arg9[%c0_43, %c0_44] : memref<16x128xf32, #tpu.memory_space<vmem>>, vector<16x128xf32>
    %90 = arith.truncf %89 : vector<16x128xf32> to vector<16x128xbf16>
    %c0_45 = arith.constant 0 : index
    %c0_46 = arith.constant 0 : index
    %91 = vector.load %arg4[%c0_45, %c0_46] : memref<128x512xbf16, #tpu.memory_space<vmem>>, vector<128x512xbf16>
    %cst_47 = arith.constant dense<0.000000e+00> : vector<16x512xf32>
    %92 = tpu.matmul %90, %91, %cst_47 {dimension_numbers = #tpu.dot_dimension_numbers<[1], [0], [0], [1], [0, 0, 1, 1], [], []>} : vector<16x128xbf16>, vector<128x512xbf16>, vector<16x512xf32> -> vector<16x512xf32>
    %93 = arith.addf %88, %92 : vector<16x512xf32>
    %94 = vector.extract_strided_slice %93 {offsets = [0, 0], sizes = [16, 128], strides = [1, 1]} : vector<16x512xf32> to vector<16x128xf32>
    %95 = arith.negf %94 : vector<16x128xf32>
    %96 = math.exp %95 : vector<16x128xf32>
    %cst_48 = arith.constant 1.000000e+00 : f32
    %97 = vector.broadcast %cst_48 : f32 to vector<16x128xf32>
    %98 = arith.addf %97, %96 : vector<16x128xf32>
    %99 = arith.divf %97, %98 : vector<16x128xf32>
    %100 = vector.extract_strided_slice %93 {offsets = [0, 128], sizes = [16, 128], strides = [1, 1]} : vector<16x512xf32> to vector<16x128xf32>
    %101 = arith.negf %100 : vector<16x128xf32>
    %102 = math.exp %101 : vector<16x128xf32>
    %cst_49 = arith.constant 1.000000e+00 : f32
    %103 = vector.broadcast %cst_49 : f32 to vector<16x128xf32>
    %104 = arith.addf %103, %102 : vector<16x128xf32>
    %105 = arith.divf %103, %104 : vector<16x128xf32>
    %106 = vector.extract_strided_slice %93 {offsets = [0, 256], sizes = [16, 128], strides = [1, 1]} : vector<16x512xf32> to vector<16x128xf32>
    %107 = math.tanh %106 : vector<16x128xf32>
    %108 = vector.extract_strided_slice %93 {offsets = [0, 384], sizes = [16, 128], strides = [1, 1]} : vector<16x512xf32> to vector<16x128xf32>
    %109 = arith.negf %108 : vector<16x128xf32>
    %110 = math.exp %109 : vector<16x128xf32>
    %cst_50 = arith.constant 1.000000e+00 : f32
    %111 = vector.broadcast %cst_50 : f32 to vector<16x128xf32>
    %112 = arith.addf %111, %110 : vector<16x128xf32>
    %113 = arith.divf %111, %112 : vector<16x128xf32>
    %c0_51 = arith.constant 0 : index
    %c0_52 = arith.constant 0 : index
    %114 = vector.load %arg10[%c0_51, %c0_52] : memref<16x128xf32, #tpu.memory_space<vmem>>, vector<16x128xf32>
    %115 = arith.mulf %105, %114 : vector<16x128xf32>
    %116 = arith.mulf %99, %107 : vector<16x128xf32>
    %117 = arith.addf %115, %116 : vector<16x128xf32>
    %118 = math.tanh %117 : vector<16x128xf32>
    %119 = arith.mulf %113, %118 : vector<16x128xf32>
    %c0_53 = arith.constant 0 : index
    %c0_54 = arith.constant 0 : index
    %120 = vector.load %arg10[%c0_53, %c0_54] : memref<16x128xf32, #tpu.memory_space<vmem>>, vector<16x128xf32>
    tpu.vector_store %arg10[%c0_53, %c0_54], %117 {strides = array<i32>} : memref<16x128xf32, #tpu.memory_space<vmem>>, vector<16x128xf32>,
    %c0_55 = arith.constant 0 : index
    %c0_56 = arith.constant 0 : index
    %121 = vector.load %arg9[%c0_55, %c0_56] : memref<16x128xf32, #tpu.memory_space<vmem>>, vector<16x128xf32>
    tpu.vector_store %arg9[%c0_55, %c0_56], %119 {strides = array<i32>} : memref<16x128xf32, #tpu.memory_space<vmem>>, vector<16x128xf32>,
    %c3_i32 = arith.constant 3 : i32
    %c16_i32_57 = arith.constant 16 : i32
    %122 = arith.muli %c3_i32, %c16_i32_57 : i32
    %123 = tpu.assume_multiple %122, 16 : i32
    %124 = arith.index_cast %123 : i32 to index
    %c0_58 = arith.constant 0 : index
    %125 = vector.load %arg11[%124, %c0_58] : memref<128x512xf32, #tpu.memory_space<vmem>>, vector<16x512xf32>
    %c0_59 = arith.constant 0 : index
    %c0_60 = arith.constant 0 : index
    %126 = vector.load %arg9[%c0_59, %c0_60] : memref<16x128xf32, #tpu.memory_space<vmem>>, vector<16x128xf32>
    %127 = arith.truncf %126 : vector<16x128xf32> to vector<16x128xbf16>
    %c0_61 = arith.constant 0 : index
    %c0_62 = arith.constant 0 : index
    %128 = vector.load %arg4[%c0_61, %c0_62] : memref<128x512xbf16, #tpu.memory_space<vmem>>, vector<128x512xbf16>
    %cst_63 = arith.constant dense<0.000000e+00> : vector<16x512xf32>
    %129 = tpu.matmul %127, %128, %cst_63 {dimension_numbers = #tpu.dot_dimension_numbers<[1], [0], [0], [1], [0, 0, 1, 1], [], []>} : vector<16x128xbf16>, vector<128x512xbf16>, vector<16x512xf32> -> vector<16x512xf32>
    %130 = arith.addf %125, %129 : vector<16x512xf32>
    %131 = vector.extract_strided_slice %130 {offsets = [0, 0], sizes = [16, 128], strides = [1, 1]} : vector<16x512xf32> to vector<16x128xf32>
    %132 = arith.negf %131 : vector<16x128xf32>
    %133 = math.exp %132 : vector<16x128xf32>
    %cst_64 = arith.constant 1.000000e+00 : f32
    %134 = vector.broadcast %cst_64 : f32 to vector<16x128xf32>
    %135 = arith.addf %134, %133 : vector<16x128xf32>
    %136 = arith.divf %134, %135 : vector<16x128xf32>
    %137 = vector.extract_strided_slice %130 {offsets = [0, 128], sizes = [16, 128], strides = [1, 1]} : vector<16x512xf32> to vector<16x128xf32>
    %138 = arith.negf %137 : vector<16x128xf32>
    %139 = math.exp %138 : vector<16x128xf32>
    %cst_65 = arith.constant 1.000000e+00 : f32
    %140 = vector.broadcast %cst_65 : f32 to vector<16x128xf32>
    %141 = arith.addf %140, %139 : vector<16x128xf32>
    %142 = arith.divf %140, %141 : vector<16x128xf32>
    %143 = vector.extract_strided_slice %130 {offsets = [0, 256], sizes = [16, 128], strides = [1, 1]} : vector<16x512xf32> to vector<16x128xf32>
    %144 = math.tanh %143 : vector<16x128xf32>
    %145 = vector.extract_strided_slice %130 {offsets = [0, 384], sizes = [16, 128], strides = [1, 1]} : vector<16x512xf32> to vector<16x128xf32>
    %146 = arith.negf %145 : vector<16x128xf32>
    %147 = math.exp %146 : vector<16x128xf32>
    %cst_66 = arith.constant 1.000000e+00 : f32
    %148 = vector.broadcast %cst_66 : f32 to vector<16x128xf32>
    %149 = arith.addf %148, %147 : vector<16x128xf32>
    %150 = arith.divf %148, %149 : vector<16x128xf32>
    %c0_67 = arith.constant 0 : index
    %c0_68 = arith.constant 0 : index
    %151 = vector.load %arg10[%c0_67, %c0_68] : memref<16x128xf32, #tpu.memory_space<vmem>>, vector<16x128xf32>
    %152 = arith.mulf %142, %151 : vector<16x128xf32>
    %153 = arith.mulf %136, %144 : vector<16x128xf32>
    %154 = arith.addf %152, %153 : vector<16x128xf32>
    %155 = math.tanh %154 : vector<16x128xf32>
    %156 = arith.mulf %150, %155 : vector<16x128xf32>
    %c0_69 = arith.constant 0 : index
    %c0_70 = arith.constant 0 : index
    %157 = vector.load %arg10[%c0_69, %c0_70] : memref<16x128xf32, #tpu.memory_space<vmem>>, vector<16x128xf32>
    tpu.vector_store %arg10[%c0_69, %c0_70], %154 {strides = array<i32>} : memref<16x128xf32, #tpu.memory_space<vmem>>, vector<16x128xf32>,
    %c0_71 = arith.constant 0 : index
    %c0_72 = arith.constant 0 : index
    %158 = vector.load %arg9[%c0_71, %c0_72] : memref<16x128xf32, #tpu.memory_space<vmem>>, vector<16x128xf32>
    tpu.vector_store %arg9[%c0_71, %c0_72], %156 {strides = array<i32>} : memref<16x128xf32, #tpu.memory_space<vmem>>, vector<16x128xf32>,
    %c4_i32 = arith.constant 4 : i32
    %c16_i32_73 = arith.constant 16 : i32
    %159 = arith.muli %c4_i32, %c16_i32_73 : i32
    %160 = tpu.assume_multiple %159, 16 : i32
    %161 = arith.index_cast %160 : i32 to index
    %c0_74 = arith.constant 0 : index
    %162 = vector.load %arg11[%161, %c0_74] : memref<128x512xf32, #tpu.memory_space<vmem>>, vector<16x512xf32>
    %c0_75 = arith.constant 0 : index
    %c0_76 = arith.constant 0 : index
    %163 = vector.load %arg9[%c0_75, %c0_76] : memref<16x128xf32, #tpu.memory_space<vmem>>, vector<16x128xf32>
    %164 = arith.truncf %163 : vector<16x128xf32> to vector<16x128xbf16>
    %c0_77 = arith.constant 0 : index
    %c0_78 = arith.constant 0 : index
    %165 = vector.load %arg4[%c0_77, %c0_78] : memref<128x512xbf16, #tpu.memory_space<vmem>>, vector<128x512xbf16>
    %cst_79 = arith.constant dense<0.000000e+00> : vector<16x512xf32>
    %166 = tpu.matmul %164, %165, %cst_79 {dimension_numbers = #tpu.dot_dimension_numbers<[1], [0], [0], [1], [0, 0, 1, 1], [], []>} : vector<16x128xbf16>, vector<128x512xbf16>, vector<16x512xf32> -> vector<16x512xf32>
    %167 = arith.addf %162, %166 : vector<16x512xf32>
    %168 = vector.extract_strided_slice %167 {offsets = [0, 0], sizes = [16, 128], strides = [1, 1]} : vector<16x512xf32> to vector<16x128xf32>
    %169 = arith.negf %168 : vector<16x128xf32>
    %170 = math.exp %169 : vector<16x128xf32>
    %cst_80 = arith.constant 1.000000e+00 : f32
    %171 = vector.broadcast %cst_80 : f32 to vector<16x128xf32>
    %172 = arith.addf %171, %170 : vector<16x128xf32>
    %173 = arith.divf %171, %172 : vector<16x128xf32>
    %174 = vector.extract_strided_slice %167 {offsets = [0, 128], sizes = [16, 128], strides = [1, 1]} : vector<16x512xf32> to vector<16x128xf32>
    %175 = arith.negf %174 : vector<16x128xf32>
    %176 = math.exp %175 : vector<16x128xf32>
    %cst_81 = arith.constant 1.000000e+00 : f32
    %177 = vector.broadcast %cst_81 : f32 to vector<16x128xf32>
    %178 = arith.addf %177, %176 : vector<16x128xf32>
    %179 = arith.divf %177, %178 : vector<16x128xf32>
    %180 = vector.extract_strided_slice %167 {offsets = [0, 256], sizes = [16, 128], strides = [1, 1]} : vector<16x512xf32> to vector<16x128xf32>
    %181 = math.tanh %180 : vector<16x128xf32>
    %182 = vector.extract_strided_slice %167 {offsets = [0, 384], sizes = [16, 128], strides = [1, 1]} : vector<16x512xf32> to vector<16x128xf32>
    %183 = arith.negf %182 : vector<16x128xf32>
    %184 = math.exp %183 : vector<16x128xf32>
    %cst_82 = arith.constant 1.000000e+00 : f32
    %185 = vector.broadcast %cst_82 : f32 to vector<16x128xf32>
    %186 = arith.addf %185, %184 : vector<16x128xf32>
    %187 = arith.divf %185, %186 : vector<16x128xf32>
    %c0_83 = arith.constant 0 : index
    %c0_84 = arith.constant 0 : index
    %188 = vector.load %arg10[%c0_83, %c0_84] : memref<16x128xf32, #tpu.memory_space<vmem>>, vector<16x128xf32>
    %189 = arith.mulf %179, %188 : vector<16x128xf32>
    %190 = arith.mulf %173, %181 : vector<16x128xf32>
    %191 = arith.addf %189, %190 : vector<16x128xf32>
    %192 = math.tanh %191 : vector<16x128xf32>
    %193 = arith.mulf %187, %192 : vector<16x128xf32>
    %c0_85 = arith.constant 0 : index
    %c0_86 = arith.constant 0 : index
    %194 = vector.load %arg10[%c0_85, %c0_86] : memref<16x128xf32, #tpu.memory_space<vmem>>, vector<16x128xf32>
    tpu.vector_store %arg10[%c0_85, %c0_86], %191 {strides = array<i32>} : memref<16x128xf32, #tpu.memory_space<vmem>>, vector<16x128xf32>,
    %c0_87 = arith.constant 0 : index
    %c0_88 = arith.constant 0 : index
    %195 = vector.load %arg9[%c0_87, %c0_88] : memref<16x128xf32, #tpu.memory_space<vmem>>, vector<16x128xf32>
    tpu.vector_store %arg9[%c0_87, %c0_88], %193 {strides = array<i32>} : memref<16x128xf32, #tpu.memory_space<vmem>>, vector<16x128xf32>,
    %c5_i32 = arith.constant 5 : i32
    %c16_i32_89 = arith.constant 16 : i32
    %196 = arith.muli %c5_i32, %c16_i32_89 : i32
    %197 = tpu.assume_multiple %196, 16 : i32
    %198 = arith.index_cast %197 : i32 to index
    %c0_90 = arith.constant 0 : index
    %199 = vector.load %arg11[%198, %c0_90] : memref<128x512xf32, #tpu.memory_space<vmem>>, vector<16x512xf32>
    %c0_91 = arith.constant 0 : index
    %c0_92 = arith.constant 0 : index
    %200 = vector.load %arg9[%c0_91, %c0_92] : memref<16x128xf32, #tpu.memory_space<vmem>>, vector<16x128xf32>
    %201 = arith.truncf %200 : vector<16x128xf32> to vector<16x128xbf16>
    %c0_93 = arith.constant 0 : index
    %c0_94 = arith.constant 0 : index
    %202 = vector.load %arg4[%c0_93, %c0_94] : memref<128x512xbf16, #tpu.memory_space<vmem>>, vector<128x512xbf16>
    %cst_95 = arith.constant dense<0.000000e+00> : vector<16x512xf32>
    %203 = tpu.matmul %201, %202, %cst_95 {dimension_numbers = #tpu.dot_dimension_numbers<[1], [0], [0], [1], [0, 0, 1, 1], [], []>} : vector<16x128xbf16>, vector<128x512xbf16>, vector<16x512xf32> -> vector<16x512xf32>
    %204 = arith.addf %199, %203 : vector<16x512xf32>
    %205 = vector.extract_strided_slice %204 {offsets = [0, 0], sizes = [16, 128], strides = [1, 1]} : vector<16x512xf32> to vector<16x128xf32>
    %206 = arith.negf %205 : vector<16x128xf32>
    %207 = math.exp %206 : vector<16x128xf32>
    %cst_96 = arith.constant 1.000000e+00 : f32
    %208 = vector.broadcast %cst_96 : f32 to vector<16x128xf32>
    %209 = arith.addf %208, %207 : vector<16x128xf32>
    %210 = arith.divf %208, %209 : vector<16x128xf32>
    %211 = vector.extract_strided_slice %204 {offsets = [0, 128], sizes = [16, 128], strides = [1, 1]} : vector<16x512xf32> to vector<16x128xf32>
    %212 = arith.negf %211 : vector<16x128xf32>
    %213 = math.exp %212 : vector<16x128xf32>
    %cst_97 = arith.constant 1.000000e+00 : f32
    %214 = vector.broadcast %cst_97 : f32 to vector<16x128xf32>
    %215 = arith.addf %214, %213 : vector<16x128xf32>
    %216 = arith.divf %214, %215 : vector<16x128xf32>
    %217 = vector.extract_strided_slice %204 {offsets = [0, 256], sizes = [16, 128], strides = [1, 1]} : vector<16x512xf32> to vector<16x128xf32>
    %218 = math.tanh %217 : vector<16x128xf32>
    %219 = vector.extract_strided_slice %204 {offsets = [0, 384], sizes = [16, 128], strides = [1, 1]} : vector<16x512xf32> to vector<16x128xf32>
    %220 = arith.negf %219 : vector<16x128xf32>
    %221 = math.exp %220 : vector<16x128xf32>
    %cst_98 = arith.constant 1.000000e+00 : f32
    %222 = vector.broadcast %cst_98 : f32 to vector<16x128xf32>
    %223 = arith.addf %222, %221 : vector<16x128xf32>
    %224 = arith.divf %222, %223 : vector<16x128xf32>
    %c0_99 = arith.constant 0 : index
    %c0_100 = arith.constant 0 : index
    %225 = vector.load %arg10[%c0_99, %c0_100] : memref<16x128xf32, #tpu.memory_space<vmem>>, vector<16x128xf32>
    %226 = arith.mulf %216, %225 : vector<16x128xf32>
    %227 = arith.mulf %210, %218 : vector<16x128xf32>
    %228 = arith.addf %226, %227 : vector<16x128xf32>
    %229 = math.tanh %228 : vector<16x128xf32>
    %230 = arith.mulf %224, %229 : vector<16x128xf32>
    %c0_101 = arith.constant 0 : index
    %c0_102 = arith.constant 0 : index
    %231 = vector.load %arg10[%c0_101, %c0_102] : memref<16x128xf32, #tpu.memory_space<vmem>>, vector<16x128xf32>
    tpu.vector_store %arg10[%c0_101, %c0_102], %228 {strides = array<i32>} : memref<16x128xf32, #tpu.memory_space<vmem>>, vector<16x128xf32>,
    %c0_103 = arith.constant 0 : index
    %c0_104 = arith.constant 0 : index
    %232 = vector.load %arg9[%c0_103, %c0_104] : memref<16x128xf32, #tpu.memory_space<vmem>>, vector<16x128xf32>
    tpu.vector_store %arg9[%c0_103, %c0_104], %230 {strides = array<i32>} : memref<16x128xf32, #tpu.memory_space<vmem>>, vector<16x128xf32>,
    %c6_i32 = arith.constant 6 : i32
    %c16_i32_105 = arith.constant 16 : i32
    %233 = arith.muli %c6_i32, %c16_i32_105 : i32
    %234 = tpu.assume_multiple %233, 16 : i32
    %235 = arith.index_cast %234 : i32 to index
    %c0_106 = arith.constant 0 : index
    %236 = vector.load %arg11[%235, %c0_106] : memref<128x512xf32, #tpu.memory_space<vmem>>, vector<16x512xf32>
    %c0_107 = arith.constant 0 : index
    %c0_108 = arith.constant 0 : index
    %237 = vector.load %arg9[%c0_107, %c0_108] : memref<16x128xf32, #tpu.memory_space<vmem>>, vector<16x128xf32>
    %238 = arith.truncf %237 : vector<16x128xf32> to vector<16x128xbf16>
    %c0_109 = arith.constant 0 : index
    %c0_110 = arith.constant 0 : index
    %239 = vector.load %arg4[%c0_109, %c0_110] : memref<128x512xbf16, #tpu.memory_space<vmem>>, vector<128x512xbf16>
    %cst_111 = arith.constant dense<0.000000e+00> : vector<16x512xf32>
    %240 = tpu.matmul %238, %239, %cst_111 {dimension_numbers = #tpu.dot_dimension_numbers<[1], [0], [0], [1], [0, 0, 1, 1], [], []>} : vector<16x128xbf16>, vector<128x512xbf16>, vector<16x512xf32> -> vector<16x512xf32>
    %241 = arith.addf %236, %240 : vector<16x512xf32>
    %242 = vector.extract_strided_slice %241 {offsets = [0, 0], sizes = [16, 128], strides = [1, 1]} : vector<16x512xf32> to vector<16x128xf32>
    %243 = arith.negf %242 : vector<16x128xf32>
    %244 = math.exp %243 : vector<16x128xf32>
    %cst_112 = arith.constant 1.000000e+00 : f32
    %245 = vector.broadcast %cst_112 : f32 to vector<16x128xf32>
    %246 = arith.addf %245, %244 : vector<16x128xf32>
    %247 = arith.divf %245, %246 : vector<16x128xf32>
    %248 = vector.extract_strided_slice %241 {offsets = [0, 128], sizes = [16, 128], strides = [1, 1]} : vector<16x512xf32> to vector<16x128xf32>
    %249 = arith.negf %248 : vector<16x128xf32>
    %250 = math.exp %249 : vector<16x128xf32>
    %cst_113 = arith.constant 1.000000e+00 : f32
    %251 = vector.broadcast %cst_113 : f32 to vector<16x128xf32>
    %252 = arith.addf %251, %250 : vector<16x128xf32>
    %253 = arith.divf %251, %252 : vector<16x128xf32>
    %254 = vector.extract_strided_slice %241 {offsets = [0, 256], sizes = [16, 128], strides = [1, 1]} : vector<16x512xf32> to vector<16x128xf32>
    %255 = math.tanh %254 : vector<16x128xf32>
    %256 = vector.extract_strided_slice %241 {offsets = [0, 384], sizes = [16, 128], strides = [1, 1]} : vector<16x512xf32> to vector<16x128xf32>
    %257 = arith.negf %256 : vector<16x128xf32>
    %258 = math.exp %257 : vector<16x128xf32>
    %cst_114 = arith.constant 1.000000e+00 : f32
    %259 = vector.broadcast %cst_114 : f32 to vector<16x128xf32>
    %260 = arith.addf %259, %258 : vector<16x128xf32>
    %261 = arith.divf %259, %260 : vector<16x128xf32>
    %c0_115 = arith.constant 0 : index
    %c0_116 = arith.constant 0 : index
    %262 = vector.load %arg10[%c0_115, %c0_116] : memref<16x128xf32, #tpu.memory_space<vmem>>, vector<16x128xf32>
    %263 = arith.mulf %253, %262 : vector<16x128xf32>
    %264 = arith.mulf %247, %255 : vector<16x128xf32>
    %265 = arith.addf %263, %264 : vector<16x128xf32>
    %266 = math.tanh %265 : vector<16x128xf32>
    %267 = arith.mulf %261, %266 : vector<16x128xf32>
    %c0_117 = arith.constant 0 : index
    %c0_118 = arith.constant 0 : index
    %268 = vector.load %arg10[%c0_117, %c0_118] : memref<16x128xf32, #tpu.memory_space<vmem>>, vector<16x128xf32>
    tpu.vector_store %arg10[%c0_117, %c0_118], %265 {strides = array<i32>} : memref<16x128xf32, #tpu.memory_space<vmem>>, vector<16x128xf32>,
    %c0_119 = arith.constant 0 : index
    %c0_120 = arith.constant 0 : index
    %269 = vector.load %arg9[%c0_119, %c0_120] : memref<16x128xf32, #tpu.memory_space<vmem>>, vector<16x128xf32>
    tpu.vector_store %arg9[%c0_119, %c0_120], %267 {strides = array<i32>} : memref<16x128xf32, #tpu.memory_space<vmem>>, vector<16x128xf32>,
    %c7_i32 = arith.constant 7 : i32
    %c16_i32_121 = arith.constant 16 : i32
    %270 = arith.muli %c7_i32, %c16_i32_121 : i32
    %271 = tpu.assume_multiple %270, 16 : i32
    %272 = arith.index_cast %271 : i32 to index
    %c0_122 = arith.constant 0 : index
    %273 = vector.load %arg11[%272, %c0_122] : memref<128x512xf32, #tpu.memory_space<vmem>>, vector<16x512xf32>
    %c0_123 = arith.constant 0 : index
    %c0_124 = arith.constant 0 : index
    %274 = vector.load %arg9[%c0_123, %c0_124] : memref<16x128xf32, #tpu.memory_space<vmem>>, vector<16x128xf32>
    %275 = arith.truncf %274 : vector<16x128xf32> to vector<16x128xbf16>
    %c0_125 = arith.constant 0 : index
    %c0_126 = arith.constant 0 : index
    %276 = vector.load %arg4[%c0_125, %c0_126] : memref<128x512xbf16, #tpu.memory_space<vmem>>, vector<128x512xbf16>
    %cst_127 = arith.constant dense<0.000000e+00> : vector<16x512xf32>
    %277 = tpu.matmul %275, %276, %cst_127 {dimension_numbers = #tpu.dot_dimension_numbers<[1], [0], [0], [1], [0, 0, 1, 1], [], []>} : vector<16x128xbf16>, vector<128x512xbf16>, vector<16x512xf32> -> vector<16x512xf32>
    %278 = arith.addf %273, %277 : vector<16x512xf32>
    %279 = vector.extract_strided_slice %278 {offsets = [0, 0], sizes = [16, 128], strides = [1, 1]} : vector<16x512xf32> to vector<16x128xf32>
    %280 = arith.negf %279 : vector<16x128xf32>
    %281 = math.exp %280 : vector<16x128xf32>
    %cst_128 = arith.constant 1.000000e+00 : f32
    %282 = vector.broadcast %cst_128 : f32 to vector<16x128xf32>
    %283 = arith.addf %282, %281 : vector<16x128xf32>
    %284 = arith.divf %282, %283 : vector<16x128xf32>
    %285 = vector.extract_strided_slice %278 {offsets = [0, 128], sizes = [16, 128], strides = [1, 1]} : vector<16x512xf32> to vector<16x128xf32>
    %286 = arith.negf %285 : vector<16x128xf32>
    %287 = math.exp %286 : vector<16x128xf32>
    %cst_129 = arith.constant 1.000000e+00 : f32
    %288 = vector.broadcast %cst_129 : f32 to vector<16x128xf32>
    %289 = arith.addf %288, %287 : vector<16x128xf32>
    %290 = arith.divf %288, %289 : vector<16x128xf32>
    %291 = vector.extract_strided_slice %278 {offsets = [0, 256], sizes = [16, 128], strides = [1, 1]} : vector<16x512xf32> to vector<16x128xf32>
    %292 = math.tanh %291 : vector<16x128xf32>
    %293 = vector.extract_strided_slice %278 {offsets = [0, 384], sizes = [16, 128], strides = [1, 1]} : vector<16x512xf32> to vector<16x128xf32>
    %294 = arith.negf %293 : vector<16x128xf32>
    %295 = math.exp %294 : vector<16x128xf32>
    %cst_130 = arith.constant 1.000000e+00 : f32
    %296 = vector.broadcast %cst_130 : f32 to vector<16x128xf32>
    %297 = arith.addf %296, %295 : vector<16x128xf32>
    %298 = arith.divf %296, %297 : vector<16x128xf32>
    %c0_131 = arith.constant 0 : index
    %c0_132 = arith.constant 0 : index
    %299 = vector.load %arg10[%c0_131, %c0_132] : memref<16x128xf32, #tpu.memory_space<vmem>>, vector<16x128xf32>
    %300 = arith.mulf %290, %299 : vector<16x128xf32>
    %301 = arith.mulf %284, %292 : vector<16x128xf32>
    %302 = arith.addf %300, %301 : vector<16x128xf32>
    %303 = math.tanh %302 : vector<16x128xf32>
    %304 = arith.mulf %298, %303 : vector<16x128xf32>
    %c0_133 = arith.constant 0 : index
    %c0_134 = arith.constant 0 : index
    %305 = vector.load %arg10[%c0_133, %c0_134] : memref<16x128xf32, #tpu.memory_space<vmem>>, vector<16x128xf32>
    tpu.vector_store %arg10[%c0_133, %c0_134], %302 {strides = array<i32>} : memref<16x128xf32, #tpu.memory_space<vmem>>, vector<16x128xf32>,
    %c0_135 = arith.constant 0 : index
    %c0_136 = arith.constant 0 : index
    %306 = vector.load %arg9[%c0_135, %c0_136] : memref<16x128xf32, #tpu.memory_space<vmem>>, vector<16x128xf32>
    tpu.vector_store %arg9[%c0_135, %c0_136], %304 {strides = array<i32>} : memref<16x128xf32, #tpu.memory_space<vmem>>, vector<16x128xf32>,
    %c8_i32 = arith.constant 8 : i32
    %c0_i32_137 = arith.constant 0 : i32
    %307 = arith.cmpi eq, %arg1, %c0_i32_137 : i32
    %308 = arith.extui %307 : i1 to i32
    %c0_i32_138 = arith.constant 0 : i32
    %309 = arith.cmpi ne, %308, %c0_i32_138 : i32
    scf.if %309 {
      %c0_139 = arith.constant 0 : index
      %c0_140 = arith.constant 0 : index
      %310 = vector.load %arg9[%c0_139, %c0_140] : memref<16x128xf32, #tpu.memory_space<vmem>>, vector<16x128xf32>
      %311 = arith.truncf %310 : vector<16x128xf32> to vector<16x128xbf16>
      %c0_141 = arith.constant 0 : index
      %c0_142 = arith.constant 0 : index
      %312 = vector.load %arg6[%c0_141, %c0_142] : memref<128x128xbf16, #tpu.memory_space<vmem>>, vector<128x128xbf16>
      %cst_143 = arith.constant dense<0.000000e+00> : vector<16x128xf32>
      %313 = tpu.matmul %311, %312, %cst_143 {dimension_numbers = #tpu.dot_dimension_numbers<[1], [0], [0], [1], [0, 0, 1, 1], [], []>} : vector<16x128xbf16>, vector<128x128xbf16>, vector<16x128xf32> -> vector<16x128xf32>
      %c0_144 = arith.constant 0 : index
      %c0_145 = arith.constant 0 : index
      %314 = vector.load %arg7[%c0_144, %c0_145] : memref<1x128xf32, #tpu.memory_space<vmem>>, vector<1x128xf32>
      %315 = vector.broadcast %314 : vector<1x128xf32> to vector<16x128xf32>
      %316 = arith.addf %313, %315 : vector<16x128xf32>
      %c0_146 = arith.constant 0 : index
      %c0_147 = arith.constant 0 : index
      %317 = vector.load %arg8[%c0_146, %c0_147] : memref<16x128xf32, #tpu.memory_space<vmem>>, vector<16x128xf32>
      tpu.vector_store %arg8[%c0_146, %c0_147], %316 {strides = array<i32>} : memref<16x128xf32, #tpu.memory_space<vmem>>, vector<16x128xf32>,
    } else {
    }
    return
  }
  func.func @transform_0(%arg0: i32, %arg1: i32) -> (i32, i32, i32) {
    %c0_i32 = arith.constant 0 : i32
    %c0_i32_0 = arith.constant 0 : i32
    return %arg1, %arg0, %c0_i32 : i32, i32, i32
  }
  func.func @transform_1(%arg0: i32, %arg1: i32) -> (i32, i32) {
    %c0_i32 = arith.constant 0 : i32
    %c0_i32_0 = arith.constant 0 : i32
    %c0_i32_1 = arith.constant 0 : i32
    return %c0_i32, %c0_i32_0 : i32, i32
  }
  func.func @transform_2(%arg0: i32, %arg1: i32) -> (i32, i32) {
    %c0_i32 = arith.constant 0 : i32
    %c0_i32_0 = arith.constant 0 : i32
    %c0_i32_1 = arith.constant 0 : i32
    return %c0_i32, %c0_i32_0 : i32, i32
  }
  func.func @transform_3(%arg0: i32, %arg1: i32) -> (i32, i32) {
    %c0_i32 = arith.constant 0 : i32
    %c0_i32_0 = arith.constant 0 : i32
    %c0_i32_1 = arith.constant 0 : i32
    return %c0_i32, %c0_i32_0 : i32, i32
  }
  func.func @transform_4(%arg0: i32, %arg1: i32) -> (i32, i32) {
    %c0_i32 = arith.constant 0 : i32
    %c0_i32_0 = arith.constant 0 : i32
    %c0_i32_1 = arith.constant 0 : i32
    return %c0_i32, %c0_i32_0 : i32, i32
  }
  func.func @transform_5(%arg0: i32, %arg1: i32) -> (i32, i32) {
    %c0_i32 = arith.constant 0 : i32
    %c0_i32_0 = arith.constant 0 : i32
    %c0_i32_1 = arith.constant 0 : i32
    return %c0_i32, %c0_i32_0 : i32, i32
  }
  func.func @transform_6(%arg0: i32, %arg1: i32) -> (i32, i32) {
    %c0_i32 = arith.constant 0 : i32
    %c0_i32_0 = arith.constant 0 : i32
    return %arg0, %c0_i32 : i32, i32
  }
}

</mosaic_0001>

<bundles_post_ra>
// kernel: tpu_custom_call.1
= control target key start
LH: loop header
LB: loop body
LE: loop exit
PB: predicated region body
PF: predicated region fallthrough
CT: control target
= control target key end

     0   :  { %11 = vsyncpa [#allocation6], 0  ;;  %s6928_s0 = inlined_call_operand.hbm [shape: bf16[8,16,16], index: 0, kind: input, shape index: {}]   ;;  %s6929_s1 = inlined_call_operand.hbm [shape: bf16[16,512], index: 1, kind: input, shape index: {}]   ;;  %s6930_s2 = inlined_call_operand.hbm [shape: bf16[128,512], index: 2, kind: input, shape index: {}]   ;;  %s6931_s3 = inlined_call_operand.hbm [shape: f32[1,512], index: 3, kind: input, shape index: {}]   ;;  %s6932_s4 = inlined_call_operand.hbm [shape: bf16[128,128], index: 4, kind: input, shape index: {}]   ;;  %s6933_s5 = inlined_call_operand.vmem [shape: f32[1,128], index: 5, kind: input, shape index: {}]   ;;  %s6934_s6 = inlined_call_operand.hbm [shape: f32[16,128], index: 6, kind: output, shape index: {}]  }
   0x1   :  { %12 = vsyncpa [#allocation9], 0 }
   0x2   :  { %13 = vsyncpa [#allocation12], 0  ;;  %s32_s23 = sshll.u32 %s6929_s1, 4  ;;  %s33_s23 = int_to_ptr.hbm [resolvable:$true] %s32_s23 }
   0x3   :  { %14 = vsyncpa [#allocation7], 0  ;;  %s5701_s24 = smov [#allocation8]   ;;  %s59_s28 = sshll.u32 %s6931_s3, 4  ;;  %s60_s28 = int_to_ptr.hbm [resolvable:$true] %s59_s28 }
   0x4   :  { %s34_s25 = sshll.u32 %s5701_s24, 4  ;;  %s5702_s29 = smov 256   ;;  %s35_s25 = int_to_ptr.vmem [resolvable:$true] %s34_s25 }
   0x5   :  { %s5703_s30 = smov 16   ;;  %s5704_s7 = smov [#allocation11]  }
   0x6   :  { %40 = dma.hbm_to_vmem [thread:$0]  %s33_s23, 512, %s35_s25, [#allocation9], %s5702_s29, %s5702_s29, %s5703_s30  }
   0x7   :  { %s61_s8 = sshll.u32 %s5704_s7, 4  ;;  %s19_s11 = sshll.u32 %s6928_s0, 4  ;;  %s62_s8 = int_to_ptr.vmem [resolvable:$true] %s61_s8  ;;  %s20_s11 = int_to_ptr.hbm [resolvable:$true] %s19_s11 }
   0x8   :  { %64 = dma.hbm_to_vmem [thread:$0]  %s60_s28, 64, %s62_s8, [#allocation12]  }
   0x9   :  { %s5705_s1 = smov [#allocation5]   ;;  %s45_s3 = sshll.u32 %s6930_s2, 4  ;;  %s46_s3 = int_to_ptr.hbm [resolvable:$true] %s45_s3 }
   0xa   :  { %s21_s12 = sshll.u32 %s5705_s1, 4  ;;  %s5706_s15 = smov 64   ;;  %s22_s12 = int_to_ptr.vmem [resolvable:$true] %s21_s12 }
   0xb   :  { %s5707_s16 = smov 4   ;;  %s5708_s17 = smov [#allocation10]  }
   0xc   :  { %27 = dma.hbm_to_vmem [thread:$0]  %s20_s11, 1024, %s22_s12, [#allocation6], %s5706_s15, %s5706_s15, %s5707_s16  }
   0xd   :  { %s47_s18 = sshll.u32 %s5708_s17, 4  ;;  %s69_s0 = sshll.u32 %s6932_s4, 4  ;;  %s48_s18 = int_to_ptr.vmem [resolvable:$true] %s47_s18  ;;  %s70_s0 = int_to_ptr.hbm [resolvable:$true] %s69_s0 }
   0xe   :  { %53 = dma.hbm_to_vmem [thread:$0]  %s46_s3, 4096, %s48_s18, [#allocation9], %s5702_s29, %s5702_s29, %s5703_s30  }
   0xf   :  { %s5709_s21 = smov [#allocation13]  }
  0x10   :  { %s71_s22 = sshll.u32 %s5709_s21, 4  ;;  %s72_s22 = int_to_ptr.vmem [resolvable:$true] %s71_s22 }
  0x11   :  { %77 = dma.hbm_to_vmem [thread:$0]  %s70_s0, 1024, %s72_s22, [#allocation12], %s5706_s15, %s5706_s15, %s5707_s16  }
  0x12   :  { %5693 = dma.done.wait [#allocation6], 1024  }
  0x13   :  { %5694 = vsyncadd [#allocation6], 4294966272 }
  0x14   :  { %5695 = dma.done.wait [#allocation9], 4608  }
  0x15   :  { %5696 = vsyncadd [#allocation9], 4294962688 }
  0x16   :  { %5697 = dma.done.wait [#allocation12], 1088  }
  0x17   :  { %5698 = vsyncadd [#allocation12], 4294966208  ;;  %v3852_v0 = vld [vmem:[#allocation8] sm:$0xf]  ;;  %v5012_v1 = vld [vmem:[#allocation8 + $0xc] sm:$0xf0] }
  0x18   :  { %v3860_v2 = vld [vmem:[#allocation8 + $0x8] sm:$0xf]  ;;  %v3853_v3 = vor.u32 %v5012_v1, %v3852_v0  ;;  %v5013_v4 = vld [vmem:[#allocation8 + $0x14] sm:$0xf0]  ;;  %v5011_v5 = vld [vmem:[#allocation8 + $0xc] sm:$0xf] }
  0x19   :  { %v3862_v6 = vld [vmem:[#allocation8 + $0x18] sm:$0xf0]  ;;  %v3861_v7 = vor.u32 %v5013_v4, %v3860_v2  ;;  %v5002_v9 = vld [vmem:[#allocation5] sm:$0xff]  ;;  %vm199_vm0 = vcmask 130048   ;;  %v3854_v12 = vld [vmem:[#allocation8 + $0x10] sm:$0xf0] }
  0x1a   :  { %v3865_v8 = vor.u32 %v5011_v5, %v3862_v6  ;;  %v5764_v10 = vld [vmem:[#allocation5 + $0x38] sm:$0xff]  ;;  %v5010_v11 = vld [vmem:[#allocation8 + $0x4] sm:$0xf]  ;;  %231 = vmatpush.bf16.msra.mxu0 %v3853_v3  ;;  %5278 = vmatpush.bf16.msra.mxu1 %v3853_v3  ;;  %v4014_v15 = vld [vmem:[#allocation10 + $0xf0] sm:$0xf0]  ;;  %s5711_s23 = smov [#allocation14]  }
  0x1b   :  { %v5042_v13 = vld [vmem:[#allocation10 + $0xe4] sm:$0xf]  ;;  %329 = vmatpush.bf16.msra.mxu2 %v3861_v7  ;;  %v3857_v14 = vor.u32 %v5010_v11, %v3854_v12  ;;  %v5043_v16 = vld [vmem:[#allocation10 + $0xec] sm:$0xf]  ;;  %v4022_v17 = vld [vmem:[#allocation10 + $0xf8] sm:$0xf0] }
  0x1c   :  { %378 = vmatpush.bf16.msra.mxu3 %v3865_v8  ;;  %v4017_v18 = vor.u32 %v5042_v13, %v4014_v15  ;;  %v4025_v19 = vor.u32 %v5043_v16, %v4022_v17  ;;  %v4020_v20 = vld [vmem:[#allocation10 + $0xe8] sm:$0xf]  ;;  %v5045_v21 = vld [vmem:[#allocation10 + $0xf4] sm:$0xf0]  ;;  %v4012_v23 = vld [vmem:[#allocation10 + $0xe0] sm:$0xf] }
  0x1d   :  { %3866 = vmatmul.msk.bf16.vlgmr.msra.gmra.mxu0 %vm199_vm0, %v5002_v9  ;;  %3873 = vmatmul.msk.bf16.vlgmr.msra.gmra.mxu1 %vm199_vm0, %v5764_v10  ;;  %v4021_v22 = vor.u32 %v5045_v21, %v4020_v20  ;;  %v5044_v24 = vld [vmem:[#allocation10 + $0xec] sm:$0xf0]  ;;  %v5038_v25 = vld [vmem:[#allocation10 + $0xc4] sm:$0xf]  ;;  %v3998_v27 = vld [vmem:[#allocation10 + $0xd0] sm:$0xf0] }
  0x1e   :  { %280 = vmatpush.bf16.msrb.mxu1 %v3857_v14  ;;  %3882 = vmatmul.msk.bf16.vlgmr.msra.gmra.mxu2 %vm199_vm0, %v5002_v9  ;;  %v4013_v26 = vor.u32 %v5044_v24, %v4012_v23  ;;  %v5039_v28 = vld [vmem:[#allocation10 + $0xcc] sm:$0xf]  ;;  %v4006_v29 = vld [vmem:[#allocation10 + $0xd8] sm:$0xf0]  ;;  %v4001_v30 = vor.u32 %v5038_v25, %v3998_v27  ;;  %v3996_v32 = vld [vmem:[#allocation10 + $0xc0] sm:$0xf] }
  0x1f   :  { %3890 = vmatmul.msk.bf16.vlgmr.msra.gmra.mxu3 %vm199_vm0, %v5002_v9  ;;  %718 = vmatpush.bf16.msrb.mxu2 %v4021_v22  ;;  %v4009_v31 = vor.u32 %v5039_v28, %v4006_v29  ;;  %v5040_v33 = vld [vmem:[#allocation10 + $0xcc] sm:$0xf0]  ;;  %v4004_v34 = vld [vmem:[#allocation10 + $0xc8] sm:$0xf]  ;;  %v5041_v36 = vld [vmem:[#allocation10 + $0xd4] sm:$0xf0] }
  0x20   :  { %732 = vmatpush.bf16.msrb.mxu3 %v4025_v19  ;;  %690 = vmatpush.bf16.msrb.mxu0 %v4013_v26  ;;  %v3997_v35 = vor.u32 %v5040_v33, %v3996_v32  ;;  %v4005_v37 = vor.u32 %v5041_v36, %v4004_v34  ;;  %v5003_v38 = vld [vmem:[#allocation5 + $0x8] sm:$0xff]  ;;  %v5034_v39 = vld [vmem:[#allocation10 + $0xa4] sm:$0xf]  ;;  %v3982_v40 = vld [vmem:[#allocation10 + $0xb0] sm:$0xf0]  ;;  %s3794_s24 = sshll.u32 %s5711_s23, 4  ;;  %s3795_s24 = int_to_ptr.vmem [resolvable:$true] %s3794_s24 }
  0x21   :  { %v5035_v41 = vld [vmem:[#allocation10 + $0xac] sm:$0xf]  ;;  %v3985_v42 = vor.u32 %v5034_v39, %v3982_v40  ;;  %v3990_v43 = vld [vmem:[#allocation10 + $0xb8] sm:$0xf0]  ;;  %v3980_v44 = vld [vmem:[#allocation10 + $0xa0] sm:$0xf] }
  0x22   :  { %704 = vmatpush.bf16.msra.mxu1 %v4017_v18  ;;  %v5036_v45 = vld [vmem:[#allocation10 + $0xac] sm:$0xf0]  ;;  %v3993_v46 = vor.u32 %v5035_v41, %v3990_v43  ;;  %v3988_v48 = vld [vmem:[#allocation10 + $0xa8] sm:$0xf]  ;;  %v5037_v49 = vld [vmem:[#allocation10 + $0xb4] sm:$0xf0] }
  0x23   :  { %719 = vmatpush.bf16.msrb.mxu2 %v4005_v37  ;;  %v3981_v47 = vor.u32 %v5036_v45, %v3980_v44  ;;  %v3989_v50 = vor.u32 %v5037_v49, %v3988_v48  ;;  %v5004_v51 = vld [vmem:[#allocation5 + $0x10] sm:$0xff]  ;;  %v5030_v52 = vld [vmem:[#allocation10 + $0x84] sm:$0xf]  ;;  %v5031_v54 = vld [vmem:[#allocation10 + $0x8c] sm:$0xf]  ;;  %s3796_s27 = sshll.u32 %s6934_s6, 4  ;;  %s3797_s27 = int_to_ptr.hbm [resolvable:$true] %s3796_s27 }
  0x24   :  { %733 = vmatpush.bf16.msrb.mxu3 %v4009_v31  ;;  %691 = vmatpush.bf16.msrb.mxu0 %v3997_v35  ;;  %v3966_v53 = vld [vmem:[#allocation10 + $0x90] sm:$0xf0]  ;;  %v3974_v56 = vld [vmem:[#allocation10 + $0x98] sm:$0xf0]  ;;  %v3964_v57 = vld [vmem:[#allocation10 + $0x80] sm:$0xf] }
  0x25   :  { %v3969_v55 = vor.u32 %v5030_v52, %v3966_v53  ;;  %v5032_v58 = vld [vmem:[#allocation10 + $0x8c] sm:$0xf0]  ;;  %v3977_v59 = vor.u32 %v5031_v54, %v3974_v56  ;;  %v3972_v61 = vld [vmem:[#allocation10 + $0x88] sm:$0xf]  ;;  %v5033_v62 = vld [vmem:[#allocation10 + $0x94] sm:$0xf0] }
  0x26   :  { %705 = vmatpush.bf16.msra.mxu1 %v4001_v30  ;;  %v3965_v60 = vor.u32 %v5032_v58, %v3964_v57  ;;  %v3973_v63 = vor.u32 %v5033_v62, %v3972_v61  ;;  %v5005_v0 = vld [vmem:[#allocation5 + $0x18] sm:$0xff]  ;;  %v5026_v1 = vld [vmem:[#allocation10 + $0x64] sm:$0xf]  ;;  %v3950_v2 = vld [vmem:[#allocation10 + $0x70] sm:$0xf0]  ;;  %v5710_v53 = vmov 0.0|0.0  }
  0x27   :  { %720 = vmatpush.bf16.msrb.mxu2 %v3989_v50  ;;  %v5027_v3 = vld [vmem:[#allocation10 + $0x6c] sm:$0xf]  ;;  %v3953_v4 = vor.u32 %v5026_v1, %v3950_v2  ;;  %v3958_v5 = vld [vmem:[#allocation10 + $0x78] sm:$0xf0]  ;;  %v3948_v6 = vld [vmem:[#allocation10 + $0x60] sm:$0xf] }
  0x28   :  { %734 = vmatpush.bf16.msrb.mxu3 %v3993_v46  ;;  %692 = vmatpush.bf16.msrb.mxu0 %v3981_v47  ;;  %v5028_v7 = vld [vmem:[#allocation10 + $0x6c] sm:$0xf0]  ;;  %v3961_v8 = vor.u32 %v5027_v3, %v3958_v5  ;;  %v3956_v11 = vld [vmem:[#allocation10 + $0x68] sm:$0xf]  ;;  %v5029_v12 = vld [vmem:[#allocation10 + $0x74] sm:$0xf0] }
  0x29   :  { %v3957_v13 = vor.u32 %v5029_v12, %v3956_v11  ;;  %v5006_v14 = vld [vmem:[#allocation5 + $0x20] sm:$0xff]  ;;  %v3934_v16 = vld [vmem:[#allocation10 + $0x50] sm:$0xf0]  ;;  %v5024_v19 = vld [vmem:[#allocation10 + $0x4c] sm:$0xf0]  ;;  %s5712_s28 = smov 128  }
  0x2a   :  { %706 = vmatpush.bf16.msra.mxu1 %v3985_v42  ;;  %v5022_v15 = vld [vmem:[#allocation10 + $0x44] sm:$0xf]  ;;  %v3932_v17 = vld [vmem:[#allocation10 + $0x40] sm:$0xf]  ;;  %v5023_v20 = vld [vmem:[#allocation10 + $0x4c] sm:$0xf] }
  0x2b   :  { %721 = vmatpush.bf16.msrb.mxu2 %v3973_v63  ;;  %v3937_v18 = vor.u32 %v5022_v15, %v3934_v16  ;;  %v3942_v21 = vld [vmem:[#allocation10 + $0x58] sm:$0xf0]  ;;  %v3933_v22 = vor.u32 %v5024_v19, %v3932_v17  ;;  %v3916_v24 = vld [vmem:[#allocation10 + $0x20] sm:$0xf]  ;;  %v5020_v25 = vld [vmem:[#allocation10 + $0x2c] sm:$0xf0] }
  0x2c   :  { %735 = vmatpush.bf16.msrb.mxu3 %v3977_v59  ;;  %693 = vmatpush.bf16.msrb.mxu0 %v3965_v60  ;;  %v3945_v23 = vor.u32 %v5023_v20, %v3942_v21  ;;  %v3940_v26 = vld [vmem:[#allocation10 + $0x48] sm:$0xf]  ;;  %v5025_v27 = vld [vmem:[#allocation10 + $0x54] sm:$0xf0]  ;;  %v3917_v28 = vor.u32 %v5020_v25, %v3916_v24  ;;  %v3900_v30 = vld [vmem:[#allocation10] sm:$0xf] }
  0x2d   :  { %3867 = vmatmul.msk.bf16.gmra.mxu0 %vm199_vm0, %v5003_v38  ;;  %3874 = vmatmul.msk.bf16.vlgmr.msrb.gmra.mxu1 %vm199_vm0, %v5002_v9  ;;  %v3949_v9 = vor.u32 %v5028_v7, %v3948_v6  ;;  %v3941_v29 = vor.u32 %v5025_v27, %v3940_v26  ;;  %v5016_v31 = vld [vmem:[#allocation10 + $0xc] sm:$0xf0]  ;;  %v5007_v33 = vld [vmem:[#allocation5 + $0x28] sm:$0xff]  ;;  %v5018_v34 = vld [vmem:[#allocation10 + $0x24] sm:$0xf]  ;;  %s5713_s29 = smov 8  }
  0x2e   :  { %3883 = vmatmul.msk.bf16.gmra.mxu2 %vm199_vm0, %v5003_v38  ;;  %707 = vmatpush.bf16.msra.mxu1 %v3969_v55  ;;  %v3901_v32 = vor.u32 %v5016_v31, %v3900_v30  ;;  %v3918_v35 = vld [vmem:[#allocation10 + $0x30] sm:$0xf0]  ;;  %v5019_v36 = vld [vmem:[#allocation10 + $0x2c] sm:$0xf]  ;;  %v3924_v39 = vld [vmem:[#allocation10 + $0x28] sm:$0xf] }
  0x2f   :  { %3891 = vmatmul.msk.bf16.gmra.mxu3 %vm199_vm0, %v5003_v38  ;;  %722 = vmatpush.bf16.msrb.mxu2 %v3957_v13  ;;  %v3921_v37 = vor.u32 %v5018_v34, %v3918_v35  ;;  %v5021_v40 = vld [vmem:[#allocation10 + $0x34] sm:$0xf0]  ;;  %v5008_v43 = vld [vmem:[#allocation5 + $0x30] sm:$0xff]  ;;  %v3908_v44 = vld [vmem:[#allocation10 + $0x8] sm:$0xf] }
  0x30   :  { %736 = vmatpush.bf16.msrb.mxu3 %v3961_v8  ;;  %694 = vmatpush.bf16.msrb.mxu0 %v3949_v9  ;;  %v3925_v42 = vor.u32 %v5021_v40, %v3924_v39  ;;  %v5017_v45 = vld [vmem:[#allocation10 + $0x14] sm:$0xf0]  ;;  %v5015_v46 = vld [vmem:[#allocation10 + $0xc] sm:$0xf]  ;;  %v3910_v48 = vld [vmem:[#allocation10 + $0x18] sm:$0xf0] }
  0x31   :  { %v3909_v47 = vor.u32 %v5017_v45, %v3908_v44  ;;  %v3913_v49 = vor.u32 %v5015_v46, %v3910_v48  ;;  %v5014_v50 = vld [vmem:[#allocation10 + $0x4] sm:$0xf]  ;;  %v129_v44 = vld [vmem:[#allocation11] sm:$0xf] }
  0x32   :  { %708 = vmatpush.bf16.msra.mxu1 %v3953_v4  ;;  %v5908_v45 = vperm.slane %v129_v44, 0 }
  0x33   :  { %723 = vmatpush.bf16.msrb.mxu2 %v3941_v29 }
  0x34   :  { %695 = vmatpush.bf16.msrb.mxu0 %v3933_v22  ;;  %737 = vmatpush.bf16.msrb.mxu3 %v3945_v23 }
  0x36   :  { %709 = vmatpush.bf16.msra.mxu1 %v3937_v18 }
  0x37   :  { %724 = vmatpush.bf16.msrb.mxu2 %v3925_v42 }
  0x38   :  { %696 = vmatpush.bf16.msrb.mxu0 %v3917_v28 }
  0x3a   :  { %710 = vmatpush.bf16.msra.mxu1 %v3921_v37 }
  0x3b   :  { %725 = vmatpush.bf16.msrb.mxu2 %v3909_v47 }
  0x3c   :  { %697 = vmatpush.bf16.msrb.mxu0 %v3901_v32 }
  0x3d   :  { %3868 = vmatmul.msk.bf16.gmra.mxu0 %vm199_vm0, %v5004_v51  ;;  %3875 = vmatmul.msk.bf16.gmra.mxu1 %vm199_vm0, %v5003_v38  ;;  %v3926_v38 = vld [vmem:[#allocation10 + $0x38] sm:$0xf0] }
  0x3e   :  { %3884 = vmatmul.msk.bf16.gmra.mxu2 %vm199_vm0, %v5004_v51  ;;  %v3929_v41 = vor.u32 %v5019_v36, %v3926_v38 }
  0x3f   :  { %3892 = vmatmul.msk.bf16.gmra.mxu3 %vm199_vm0, %v5004_v51 }
  0x40   :  { %738 = vmatpush.bf16.msrb.mxu3 %v3929_v41 }
  0x44   :  { %739 = vmatpush.bf16.msrb.mxu3 %v3913_v49 }
  0x4d   :  { %3869 = vmatmul.msk.bf16.gmra.mxu0 %vm199_vm0, %v5005_v0  ;;  %3876 = vmatmul.msk.bf16.gmra.mxu1 %vm199_vm0, %v5004_v51  ;;  %v3902_v51 = vld [vmem:[#allocation10 + $0x10] sm:$0xf0] }
  0x4e   :  { %3885 = vmatmul.msk.bf16.gmra.mxu2 %vm199_vm0, %v5005_v0  ;;  %v3905_v52 = vor.u32 %v5014_v50, %v3902_v51 }
  0x4f   :  { %3893 = vmatmul.msk.bf16.gmra.mxu3 %vm199_vm0, %v5005_v0 }
  0x50   :  { %711 = vmatpush.bf16.msra.mxu1 %v3905_v52 }
  0x5d   :  { %3870 = vmatmul.msk.bf16.gmra.mxu0 %vm199_vm0, %v5006_v14  ;;  %3877 = vmatmul.msk.bf16.gmra.mxu1 %vm199_vm0, %v5005_v0 }
  0x5e   :  { %3886 = vmatmul.msk.bf16.gmra.mxu2 %vm199_vm0, %v5006_v14 }
  0x5f   :  { %3894 = vmatmul.msk.bf16.gmra.mxu3 %vm199_vm0, %v5006_v14 }
  0x6d   :  { %3871 = vmatmul.msk.bf16.gmra.mxu0 %vm199_vm0, %v5007_v33  ;;  %3878 = vmatmul.msk.bf16.gmra.mxu1 %vm199_vm0, %v5006_v14 }
  0x6e   :  { %3887 = vmatmul.msk.bf16.gmra.mxu2 %vm199_vm0, %v5007_v33 }
  0x6f   :  { %3895 = vmatmul.msk.bf16.gmra.mxu3 %vm199_vm0, %v5007_v33 }
  0x7d   :  { %3872 = vmatmul.msk.bf16.gmra.mxu0 %vm199_vm0, %v5008_v43  ;;  %3879 = vmatmul.msk.bf16.gmra.mxu1 %vm199_vm0, %v5007_v33 }
  0x7e   :  { %3888 = vmatmul.msk.bf16.gmra.mxu2 %vm199_vm0, %v5008_v43 }
  0x7f   :  { %3896 = vmatmul.msk.bf16.gmra.mxu3 %vm199_vm0, %v5008_v43 }
  0x8d   :  { %3880 = vmatmul.msk.bf16.gmra.mxu1 %vm199_vm0, %v5008_v43  ;;  %698 = vmatmul.bf16.vlgmr.msrb.gmra.mxu0 %v5710_v53 }
  0x8e   :  { %3889 = vmatmul.msk.bf16.gmra.mxu2 %vm199_vm0, %v5764_v10 }
  0x8f   :  { %3897 = vmatmul.msk.bf16.gmra.mxu3 %vm199_vm0, %v5764_v10 }
  0x9a   :  { %v233_v54 = vpop.f32.mrf.mxu0  ;;  %v5800_v55 = vpop.f32.mrf.mxu1 }
  0x9b   :  { %6935 = vst [vmem:[#allocation19_spill] sm:$0xff] %v5800_v55  ;;  %v234_v46 = vadd.f32 %v233_v54, %v5908_v45 }
  0x9d   :  { %3881 = vmatmul.msk.bf16.gmra.mxu1 %vm199_vm0, %v5764_v10 }
  0x9e   :  { %726 = vmatmul.bf16.vlgmr.msrb.gmra.mxu2 %v5710_v53 }
  0x9f   :  { %740 = vmatmul.bf16.vlgmr.msrb.gmra.mxu3 %v5710_v53 }
  0xa1   :  { %v5804_v56 = vpop.f32.mrf.mxu2 }
  0xa2   :  { %v5806_v57 = vpop.f32.mrf.mxu3  ;;  %v5808_v58 = vpop.f32.mrf.mxu0 }
  0xa3   :  { %v5810_v59 = vpop.f32.mrf.mxu1 }
  0xa4   :  { %6936 = vst [vmem:[#allocation20_spill] sm:$0xff] %v5810_v59 }
  0xa9   :  { %v5812_v60 = vpop.f32.mrf.mxu2 }
  0xaa   :  { %v5814_v61 = vpop.f32.mrf.mxu3  ;;  %v5816_v62 = vpop.f32.mrf.mxu0 }
  0xab   :  { %v5818_v63 = vpop.f32.mrf.mxu1 }
  0xad   :  { %712 = vmatmul.bf16.vlgmr.msra.gmra.mxu1 %v5710_v53 }
  0xb1   :  { %v5820_v10 = vpop.f32.mrf.mxu2 }
  0xb2   :  { %v5822_v0 = vpop.f32.mrf.mxu3  ;;  %v5824_v1 = vpop.f32.mrf.mxu0 }
  0xb3   :  { %v5826_v2 = vpop.f32.mrf.mxu1 }
  0xb9   :  { %v5828_v3 = vpop.f32.mrf.mxu2 }
  0xba   :  { %v5830_v4 = vpop.f32.mrf.mxu3  ;;  %v5832_v5 = vpop.f32.mrf.mxu0 }
  0xbb   :  { %v5834_v6 = vpop.f32.mrf.mxu1 }
  0xc1   :  { %v5836_v7 = vpop.f32.mrf.mxu2 }
  0xc2   :  { %v5838_v8 = vpop.f32.mrf.mxu3  ;;  %v5840_v9 = vpop.f32.mrf.mxu0 }
  0xc3   :  { %v5842_v11 = vpop.f32.mrf.mxu1 }
  0xc9   :  { %v5844_v12 = vpop.f32.mrf.mxu2 }
  0xca   :  { %v5846_v13 = vpop.f32.mrf.mxu3  ;;  %v5848_v14 = vpop.f32.mrf.mxu0 }
  0xcb   :  { %v5850_v15 = vpop.f32.mrf.mxu1 }
  0xd1   :  { %v5852_v16 = vpop.f32.mrf.mxu2 }
  0xd2   :  { %v5854_v17 = vpop.f32.mrf.mxu3  ;;  %v5856_v18 = vpop.f32.mrf.mxu0 }
  0xd3   :  { %v5858_v19 = vpop.f32.mrf.mxu1 }
  0xd9   :  { %v5860_v20 = vpop.f32.mrf.mxu2 }
  0xda   :  { %v5862_v21 = vpop.f32.mrf.mxu3  ;;  %v5864_v22 = vpop.f32.mrf.mxu0 }
  0xdb   :  { %v5866_v23 = vpop.f32.mrf.mxu1 }
  0xe1   :  { %v5868_v24 = vpop.f32.mrf.mxu2 }
  0xe2   :  { %6937 = vst [vmem:[#allocation21_spill] sm:$0xff] %v5868_v24  ;;  %v5870_v25 = vpop.f32.mrf.mxu3  ;;  %v5872_v26 = vpop.f32.mrf.mxu0  ;;  %v5939_v24 = vperm.slane %v129_v44, 1 }
  0xe3   :  { %v5874_v27 = vpop.f32.mrf.mxu1 }
  0xe9   :  { %v5876_v28 = vpop.f32.mrf.mxu2 }
  0xea   :  { %6938 = vst [vmem:[#allocation22_spill] sm:$0xff] %v5876_v28  ;;  %v5878_v29 = vpop.f32.mrf.mxu3  ;;  %v5880_v30 = vpop.f32.mrf.mxu0 }
  0xeb   :  { %6939 = vst [vmem:[#allocation23_spill] sm:$0xff] %v5878_v29  ;;  %v5882_v31 = vpop.f32.mrf.mxu1  ;;  %v5070_v29 = vld [vmem:[#allocation10 + $0xc4] sm:$0xf] }
  0xec   :  { %6940 = vst [vmem:[#allocation24_spill] sm:$0xff] %v5880_v30  ;;  %v4156_v30 = vld [vmem:[#allocation10 + $0xf8] sm:$0xf0] }
  0xf1   :  { %v5884_v32 = vpop.f32.mrf.mxu2 }
  0xf2   :  { %6941 = vst [vmem:[#allocation25_spill] sm:$0xff] %v5884_v32  ;;  %v5886_v33 = vpop.f32.mrf.mxu3  ;;  %v5888_v34 = vpop.f32.mrf.mxu0  ;;  %v4148_v32 = vld [vmem:[#allocation10 + $0xf0] sm:$0xf0] }
  0xf3   :  { %6942 = vst [vmem:[#allocation26_spill] sm:$0xff] %v5886_v33  ;;  %v5890_v35 = vpop.f32.mrf.mxu1  ;;  %v5077_v33 = vld [vmem:[#allocation10 + $0xf4] sm:$0xf0] }
  0xf4   :  { %6943 = vst [vmem:[#allocation27_spill] sm:$0xff] %v5888_v34 }
  0xf9   :  { %v5892_v36 = vpop.f32.mrf.mxu2 }
  0xfa   :  { %6944 = vst [vmem:[#allocation28_spill] sm:$0xff] %v5892_v36  ;;  %v5894_v37 = vpop.f32.mrf.mxu3  ;;  %v5896_v38 = vpop.f32.mrf.mxu0 }
  0xfb   :  { %6945 = vst [vmem:[#allocation29_spill] sm:$0xff] %v5894_v37  ;;  %v5898_v39 = vpop.f32.mrf.mxu1  ;;  %v5074_v37 = vld [vmem:[#allocation10 + $0xe4] sm:$0xf] }
  0xfc   :  { %6946 = vst [vmem:[#allocation30_spill] sm:$0xff] %v5896_v38 }
  0xfd   :  { %6947 = vst [vmem:[#allocation31_spill] sm:$0xff] %v5898_v39  ;;  %v5075_v39 = vld [vmem:[#allocation10 + $0xec] sm:$0xf] }
  0xfe   :  { %v4159_v28 = vor.u32 %v5075_v39, %v4156_v30  ;;  %v5073_v30 = vld [vmem:[#allocation10 + $0xd4] sm:$0xf0]  ;;  %v5071_v39 = vld [vmem:[#allocation10 + $0xcc] sm:$0xf] }
 0x100   :  { %1134 = vmatpush.bf16.msra.mxu3 %v4159_v28 }
 0x101   :  { %v5900_v40 = vpop.f32.mrf.mxu2 }
 0x102   :  { %6948 = vst [vmem:[#allocation32_spill] sm:$0xff] %v5900_v40  ;;  %v5902_v41 = vpop.f32.mrf.mxu3  ;;  %v5904_v42 = vpop.f32.mrf.mxu0 }
 0x103   :  { %6949 = vst [vmem:[#allocation33_spill] sm:$0xff] %v5902_v41  ;;  %v5906_v43 = vpop.f32.mrf.mxu1 }
 0x104   :  { %6950 = vst [vmem:[#allocation34_spill] sm:$0xff] %v5904_v42 }
 0x105   :  { %6951 = vst [vmem:[#allocation35_spill] sm:$0xff] %v5906_v43  ;;  %v4154_v43 = vld [vmem:[#allocation10 + $0xe8] sm:$0xf] }
 0x109   :  { %v5911_v47 = vpop.f32.mrf.mxu2 }
 0x10a   :  { %6952 = vst [vmem:[#allocation36_spill] sm:$0xff] %v5911_v47  ;;  %v5913_v48 = vpop.f32.mrf.mxu3  ;;  %v699_v49 = vpop.f32.mrf.mxu0  ;;  %v236_v47 = vadd.f32 %v5808_v58, %v5908_v45 }
 0x10b   :  { %6953 = vst [vmem:[#allocation37_spill] sm:$0xff] %v5913_v48  ;;  %v5915_v50 = vpop.f32.mrf.mxu1  ;;  %v746_v51 = vadd.f32 %v699_v49, %v234_v46 }
 0x10c   :  { %6954 = vst [vmem:[#allocation38_spill] sm:$0xff] %v5915_v50  ;;  %v4146_v50 = vld [vmem:[#allocation10 + $0xe0] sm:$0xf] }
 0x10d   :  { %v4026_v52 = vmul.f32 -1.442695, %v746_v51  ;;  %v5931_v51 = vperm.slane %v129_v44, 2 }
 0x10f   :  { %5293 = vpow2.f32 %v4026_v52 }
 0x111   :  { %v5917_v53 = vpop.f32.mrf.mxu2 }
 0x112   :  { %6955 = vst [vmem:[#allocation39_spill] sm:$0xff] %v5917_v53  ;;  %v5919_v59 = vpop.f32.mrf.mxu3  ;;  %v701_v54 = vpop.f32.mrf.mxu0 }
 0x113   :  { %6956 = vst [vmem:[#allocation40_spill] sm:$0xff] %v5919_v59  ;;  %v5921_v55 = vpop.f32.mrf.mxu1  ;;  %v750_v46 = vadd.f32 %v701_v54, %v236_v47 }
 0x114   :  { %6957 = vst [vmem:[#allocation41_spill] sm:$0xff] %v5921_v55  ;;  %v5935_v55 = vperm.slane %v129_v44, 3 }
 0x115   :  { %v5294_v40 = vpop.eup %5293  ;;  %v4027_v59 = vmul.f32 -1.442695, %v750_v46 }
 0x116   :  { %v760_v42 = vadd.f32 1.0, %v5294_v40  ;;  %v332_v40 = vadd.f32 %v5804_v56, %v5931_v51  ;;  %v4151_v56 = vor.u32 %v5074_v37, %v4148_v32  ;;  %v381_v44 = vadd.f32 %v5806_v57, %v5935_v55 }
 0x117   :  { %v383_v28 = vadd.f32 %v5814_v61, %v5935_v55 }
 0x118   :  { %5295 = vrcp.f32 %v760_v42  ;;  %v773_v36 = vand.u32 2147483648, %v760_v42  ;;  %v771_v47 = vand.u32 2147483647, %v760_v42  ;;  %vm767_vm2 = vweird.f32 %v760_v42  ;;  %1106 = vmatpush.bf16.msrb.mxu1 %v4151_v56  ;;  %v5068_v56 = vld [vmem:[#allocation10 + $0xac] sm:$0xf0] }
 0x119   :  { %v5925_v48 = vpop.f32.mrf.mxu2  ;;  %5297 = vpow2.f32 %v4027_v59 }
 0x11a   :  { %6958 = vst [vmem:[#allocation42_spill] sm:$0xff] %v5925_v48  ;;  %v5927_v41 = vpop.f32.mrf.mxu3  ;;  %v5076_v48 = vld [vmem:[#allocation10 + $0xec] sm:$0xf0]  ;;  %v774_v32 = vor.u32 1.1754944e-38, %v773_v36  ;;  %vm772_vm4 = vcmp.eq.f32.partialorder %v771_v47, 8.507059e+37 }
 0x11b   :  { %6959 = vst [vmem:[#allocation43_spill] sm:$0xff] %v5927_v41  ;;  %v5929_v49 = vpop.f32.mrf.mxu1 }
 0x11c   :  { %6960 = vst [vmem:[#allocation44_spill] sm:$0xff] %v5929_v49  ;;  %v4147_v49 = vor.u32 %v5076_v48, %v4146_v50 }
 0x11e   :  { %v5296_v52 = vpop.eup %5295  ;;  %1092 = vmatpush.bf16.msra.mxu0 %v4147_v49 }
 0x11f   :  { %v763_v53 = vmul.f32 %v5296_v52, %v760_v42  ;;  %vm768_vm1 = vweird.f32 %v5296_v52  ;;  %v4138_v42 = vld [vmem:[#allocation10 + $0xc8] sm:$0xf] }
 0x120   :  { %vm5942_vm3 = vmor %vm767_vm2, %vm768_vm1  ;;  %v4139_v36 = vor.u32 %v5073_v30, %v4138_v42 }
 0x121   :  { %v764_v38 = vsub.f32 1.0, %v763_v53  ;;  %v727_v58 = vpop.f32.mrf.mxu2  ;;  %v4155_v53 = vor.u32 %v5077_v33, %v4154_v43 }
 0x122   :  { %v748_v41 = vadd.f32 %v727_v58, %v332_v40  ;;  %v741_v54 = vpop.f32.mrf.mxu3  ;;  %v4130_v40 = vld [vmem:[#allocation10 + $0xc0] sm:$0xf]  ;;  %v5072_v58 = vld [vmem:[#allocation10 + $0xcc] sm:$0xf0] }
 0x123   :  { %v765_v46 = vmul.f32 %v5296_v52, %v764_v38  ;;  %v5937_v34 = vpop.f32.mrf.mxu1  ;;  %v4131_v37 = vor.u32 %v5072_v58, %v4130_v40  ;;  %v4132_v38 = vld [vmem:[#allocation10 + $0xd0] sm:$0xf0]  ;;  %1120 = vmatpush.bf16.msra.mxu2 %v4155_v53  ;;  %v5298_v40 = vpop.eup %5297  ;;  %v5066_v53 = vld [vmem:[#allocation10 + $0xa4] sm:$0xf]  ;;  %v749_v47 = vadd.f32 %v741_v54, %v381_v44 }
 0x124   :  { %6961 = vst [vmem:[#allocation45_spill] sm:$0xff] %v5937_v34  ;;  %5299 = vtanh.f32 %v748_v41  ;;  %v4135_v33 = vor.u32 %v5070_v29, %v4132_v38  ;;  %v4140_v41 = vld [vmem:[#allocation10 + $0xd8] sm:$0xf0]  ;;  %v4116_v58 = vld [vmem:[#allocation10 + $0xb0] sm:$0xf0]  ;;  %v5956_v54 = vadd.f32 1.0, %v5298_v40 }
 0x125   :  { %v766_v48 = vadd.f32 %v5296_v52, %v765_v46  ;;  %1093 = vmatpush.bf16.msra.mxu0 %v4131_v37  ;;  %v4143_v49 = vor.u32 %v5071_v39, %v4140_v41  ;;  %v4114_v46 = vld [vmem:[#allocation10 + $0xa0] sm:$0xf]  ;;  %v5069_v37 = vld [vmem:[#allocation10 + $0xb4] sm:$0xf0]  ;;  %v5067_v38 = vld [vmem:[#allocation10 + $0xac] sm:$0xf] }
 0x126   :  { %1107 = vmatpush.bf16.msrb.mxu1 %v4135_v33  ;;  %v4115_v29 = vor.u32 %v5068_v56, %v4114_v46  ;;  %v4124_v39 = vld [vmem:[#allocation10 + $0xb8] sm:$0xf0]  ;;  %v4098_v46 = vld [vmem:[#allocation10 + $0x80] sm:$0xf]  ;;  %v5064_v56 = vld [vmem:[#allocation10 + $0x8c] sm:$0xf0]  ;;  %vm782_vm7 = vweird.f32 %v5956_v54 }
 0x127   :  { %v770_v43 = vsel %vm5942_vm3, %v5296_v52, %v766_v48  ;;  %v283_v52 = vadd.f32 %v5818_v63, %v5939_v24  ;;  %1121 = vmatpush.bf16.msra.mxu2 %v4139_v36  ;;  %1135 = vmatpush.bf16.msra.mxu3 %v4143_v49  ;;  %v4119_v48 = vor.u32 %v5066_v53, %v4116_v58  ;;  %v5062_v63 = vld [vmem:[#allocation10 + $0x84] sm:$0xf]  ;;  %v4100_v36 = vld [vmem:[#allocation10 + $0x90] sm:$0xf0]  ;;  %v4106_v49 = vld [vmem:[#allocation10 + $0x88] sm:$0xf] }
 0x128   :  { %v775_v50 = vsel %vm772_vm4, %v774_v32, %v770_v43  ;;  %v4122_v32 = vld [vmem:[#allocation10 + $0xa8] sm:$0xf]  ;;  %v4127_v43 = vor.u32 %v5067_v38, %v4124_v39  ;;  %v4099_v44 = vor.u32 %v5064_v56, %v4098_v46  ;;  %v4030_v53 = vmul.f32 -1.442695, %v749_v47  ;;  %v5060_v38 = vld [vmem:[#allocation10 + $0x6c] sm:$0xf0] }
 0x129   :  { %v4123_v33 = vor.u32 %v5069_v37, %v4122_v32  ;;  %1094 = vmatpush.bf16.msra.mxu0 %v4115_v29  ;;  %v4108_v29 = vld [vmem:[#allocation10 + $0x98] sm:$0xf0]  ;;  %v4082_v37 = vld [vmem:[#allocation10 + $0x60] sm:$0xf]  ;;  %v5058_v40 = vld [vmem:[#allocation10 + $0x64] sm:$0xf] }
 0x12a   :  { %v5300_v59 = vpop.eup %5299  ;;  %v743_v57 = vpop.f32.mrf.mxu3  ;;  %1108 = vmatpush.bf16.msrb.mxu1 %v4119_v48  ;;  %v4083_v48 = vor.u32 %v5060_v38, %v4082_v37  ;;  %v4090_v39 = vld [vmem:[#allocation10 + $0x68] sm:$0xf]  ;;  %v5061_v47 = vld [vmem:[#allocation10 + $0x74] sm:$0xf0]  ;;  %v4092_v46 = vld [vmem:[#allocation10 + $0x78] sm:$0xf0] }
 0x12b   :  { %v5954_v42 = vmul.f32 %v5300_v59, %v775_v50  ;;  %v753_v30 = vadd.f32 %v743_v57, %v383_v28  ;;  %v713_v61 = vpop.f32.mrf.mxu1  ;;  %1122 = vmatpush.bf16.msra.mxu2 %v4123_v33  ;;  %1136 = vmatpush.bf16.msra.mxu3 %v4127_v43  ;;  %v4103_v50 = vor.u32 %v5062_v63, %v4100_v36  ;;  %v5065_v28 = vld [vmem:[#allocation10 + $0x94] sm:$0xf0]  ;;  %v5059_v43 = vld [vmem:[#allocation10 + $0x6c] sm:$0xf]  ;;  %v5056_v36 = vld [vmem:[#allocation10 + $0x4c] sm:$0xf0] }
 0x12c   :  { %v747_v41 = vadd.f32 %v713_v61, %v283_v52  ;;  %v4107_v57 = vor.u32 %v5065_v28, %v4106_v49  ;;  %v5063_v52 = vld [vmem:[#allocation10 + $0x8c] sm:$0xf]  ;;  %v4084_v61 = vld [vmem:[#allocation10 + $0x70] sm:$0xf0]  ;;  %v285_v33 = vadd.f32 %v5826_v2, %v5939_v24  ;;  %v4095_v63 = vor.u32 %v5059_v43, %v4092_v46  ;;  %v5054_v49 = vld [vmem:[#allocation10 + $0x44] sm:$0xf] }
 0x12d   :  { %v4031_v59 = vmul.f32 -1.442695, %v753_v30  ;;  %1095 = vmatpush.bf16.msra.mxu0 %v4099_v44  ;;  %v4111_v32 = vor.u32 %v5063_v52, %v4108_v29  ;;  %v4087_v30 = vor.u32 %v5058_v40, %v4084_v61  ;;  %v4066_v44 = vld [vmem:[#allocation10 + $0x40] sm:$0xf]  ;;  %v4068_v28 = vld [vmem:[#allocation10 + $0x50] sm:$0xf0] }
 0x12e   :  { %v4028_v58 = vmul.f32 -1.442695, %v747_v41  ;;  %1109 = vmatpush.bf16.msrb.mxu1 %v4103_v50  ;;  %v4091_v41 = vor.u32 %v5061_v47, %v4090_v39  ;;  %v4067_v50 = vor.u32 %v5056_v36, %v4066_v44  ;;  %v4074_v2 = vld [vmem:[#allocation10 + $0x48] sm:$0xf]  ;;  %v5057_v52 = vld [vmem:[#allocation10 + $0x54] sm:$0xf0] }
 0x12f   :  { %1123 = vmatpush.bf16.msra.mxu2 %v4107_v57  ;;  %1137 = vmatpush.bf16.msra.mxu3 %v4111_v32  ;;  %v4071_v57 = vor.u32 %v5054_v49, %v4068_v28  ;;  %v5055_v29 = vld [vmem:[#allocation10 + $0x4c] sm:$0xf]  ;;  %v4076_v32 = vld [vmem:[#allocation10 + $0x58] sm:$0xf0]  ;;  %v4050_v37 = vld [vmem:[#allocation10 + $0x20] sm:$0xf] }
 0x130   :  { %5301 = vpow2.f32 %v4028_v58  ;;  %v4079_v40 = vor.u32 %v5055_v29, %v4076_v32  ;;  %v5052_v61 = vld [vmem:[#allocation10 + $0x2c] sm:$0xf0]  ;;  %v5050_v47 = vld [vmem:[#allocation10 + $0x24] sm:$0xf]  ;;  %v5053_v46 = vld [vmem:[#allocation10 + $0x34] sm:$0xf0] }
 0x131   :  { %5303 = vrcp.f32 %v5956_v54  ;;  %1096 = vmatpush.bf16.msra.mxu0 %v4083_v48  ;;  %v4034_v36 = vld [vmem:[#allocation10] sm:$0xf]  ;;  %v5048_v28 = vld [vmem:[#allocation10 + $0xc] sm:$0xf0]  ;;  %v4036_v29 = vld [vmem:[#allocation10 + $0x10] sm:$0xf0] }
 0x132   :  { %5305 = vpow2.f32 %v4030_v53  ;;  %1110 = vmatpush.bf16.msrb.mxu1 %v4087_v30  ;;  %v4075_v53 = vor.u32 %v5057_v52, %v4074_v2  ;;  %v4051_v30 = vor.u32 %v5052_v61, %v4050_v37  ;;  %v5046_v52 = vld [vmem:[#allocation10 + $0x4] sm:$0xf]  ;;  %v5047_v61 = vld [vmem:[#allocation10 + $0xc] sm:$0xf] }
 0x133   :  { %v715_v56 = vpop.f32.mrf.mxu1  ;;  %5307 = vpow2.f32 %v4031_v59  ;;  %1124 = vmatpush.bf16.msra.mxu2 %v4091_v41  ;;  %1138 = vmatpush.bf16.msra.mxu3 %v4095_v63  ;;  %v4052_v59 = vld [vmem:[#allocation10 + $0x30] sm:$0xf0]  ;;  %v4060_v63 = vld [vmem:[#allocation10 + $0x38] sm:$0xf0] }
 0x134   :  { %v751_v58 = vadd.f32 %v715_v56, %v285_v33  ;;  %v4058_v33 = vld [vmem:[#allocation10 + $0x28] sm:$0xf]  ;;  %v5051_v56 = vld [vmem:[#allocation10 + $0x2c] sm:$0xf]  ;;  %v4055_v41 = vor.u32 %v5050_v47, %v4052_v59 }
 0x135   :  { %1097 = vmatpush.bf16.msra.mxu0 %v4067_v50  ;;  %v4063_v2 = vor.u32 %v5051_v56, %v4060_v63  ;;  %v4042_v50 = vld [vmem:[#allocation10 + $0x8] sm:$0xf] }
 0x136   :  { %v4029_v38 = vmul.f32 -1.442695, %v751_v58  ;;  %v5302_v39 = vpop.eup %5301  ;;  %1111 = vmatpush.bf16.msrb.mxu1 %v4071_v57  ;;  %v4059_v58 = vor.u32 %v5053_v46, %v4058_v33  ;;  %v4035_v57 = vor.u32 %v5048_v28, %v4034_v36  ;;  %v334_v36 = vadd.f32 %v5812_v60, %v5931_v51 }
 0x137   :  { %v5961_v48 = vpop.eup %5303  ;;  %v5963_v43 = vadd.f32 1.0, %v5302_v39  ;;  %1125 = vmatpush.bf16.msra.mxu2 %v4075_v53  ;;  %1139 = vmatpush.bf16.msra.mxu3 %v4079_v40  ;;  %v4039_v53 = vor.u32 %v5046_v52, %v4036_v29  ;;  %v4044_v40 = vld [vmem:[#allocation10 + $0x18] sm:$0xf0] }
 0x138   :  { %v5306_v44 = vpop.eup %5305  ;;  %5309 = vpow2.f32 %v4029_v38  ;;  %v778_v32 = vmul.f32 %v5961_v48, %v5956_v54  ;;  %v5049_v38 = vld [vmem:[#allocation10 + $0x14] sm:$0xf0]  ;;  %v4047_v59 = vor.u32 %v5047_v61, %v4044_v40  ;;  %vm783_vm8 = vweird.f32 %v5961_v48 }
 0x139   :  { %v5308_v49 = vpop.eup %5307  ;;  %5311 = vrcp.f32 %v5963_v43  ;;  %v5968_v37 = vadd.f32 1.0, %v5306_v44  ;;  %1098 = vmatpush.bf16.msra.mxu0 %v4051_v30  ;;  %v4043_v47 = vor.u32 %v5049_v38, %v4042_v50  ;;  %vm805_vm6 = vweird.f32 %v5963_v43  ;;  %vm5993_vm11 = vmor %vm782_vm7, %vm783_vm8 }
 0x13a   :  { %v5970_v39 = vadd.f32 1.0, %v5308_v49  ;;  %1112 = vmatpush.bf16.msrb.mxu1 %v4055_v41  ;;  %v779_v56 = vsub.f32 1.0, %v778_v32  ;;  %v729_v41 = vpop.f32.mrf.mxu2  ;;  %v788_v61 = vand.u32 2147483648, %v5956_v54 }
 0x13b   :  { %1126 = vmatpush.bf16.msra.mxu2 %v4059_v58  ;;  %1140 = vmatpush.bf16.msra.mxu3 %v4063_v2  ;;  %5313 = vrcp.f32 %v5968_v37  ;;  %v811_v58 = vand.u32 2147483648, %v5963_v43  ;;  %v809_v2 = vand.u32 2147483647, %v5963_v43  ;;  %v752_v29 = vadd.f32 %v729_v41, %v334_v36 }
 0x13c   :  { %5315 = vrcp.f32 %v5970_v39  ;;  %v780_v49 = vmul.f32 %v5961_v48, %v779_v56  ;;  %v786_v56 = vand.u32 2147483647, %v5956_v54  ;;  %vm845_vm3 = vweird.f32 %v5968_v37 }
 0x13d   :  { %1099 = vmatpush.bf16.msra.mxu0 %v4035_v57  ;;  %v812_v60 = vor.u32 1.1754944e-38, %v811_v58  ;;  %vm810_vm10 = vcmp.eq.f32.partialorder %v809_v2, 8.507059e+37  ;;  %v789_v2 = vor.u32 1.1754944e-38, %v788_v61  ;;  %vm860_vm4 = vweird.f32 %v5970_v39 }
 0x13e   :  { %v5310_v33 = vpop.eup %5309  ;;  %1113 = vmatpush.bf16.msrb.mxu1 %v4039_v53  ;;  %v781_v38 = vadd.f32 %v5961_v48, %v780_v49  ;;  %vm787_vm13 = vcmp.eq.f32.partialorder %v786_v56, 8.507059e+37  ;;  %v849_v56 = vand.u32 2147483647, %v5968_v37 }
 0x13f   :  { %v5312_v46 = vpop.eup %5311  ;;  %v799_v44 = vadd.f32 1.0, %v5310_v33  ;;  %1127 = vmatpush.bf16.msra.mxu2 %v4043_v47  ;;  %1141 = vmatpush.bf16.msra.mxu3 %v4047_v59 }
 0x140   :  { %v801_v30 = vmul.f32 %v5312_v46, %v5963_v43  ;;  %vm806_vm5 = vweird.f32 %v5312_v46  ;;  %vm850_vm7 = vcmp.eq.f32.partialorder %v849_v56, 8.507059e+37  ;;  %v5107_v56 = vld [vmem:[#allocation10 + $0xec] sm:$0xf] }
 0x141   :  { %5317 = vrcp.f32 %v799_v44  ;;  %v5980_v52 = vpop.eup %5313  ;;  %vm807_vm9 = vmor %vm805_vm6, %vm806_vm5  ;;  %v824_v49 = vand.u32 2147483647, %v799_v44  ;;  %vm820_vm14 = vweird.f32 %v799_v44 }
 0x142   :  { %v802_v63 = vsub.f32 1.0, %v801_v30  ;;  %v5982_v50 = vpop.eup %5315  ;;  %v841_v47 = vmul.f32 %v5980_v52, %v5968_v37  ;;  %5319 = vtanh.f32 %v752_v29  ;;  %vm846_vm1 = vweird.f32 %v5980_v52 }
 0x143   :  { %v856_v43 = vmul.f32 %v5982_v50, %v5970_v39  ;;  %vm825_vm0 = vcmp.eq.f32.partialorder %v824_v49, 8.507059e+37  ;;  %vm861_vm2 = vweird.f32 %v5982_v50  ;;  %vm847_vm5 = vmor %vm845_vm3, %vm846_vm1 }
 0x144   :  { %v803_v28 = vmul.f32 %v5312_v46, %v802_v63  ;;  %v826_v63 = vand.u32 2147483648, %v799_v44  ;;  %vm862_vm6 = vmor %vm860_vm4, %vm861_vm2 }
 0x145   :  { %v857_v29 = vsub.f32 1.0, %v856_v43  ;;  %v866_v43 = vand.u32 2147483648, %v5970_v39 }
 0x146   :  { %v804_v32 = vadd.f32 %v5312_v46, %v803_v28  ;;  %v842_v28 = vsub.f32 1.0, %v841_v47 }
 0x147   :  { %v5318_v57 = vpop.eup %5317  ;;  %v867_v49 = vor.u32 1.1754944e-38, %v866_v43 }
 0x148   :  { %v808_v53 = vsel %vm807_vm9, %v5312_v46, %v804_v32  ;;  %v816_v40 = vmul.f32 %v5318_v57, %v799_v44  ;;  %v785_v46 = vsel %vm5993_vm11, %v5961_v48, %v781_v38  ;;  %vm821_vm12 = vweird.f32 %v5318_v57  ;;  %v5320_v54 = vpop.eup %5319 }
 0x149   :  { %v813_v59 = vsel %vm810_vm10, %v812_v60, %v808_v53  ;;  %v790_v60 = vsel %vm787_vm13, %v789_v2, %v785_v46  ;;  %vm822_vm15 = vmor %vm820_vm14, %vm821_vm12  ;;  %v827_v53 = vor.u32 1.1754944e-38, %v826_v63  ;;  %v843_v48 = vmul.f32 %v5980_v52, %v842_v28 }
 0x14a   :  { %v872_v30 = vmul.f32 0.0, %v813_v59  ;;  %v817_v41 = vsub.f32 1.0, %v816_v40  ;;  %v858_v38 = vmul.f32 %v5982_v50, %v857_v29  ;;  %v875_v33 = vmul.f32 %v5320_v54, %v790_v60 }
 0x14b   :  { %v844_v44 = vadd.f32 %v5980_v52, %v843_v48 }
 0x14c   :  { %v818_v36 = vmul.f32 %v5318_v57, %v817_v41  ;;  %v6002_v58 = vadd.f32 %v5954_v42, %v872_v30  ;;  %v859_v47 = vadd.f32 %v5982_v50, %v858_v38  ;;  %v864_v30 = vand.u32 2147483647, %v5970_v39 }
 0x14d   :  { %v848_v41 = vsel %vm847_vm5, %v5980_v52, %v844_v44  ;;  %v288_v39 = vadd.f32 %v5834_v6, %v5939_v24  ;;  %v4280_v52 = vld [vmem:[#allocation10 + $0xe0] sm:$0xf] }
 0x14e   :  { %v819_v32 = vadd.f32 %v5318_v57, %v818_v36  ;;  %5321 = vtanh.f32 %v6002_v58  ;;  %v863_v46 = vsel %vm862_vm6, %v5982_v50, %v859_v47  ;;  %vm865_vm8 = vcmp.eq.f32.partialorder %v864_v30, 8.507059e+37  ;;  %v5108_v50 = vld [vmem:[#allocation10 + $0xec] sm:$0xf0]  ;;  %v4290_v30 = vld [vmem:[#allocation10 + $0xf8] sm:$0xf0] }
 0x14f   :  { %v868_v29 = vsel %vm865_vm8, %v867_v49, %v863_v46  ;;  %v4281_v38 = vor.u32 %v5108_v50, %v4280_v52  ;;  %v4264_v6 = vld [vmem:[#allocation10 + $0xc0] sm:$0xf]  ;;  %v4266_v49 = vld [vmem:[#allocation10 + $0xd0] sm:$0xf0]  ;;  %v241_v52 = vadd.f32 %v5824_v1, %v5908_v45  ;;  %v290_v50 = vadd.f32 %v5842_v11, %v5939_v24 }
 0x150   :  { %v823_v40 = vsel %vm822_vm15, %v5318_v57, %v819_v32  ;;  %v851_v57 = vand.u32 2147483648, %v5968_v37  ;;  %v239_v37 = vadd.f32 %v5816_v62, %v5908_v45  ;;  %v4293_v62 = vor.u32 %v5107_v56, %v4290_v30 }
 0x151   :  { %v828_v59 = vsel %vm825_vm0, %v827_v53, %v823_v40  ;;  %v5106_v53 = vld [vmem:[#allocation10 + $0xe4] sm:$0xf]  ;;  %1494 = vmatpush.bf16.msrb.mxu0 %v4281_v38  ;;  %v5100_v38 = vld [vmem:[#allocation10 + $0xac] sm:$0xf0] }
 0x152   :  { %v873_v42 = vmul.f32 0.0, %v828_v59  ;;  %v852_v36 = vor.u32 1.1754944e-38, %v851_v57  ;;  %v4282_v59 = vld [vmem:[#allocation10 + $0xf0] sm:$0xf0]  ;;  %1536 = vmatpush.bf16.msrb.mxu3 %v4293_v62  ;;  %v5099_v62 = vld [vmem:[#allocation10 + $0xac] sm:$0xf] }
 0x153   :  { %v4285_v57 = vor.u32 %v5106_v53, %v4282_v59  ;;  %v5098_v59 = vld [vmem:[#allocation10 + $0xa4] sm:$0xf] }
 0x154   :  { %v6007_v61 = vadd.f32 %v875_v33, %v873_v42  ;;  %v5322_v63 = vpop.eup %5321  ;;  %v853_v2 = vsel %vm850_vm7, %v852_v36, %v848_v41  ;;  %v4288_v33 = vld [vmem:[#allocation10 + $0xe8] sm:$0xf]  ;;  %v5109_v42 = vld [vmem:[#allocation10 + $0xf4] sm:$0xf0]  ;;  %v5102_v36 = vld [vmem:[#allocation10 + $0xc4] sm:$0xf] }
 0x155   :  { %v880_v32 = vmul.f32 %v5322_v63, %v853_v2  ;;  %v4289_v43 = vor.u32 %v5109_v42, %v4288_v33  ;;  %1508 = vmatpush.bf16.msra.mxu1 %v4285_v57  ;;  %v5104_v63 = vld [vmem:[#allocation10 + $0xcc] sm:$0xf0]  ;;  %v4269_v2 = vor.u32 %v5102_v36, %v4266_v49  ;;  %v4256_v57 = vld [vmem:[#allocation10 + $0xa8] sm:$0xf]  ;;  %v4232_v49 = vld [vmem:[#allocation10 + $0x80] sm:$0xf] }
 0x156   :  { %5323 = vtanh.f32 %v6007_v61 }
 0x157   :  { %1522 = vmatpush.bf16.msrb.mxu2 %v4289_v43  ;;  %v5101_v43 = vld [vmem:[#allocation10 + $0xb4] sm:$0xf0] }
 0x158   :  { %v4257_v11 = vor.u32 %v5101_v43, %v4256_v57  ;;  %v5092_v43 = vld [vmem:[#allocation10 + $0x6c] sm:$0xf0] }
 0x159   :  { %1509 = vmatpush.bf16.msra.mxu1 %v4269_v2 }
 0x15c   :  { %v5324_v28 = vpop.eup %5323 }
 0x15d   :  { %v881_v54 = vmul.f32 %v5324_v28, %v868_v29  ;;  %v4265_v28 = vor.u32 %v5104_v63, %v4264_v6  ;;  %v4272_v29 = vld [vmem:[#allocation10 + $0xc8] sm:$0xf] }
 0x15f   :  { %v899_v60 = vpack.c.bf16 %v881_v54, %v880_v32  ;;  %v5105_v32 = vld [vmem:[#allocation10 + $0xd4] sm:$0xf0]  ;;  %v5103_v54 = vld [vmem:[#allocation10 + $0xcc] sm:$0xf]  ;;  %1495 = vmatpush.bf16.msrb.mxu0 %v4265_v28 }
 0x161   :  { %1100 = vmatmul.bf16.vlgmr.msra.gmra.mxu0 %v899_v60  ;;  %1114 = vmatmul.bf16.vlgmr.msrb.gmra.mxu1 %v899_v60 }
 0x162   :  { %1128 = vmatmul.bf16.vlgmr.msra.gmra.mxu2 %v899_v60  ;;  %1142 = vmatmul.bf16.vlgmr.msra.gmra.mxu3 %v899_v60  ;;  %v386_v60 = vadd.f32 %v5822_v0, %v5935_v55 }
 0x1de   :  { %v1101_v40 = vpop.f32.mrf.mxu0  ;;  %v1115_v48 = vpop.f32.mrf.mxu1 }
 0x1df   :  { %v1148_v44 = vadd.f32 %v1101_v40, %v239_v37  ;;  %v1149_v47 = vadd.f32 %v1115_v48, %v288_v39  ;;  %v4273_v37 = vor.u32 %v5105_v32, %v4272_v29  ;;  %v4274_v39 = vld [vmem:[#allocation10 + $0xd8] sm:$0xf0]  ;;  %v4248_v48 = vld [vmem:[#allocation10 + $0xa0] sm:$0xf]  ;;  %v5096_v32 = vld [vmem:[#allocation10 + $0x8c] sm:$0xf0] }
 0x1e0   :  { %v4277_v40 = vor.u32 %v5103_v54, %v4274_v39  ;;  %v4249_v0 = vor.u32 %v5100_v38, %v4248_v48  ;;  %v5094_v39 = vld [vmem:[#allocation10 + $0x84] sm:$0xf]  ;;  %v4240_v48 = vld [vmem:[#allocation10 + $0x88] sm:$0xf]  ;;  %v5097_v38 = vld [vmem:[#allocation10 + $0x94] sm:$0xf0] }
 0x1e1   :  { %v4160_v41 = vmul.f32 -1.442695, %v1148_v44  ;;  %v4162_v46 = vmul.f32 -1.442695, %v1149_v47  ;;  %1523 = vmatpush.bf16.msrb.mxu2 %v4273_v37  ;;  %v4250_v47 = vld [vmem:[#allocation10 + $0xb0] sm:$0xf0]  ;;  %v4233_v37 = vor.u32 %v5096_v32, %v4232_v49 }
 0x1e2   :  { %1537 = vmatpush.bf16.msrb.mxu3 %v4277_v40  ;;  %v4253_v30 = vor.u32 %v5098_v59, %v4250_v47  ;;  %1496 = vmatpush.bf16.msrb.mxu0 %v4249_v0  ;;  %v5095_v59 = vld [vmem:[#allocation10 + $0x8c] sm:$0xf] }
 0x1e3   :  { %5325 = vpow2.f32 %v4160_v41  ;;  %v4258_v41 = vld [vmem:[#allocation10 + $0xb8] sm:$0xf0] }
 0x1e4   :  { %5327 = vpow2.f32 %v4162_v46  ;;  %v4261_v6 = vor.u32 %v5099_v62, %v4258_v41  ;;  %1510 = vmatpush.bf16.msra.mxu1 %v4253_v30  ;;  %v4224_v62 = vld [vmem:[#allocation10 + $0x68] sm:$0xf]  ;;  %v5093_v41 = vld [vmem:[#allocation10 + $0x74] sm:$0xf0] }
 0x1e5   :  { %v1143_v53 = vpop.f32.mrf.mxu3  ;;  %1524 = vmatpush.bf16.msrb.mxu2 %v4257_v11  ;;  %v4218_v11 = vld [vmem:[#allocation10 + $0x70] sm:$0xf0] }
 0x1e6   :  { %v1151_v33 = vadd.f32 %v1143_v53, %v386_v60  ;;  %v1103_v42 = vpop.f32.mrf.mxu0  ;;  %v1117_v44 = vpop.f32.mrf.mxu1  ;;  %1538 = vmatpush.bf16.msrb.mxu3 %v4261_v6  ;;  %v388_v53 = vadd.f32 %v5830_v4, %v5935_v55  ;;  %1497 = vmatpush.bf16.msrb.mxu0 %v4233_v37  ;;  %v5091_v37 = vld [vmem:[#allocation10 + $0x6c] sm:$0xf] }
 0x1e7   :  { %v1152_v56 = vadd.f32 %v1103_v42, %v241_v52  ;;  %v1153_v1 = vadd.f32 %v1117_v44, %v290_v50  ;;  %v1129_v60 = vpop.f32.mrf.mxu2  ;;  %v4234_v52 = vld [vmem:[#allocation10 + $0x90] sm:$0xf0]  ;;  %v337_v50 = vadd.f32 %v5820_v10, %v5931_v51  ;;  %v4216_v42 = vld [vmem:[#allocation10 + $0x60] sm:$0xf]  ;;  %v5090_v10 = vld [vmem:[#allocation10 + $0x64] sm:$0xf] }
 0x1e8   :  { %v4164_v46 = vmul.f32 -1.442695, %v1151_v33  ;;  %v4242_v33 = vld [vmem:[#allocation10 + $0x98] sm:$0xf0]  ;;  %v4237_v57 = vor.u32 %v5094_v39, %v4234_v52  ;;  %v4217_v30 = vor.u32 %v5092_v43, %v4216_v42  ;;  %v339_v52 = vadd.f32 %v5828_v3, %v5931_v51  ;;  %v4202_v43 = vld [vmem:[#allocation10 + $0x50] sm:$0xf0] }
 0x1e9   :  { %v5326_v63 = vpop.eup %5325  ;;  %v4161_v36 = vmul.f32 -1.442695, %v1152_v56  ;;  %v4163_v29 = vmul.f32 -1.442695, %v1153_v1  ;;  %v1150_v44 = vadd.f32 %v1129_v60, %v337_v50  ;;  %v4241_v1 = vor.u32 %v5097_v38, %v4240_v48  ;;  %v5088_v48 = vld [vmem:[#allocation10 + $0x4c] sm:$0xf0] }
 0x1ea   :  { %v5328_v28 = vpop.eup %5327  ;;  %v6032_v2 = vadd.f32 1.0, %v5326_v63  ;;  %5329 = vpow2.f32 %v4164_v46  ;;  %v4245_v4 = vor.u32 %v5095_v59, %v4242_v33  ;;  %1511 = vmatpush.bf16.msra.mxu1 %v4237_v57  ;;  %v4225_v60 = vor.u32 %v5093_v41, %v4224_v62  ;;  %1498 = vmatpush.bf16.msrb.mxu0 %v4217_v30  ;;  %v5086_v57 = vld [vmem:[#allocation10 + $0x44] sm:$0xf]  ;;  %v5087_v62 = vld [vmem:[#allocation10 + $0x4c] sm:$0xf] }
 0x1eb   :  { %v6034_v54 = vadd.f32 1.0, %v5328_v28  ;;  %5331 = vpow2.f32 %v4161_v36  ;;  %v4221_v36 = vor.u32 %v5090_v10, %v4218_v11  ;;  %1525 = vmatpush.bf16.msrb.mxu2 %v4241_v1  ;;  %v4208_v1 = vld [vmem:[#allocation10 + $0x48] sm:$0xf]  ;;  %v4210_v41 = vld [vmem:[#allocation10 + $0x58] sm:$0xf0] }
 0x1ec   :  { %5333 = vrcp.f32 %v6032_v2  ;;  %v1173_v0 = vand.u32 2147483647, %v6032_v2  ;;  %v1175_v6 = vand.u32 2147483648, %v6032_v2  ;;  %1539 = vmatpush.bf16.msrb.mxu3 %v4245_v4  ;;  %vm1169_vm9 = vweird.f32 %v6032_v2  ;;  %v5089_v4 = vld [vmem:[#allocation10 + $0x54] sm:$0xf0] }
 0x1ed   :  { %5335 = vrcp.f32 %v6034_v54  ;;  %v1145_v40 = vpop.f32.mrf.mxu3  ;;  %v1213_v28 = vand.u32 2147483648, %v6034_v54  ;;  %v1211_v3 = vand.u32 2147483647, %v6034_v54  ;;  %vm1207_vm11 = vweird.f32 %v6034_v54  ;;  %v5080_v33 = vld [vmem:[#allocation10 + $0xc] sm:$0xf0] }
 0x1ee   :  { %5337 = vpow2.f32 %v4163_v29  ;;  %v1155_v47 = vadd.f32 %v1145_v40, %v388_v53  ;;  %v4226_v53 = vld [vmem:[#allocation10 + $0x78] sm:$0xf0]  ;;  %v4200_v40 = vld [vmem:[#allocation10 + $0x40] sm:$0xf]  ;;  %vm6060_vm10 = vcmp.eq.f32.partialorder %v1173_v0, 8.507059e+37  ;;  %1512 = vmatpush.bf16.msra.mxu1 %v4221_v36  ;;  %v1176_v11 = vor.u32 1.1754944e-38, %v1175_v6 }
 0x1ef   :  { %5339 = vtanh.f32 %v1150_v44  ;;  %1526 = vmatpush.bf16.msrb.mxu2 %v4225_v60  ;;  %v4229_v0 = vor.u32 %v5091_v37, %v4226_v53  ;;  %v1214_v36 = vor.u32 1.1754944e-38, %v1213_v28  ;;  %v4184_v60 = vld [vmem:[#allocation10 + $0x20] sm:$0xf]  ;;  %v5084_v37 = vld [vmem:[#allocation10 + $0x2c] sm:$0xf0]  ;;  %vm6076_vm14 = vcmp.eq.f32.partialorder %v1211_v3, 8.507059e+37 }
 0x1f0   :  { %v5330_v56 = vpop.eup %5329  ;;  %v4165_v32 = vmul.f32 -1.442695, %v1155_v47  ;;  %v1131_v47 = vpop.f32.mrf.mxu2  ;;  %v4205_v6 = vor.u32 %v5086_v57, %v4202_v43  ;;  %v4213_v57 = vor.u32 %v5087_v62, %v4210_v41  ;;  %v4168_v28 = vld [vmem:[#allocation10] sm:$0xf] }
 0x1f1   :  { %v5332_v46 = vpop.eup %5331  ;;  %v6044_v63 = vadd.f32 1.0, %v5330_v56  ;;  %v4201_v56 = vor.u32 %v5088_v48, %v4200_v40  ;;  %1540 = vmatpush.bf16.msrb.mxu3 %v4229_v0  ;;  %v4209_v48 = vor.u32 %v5089_v4, %v4208_v1  ;;  %v4185_v1 = vor.u32 %v5084_v37, %v4184_v60  ;;  %v4192_v4 = vld [vmem:[#allocation10 + $0x28] sm:$0xf]  ;;  %v5081_v40 = vld [vmem:[#allocation10 + $0x14] sm:$0xf0] }
 0x1f2   :  { %v6046_v49 = vpop.eup %5333  ;;  %v6049_v29 = vadd.f32 1.0, %v5332_v46  ;;  %1513 = vmatpush.bf16.msra.mxu1 %v4205_v6 }
 0x1f3   :  { %v6051_v39 = vpop.eup %5335  ;;  %v1165_v50 = vmul.f32 %v6046_v49, %v6032_v2  ;;  %vm1170_vm12 = vweird.f32 %v6046_v49  ;;  %1499 = vmatpush.bf16.msrb.mxu0 %v4201_v56  ;;  %1527 = vmatpush.bf16.msrb.mxu2 %v4209_v48 }
 0x1f4   :  { %v5338_v38 = vpop.eup %5337  ;;  %v1203_v59 = vmul.f32 %v6051_v39, %v6034_v54  ;;  %5341 = vrcp.f32 %v6049_v29  ;;  %vm1208_vm13 = vweird.f32 %v6051_v39  ;;  %vm6086_vm15 = vmor %vm1169_vm9, %vm1170_vm12  ;;  %vm1184_vm1 = vweird.f32 %v6049_v29 }
 0x1f5   :  { %v1166_v42 = vsub.f32 1.0, %v1165_v50  ;;  %5343 = vrcp.f32 %v6044_v63  ;;  %v6068_v44 = vadd.f32 1.0, %v5338_v38  ;;  %v5340_v50 = vpop.eup %5339  ;;  %v5082_v38 = vld [vmem:[#allocation10 + $0x24] sm:$0xf]  ;;  %vm6099_vm0 = vmor %vm1207_vm11, %vm1208_vm13  ;;  %1541 = vmatpush.bf16.msrb.mxu3 %v4213_v57 }
 0x1f6   :  { %v1204_v10 = vsub.f32 1.0, %v1203_v59  ;;  %5345 = vpow2.f32 %v4165_v32  ;;  %v1154_v32 = vadd.f32 %v1131_v47, %v339_v52  ;;  %v4186_v59 = vld [vmem:[#allocation10 + $0x30] sm:$0xf0]  ;;  %v1190_v47 = vand.u32 2147483648, %v6049_v29 }
 0x1f7   :  { %v1167_v30 = vmul.f32 %v6046_v49, %v1166_v42  ;;  %5347 = vrcp.f32 %v6068_v44  ;;  %v1228_v56 = vand.u32 2147483648, %v6068_v44  ;;  %1500 = vmatpush.bf16.msrb.mxu0 %v4185_v1  ;;  %v4169_v1 = vor.u32 %v5080_v33, %v4168_v28 }
 0x1f8   :  { %v1205_v46 = vmul.f32 %v6051_v39, %v1204_v10  ;;  %5349 = vtanh.f32 %v1154_v32  ;;  %vm1222_vm6 = vweird.f32 %v6068_v44 }
 0x1f9   :  { %v1168_v53 = vadd.f32 %v6046_v49, %v1167_v30  ;;  %v5085_v30 = vld [vmem:[#allocation10 + $0x34] sm:$0xf0]  ;;  %v1229_v33 = vor.u32 1.1754944e-38, %v1228_v56  ;;  %v1253_v56 = vand.u32 2147483648, %v6044_v63 }
 0x1fa   :  { %v6080_v42 = vpop.eup %5341  ;;  %v1206_v52 = vadd.f32 %v6051_v39, %v1205_v46  ;;  %v5083_v46 = vld [vmem:[#allocation10 + $0x2c] sm:$0xf] }
 0x1fb   :  { %v6093_v43 = vpop.eup %5343  ;;  %v1172_v2 = vsel %vm6086_vm15, %v6046_v49, %v1168_v53  ;;  %v1180_v0 = vmul.f32 %v6080_v42, %v6049_v29  ;;  %v4189_v49 = vor.u32 %v5082_v38, %v4186_v59  ;;  %v4194_v53 = vld [vmem:[#allocation10 + $0x38] sm:$0xf0]  ;;  %v4170_v38 = vld [vmem:[#allocation10 + $0x10] sm:$0xf0]  ;;  %v4176_v59 = vld [vmem:[#allocation10 + $0x8] sm:$0xf]  ;;  %vm1185_vm2 = vweird.f32 %v6080_v42  ;;  %1501 = vmatpush.bf16.msrb.mxu0 %v4169_v1 }
 0x1fc   :  { %v5346_v62 = vpop.eup %5345  ;;  %v1177_v54 = vsel %vm6060_vm10, %v1176_v11, %v1172_v2  ;;  %v1210_v41 = vsel %vm6099_vm0, %v6051_v39, %v1206_v52  ;;  %v5078_v11 = vld [vmem:[#allocation10 + $0x4] sm:$0xf]  ;;  %v1243_v39 = vmul.f32 %v6093_v43, %v6044_v63  ;;  %v5079_v52 = vld [vmem:[#allocation10 + $0xc] sm:$0xf]  ;;  %vm1186_vm4 = vmor %vm1184_vm1, %vm1185_vm2  ;;  %vm1248_vm9 = vweird.f32 %v6093_v43 }
 0x1fd   :  { %v5348_v3 = vpop.eup %5347  ;;  %v1215_v60 = vsel %vm6076_vm14, %v1214_v36, %v1210_v41  ;;  %v1276_v37 = vmul.f32 %v5340_v50, %v1177_v54  ;;  %v1181_v6 = vsub.f32 1.0, %v1180_v0  ;;  %v6116_v48 = vadd.f32 1.0, %v5346_v62  ;;  %1514 = vmatpush.bf16.msra.mxu1 %v4189_v49 }
 0x1fe   :  { %v1274_v10 = vmul.f32 %v1215_v60, %v6002_v58  ;;  %v1218_v32 = vmul.f32 %v5348_v3, %v6068_v44  ;;  %v4193_v50 = vor.u32 %v5085_v30, %v4192_v4  ;;  %v4178_v58 = vld [vmem:[#allocation10 + $0x18] sm:$0xf0]  ;;  %v4197_v0 = vor.u32 %v5083_v46, %v4194_v53 }
 0x1ff   :  { %v1182_v36 = vmul.f32 %v6080_v42, %v1181_v6  ;;  %5351 = vrcp.f32 %v6116_v48  ;;  %v1191_v54 = vor.u32 1.1754944e-38, %v1190_v47  ;;  %v4173_v41 = vor.u32 %v5078_v11, %v4170_v38  ;;  %v5350_v6 = vpop.eup %5349 }
 0x200   :  { %v6126_v57 = vadd.f32 %v1276_v37, %v1274_v10  ;;  %v1219_v2 = vsub.f32 1.0, %v1218_v32  ;;  %1528 = vmatpush.bf16.msrb.mxu2 %v4193_v50  ;;  %v4177_v60 = vor.u32 %v5081_v40, %v4176_v59  ;;  %vm1223_vm3 = vweird.f32 %v5348_v3  ;;  %1542 = vmatpush.bf16.msrb.mxu3 %v4197_v0 }
 0x201   :  { %v1183_v62 = vadd.f32 %v6080_v42, %v1182_v36  ;;  %v1226_v4 = vand.u32 2147483647, %v6068_v44  ;;  %v4181_v30 = vor.u32 %v5079_v52, %v4178_v58  ;;  %v1244_v49 = vsub.f32 1.0, %v1243_v39  ;;  %1515 = vmatpush.bf16.msra.mxu1 %v4173_v41  ;;  %vm1224_vm7 = vmor %vm1222_vm6, %vm1223_vm3 }
 0x202   :  { %v1220_v34 = vmul.f32 %v5348_v3, %v1219_v2  ;;  %v6974_v47 = vand.u32 2147483647, %v6049_v29  ;;  %5353 = vtanh.f32 %v6126_v57  ;;  %vm1247_vm10 = vweird.f32 %v6044_v63 }
 0x203   :  { %v1187_v46 = vsel %vm1186_vm4, %v6080_v42, %v1183_v62  ;;  %vm1227_vm8 = vcmp.eq.f32.partialorder %v1226_v4, 8.507059e+37  ;;  %v1245_v42 = vmul.f32 %v6093_v43, %v1244_v49  ;;  %vm1262_vm12 = vweird.f32 %v6116_v48  ;;  %vm1249_vm13 = vmor %vm1247_vm10, %vm1248_vm9 }
 0x204   :  { %vm1189_vm5 = vcmp.eq.f32.partialorder %v6974_v47, 8.507059e+37  ;;  %v1221_v28 = vadd.f32 %v5348_v3, %v1220_v34  ;;  %1529 = vmatpush.bf16.msrb.mxu2 %v4177_v60  ;;  %1543 = vmatpush.bf16.msrb.mxu3 %v4181_v30  ;;  %v1251_v40 = vand.u32 2147483647, %v6044_v63  ;;  %v1266_v36 = vand.u32 2147483647, %v6116_v48 }
 0x205   :  { %v1192_v53 = vsel %vm1189_vm5, %v1191_v54, %v1187_v46  ;;  %v5352_v37 = vpop.eup %5351  ;;  %v1254_v2 = vor.u32 1.1754944e-38, %v1253_v56  ;;  %v244_v63 = vadd.f32 %v5832_v5, %v5908_v45  ;;  %v4414_v46 = vld [vmem:[#allocation10 + $0xe0] sm:$0xf]  ;;  %v5140_v47 = vld [vmem:[#allocation10 + $0xec] sm:$0xf0] }
 0x206   :  { %v1225_v11 = vsel %vm1224_vm7, %v5348_v3, %v1221_v28  ;;  %v1277_v10 = vmul.f32 %v5350_v6, %v1192_v53  ;;  %v1258_v32 = vmul.f32 %v5352_v37, %v6116_v48  ;;  %v1246_v3 = vadd.f32 %v6093_v43, %v1245_v42  ;;  %v5138_v53 = vld [vmem:[#allocation10 + $0xe4] sm:$0xf]  ;;  %v5141_v42 = vld [vmem:[#allocation10 + $0xf4] sm:$0xf0] }
 0x207   :  { %v1230_v39 = vsel %vm1227_vm8, %v1229_v33, %v1225_v11  ;;  %vm1263_vm11 = vweird.f32 %v5352_v37  ;;  %vm1252_vm15 = vcmp.eq.f32.partialorder %v1251_v40, 8.507059e+37  ;;  %vm1267_vm0 = vcmp.eq.f32.partialorder %v1266_v36, 8.507059e+37  ;;  %v4416_v11 = vld [vmem:[#allocation10 + $0xf0] sm:$0xf0]  ;;  %v5134_v56 = vld [vmem:[#allocation10 + $0xc4] sm:$0xf] }
 0x208   :  { %v1275_v29 = vmul.f32 %v1230_v39, %v6007_v61  ;;  %v1259_v38 = vsub.f32 1.0, %v1258_v32  ;;  %v1268_v61 = vand.u32 2147483648, %v6116_v48  ;;  %vm1264_vm14 = vmor %vm1262_vm12, %vm1263_vm11  ;;  %v1250_v50 = vsel %vm1249_vm13, %v6093_v43, %v1246_v3  ;;  %v5354_v58 = vpop.eup %5353  ;;  %v4422_v32 = vld [vmem:[#allocation10 + $0xe8] sm:$0xf]  ;;  %v5139_v39 = vld [vmem:[#allocation10 + $0xec] sm:$0xf] }
 0x209   :  { %v1255_v62 = vsel %vm1252_vm15, %v1254_v2, %v1250_v50  ;;  %v293_v43 = vadd.f32 %v5850_v15, %v5939_v24  ;;  %v4415_v33 = vor.u32 %v5140_v47, %v4414_v46  ;;  %v4423_v5 = vor.u32 %v5141_v42, %v4422_v32  ;;  %v5136_v3 = vld [vmem:[#allocation10 + $0xcc] sm:$0xf0]  ;;  %v4400_v50 = vld [vmem:[#allocation10 + $0xd0] sm:$0xf0]  ;;  %v5133_v32 = vld [vmem:[#allocation10 + $0xb4] sm:$0xf0] }
 0x20a   :  { %v6142_v44 = vadd.f32 %v1277_v10, %v1275_v29  ;;  %v1260_v34 = vmul.f32 %v5352_v37, %v1259_v38  ;;  %v1269_v0 = vor.u32 1.1754944e-38, %v1268_v61  ;;  %v1282_v41 = vmul.f32 %v5354_v58, %v1255_v62  ;;  %v4424_v29 = vld [vmem:[#allocation10 + $0xf8] sm:$0xf0]  ;;  %v5137_v58 = vld [vmem:[#allocation10 + $0xd4] sm:$0xf0] }
 0x20b   :  { %v4419_v10 = vor.u32 %v5138_v53, %v4416_v11  ;;  %1896 = vmatpush.bf16.msra.mxu0 %v4415_v33  ;;  %v391_v15 = vadd.f32 %v5838_v8, %v5935_v55  ;;  %v4427_v38 = vor.u32 %v5139_v39, %v4424_v29  ;;  %v295_v61 = vadd.f32 %v5858_v19, %v5939_v24  ;;  %v4382_v19 = vld [vmem:[#allocation10 + $0xa0] sm:$0xf]  ;;  %v5131_v29 = vld [vmem:[#allocation10 + $0xac] sm:$0xf] }
 0x20c   :  { %5355 = vtanh.f32 %v6142_v44  ;;  %v1261_v59 = vadd.f32 %v5352_v37, %v1260_v34  ;;  %v4398_v34 = vld [vmem:[#allocation10 + $0xc0] sm:$0xf]  ;;  %1924 = vmatpush.bf16.msra.mxu2 %v4423_v5  ;;  %v342_v42 = vadd.f32 %v5836_v7, %v5931_v51  ;;  %v393_v39 = vadd.f32 %v5846_v13, %v5935_v55  ;;  %v4374_v7 = vld [vmem:[#allocation10 + $0x88] sm:$0xf] }
 0x20d   :  { %1910 = vmatpush.bf16.msrb.mxu1 %v4419_v10  ;;  %v4399_v36 = vor.u32 %v5136_v3, %v4398_v34  ;;  %1938 = vmatpush.bf16.msra.mxu3 %v4427_v38  ;;  %v4390_v10 = vld [vmem:[#allocation10 + $0xa8] sm:$0xf]  ;;  %v4366_v38 = vld [vmem:[#allocation10 + $0x80] sm:$0xf]  ;;  %v5128_v34 = vld [vmem:[#allocation10 + $0x8c] sm:$0xf0]  ;;  %v344_v13 = vadd.f32 %v5844_v12, %v5931_v51 }
 0x20e   :  { %v1265_v52 = vsel %vm1264_vm14, %v5352_v37, %v1261_v59  ;;  %v246_v59 = vadd.f32 %v5840_v9, %v5908_v45  ;;  %v5126_v3 = vld [vmem:[#allocation10 + $0x84] sm:$0xf] }
 0x20f   :  { %v1270_v54 = vsel %vm1267_vm0, %v1269_v0, %v1265_v52  ;;  %v4406_v52 = vld [vmem:[#allocation10 + $0xc8] sm:$0xf]  ;;  %1897 = vmatpush.bf16.msra.mxu0 %v4399_v36  ;;  %v4368_v36 = vld [vmem:[#allocation10 + $0x90] sm:$0xf0] }
 0x210   :  { %v4407_v62 = vor.u32 %v5137_v58, %v4406_v52  ;;  %v4367_v58 = vor.u32 %v5128_v34, %v4366_v38 }
 0x212   :  { %v5356_v1 = vpop.eup %5355  ;;  %1925 = vmatpush.bf16.msra.mxu2 %v4407_v62 }
 0x213   :  { %v1283_v60 = vmul.f32 %v5356_v1, %v1270_v54  ;;  %v4403_v1 = vor.u32 %v5134_v56, %v4400_v50  ;;  %v5135_v54 = vld [vmem:[#allocation10 + $0xcc] sm:$0xf] }
 0x215   :  { %v1301_v6 = vpack.c.bf16 %v1283_v60, %v1282_v41  ;;  %v4408_v41 = vld [vmem:[#allocation10 + $0xd8] sm:$0xf0]  ;;  %1911 = vmatpush.bf16.msrb.mxu1 %v4403_v1 }
 0x216   :  { %v4411_v9 = vor.u32 %v5135_v54, %v4408_v41  ;;  %v4376_v1 = vld [vmem:[#allocation10 + $0x98] sm:$0xf0] }
 0x217   :  { %1502 = vmatmul.bf16.vlgmr.msrb.gmra.mxu0 %v1301_v6  ;;  %1516 = vmatmul.bf16.vlgmr.msra.gmra.mxu1 %v1301_v6 }
 0x218   :  { %1530 = vmatmul.bf16.vlgmr.msrb.gmra.mxu2 %v1301_v6  ;;  %1544 = vmatmul.bf16.vlgmr.msrb.gmra.mxu3 %v1301_v6 }
 0x219   :  { %1939 = vmatpush.bf16.msra.mxu3 %v4411_v9 }
 0x294   :  { %v1503_v48 = vpop.f32.mrf.mxu0  ;;  %v1517_v4 = vpop.f32.mrf.mxu1 }
 0x295   :  { %v1550_v30 = vadd.f32 %v1503_v48, %v244_v63  ;;  %v1551_v49 = vadd.f32 %v1517_v4, %v293_v43  ;;  %v5132_v43 = vld [vmem:[#allocation10 + $0xac] sm:$0xf0] }
 0x297   :  { %v4294_v28 = vmul.f32 -1.442695, %v1550_v30  ;;  %v4296_v37 = vmul.f32 -1.442695, %v1551_v49  ;;  %v4383_v30 = vor.u32 %v5132_v43, %v4382_v19  ;;  %v5130_v49 = vld [vmem:[#allocation10 + $0xa4] sm:$0xf] }
 0x299   :  { %5357 = vpow2.f32 %v4294_v28  ;;  %v4384_v28 = vld [vmem:[#allocation10 + $0xb0] sm:$0xf0]  ;;  %1898 = vmatpush.bf16.msra.mxu0 %v4383_v30 }
 0x29a   :  { %5359 = vpow2.f32 %v4296_v37  ;;  %v4387_v11 = vor.u32 %v5130_v49, %v4384_v28  ;;  %v5124_v49 = vld [vmem:[#allocation10 + $0x6c] sm:$0xf0] }
 0x29b   :  { %v1545_v40 = vpop.f32.mrf.mxu3  ;;  %v1531_v33 = vpop.f32.mrf.mxu2 }
 0x29c   :  { %v1553_v2 = vadd.f32 %v1545_v40, %v391_v15  ;;  %v1505_v8 = vpop.f32.mrf.mxu0  ;;  %v1519_v0 = vpop.f32.mrf.mxu1  ;;  %1912 = vmatpush.bf16.msrb.mxu1 %v4387_v11  ;;  %v4392_v15 = vld [vmem:[#allocation10 + $0xb8] sm:$0xf0]  ;;  %v1552_v56 = vadd.f32 %v1531_v33, %v342_v42  ;;  %v4391_v40 = vor.u32 %v5133_v32, %v4390_v10  ;;  %v4358_v10 = vld [vmem:[#allocation10 + $0x68] sm:$0xf] }
 0x29d   :  { %v1554_v60 = vadd.f32 %v1505_v8, %v246_v59  ;;  %v1555_v6 = vadd.f32 %v1519_v0, %v295_v61  ;;  %v4395_v52 = vor.u32 %v5131_v29, %v4392_v15  ;;  %v5129_v8 = vld [vmem:[#allocation10 + $0x94] sm:$0xf0]  ;;  %v5127_v0 = vld [vmem:[#allocation10 + $0x8c] sm:$0xf]  ;;  %1899 = vmatpush.bf16.msra.mxu0 %v4367_v58  ;;  %v4326_v11 = vld [vmem:[#allocation10 + $0x28] sm:$0xf] }
 0x29e   :  { %v4298_v63 = vmul.f32 -1.442695, %v1553_v2  ;;  %v4371_v2 = vor.u32 %v5126_v3, %v4368_v36  ;;  %1926 = vmatpush.bf16.msra.mxu2 %v4391_v40  ;;  %v4379_v43 = vor.u32 %v5127_v0, %v4376_v1  ;;  %v5125_v29 = vld [vmem:[#allocation10 + $0x74] sm:$0xf0]  ;;  %v5123_v3 = vld [vmem:[#allocation10 + $0x6c] sm:$0xf] }
 0x29f   :  { %v5358_v48 = vpop.eup %5357  ;;  %v4295_v4 = vmul.f32 -1.442695, %v1554_v60  ;;  %v4297_v53 = vmul.f32 -1.442695, %v1555_v6  ;;  %v4375_v6 = vor.u32 %v5129_v8, %v4374_v7  ;;  %1940 = vmatpush.bf16.msra.mxu3 %v4395_v52  ;;  %v4334_v40 = vld [vmem:[#allocation10 + $0x40] sm:$0xf] }
 0x2a0   :  { %v5360_v46 = vpop.eup %5359  ;;  %v6164_v47 = vadd.f32 1.0, %v5358_v48  ;;  %5361 = vpow2.f32 %v4298_v63  ;;  %v4350_v48 = vld [vmem:[#allocation10 + $0x60] sm:$0xf]  ;;  %1913 = vmatpush.bf16.msrb.mxu1 %v4371_v2  ;;  %v5120_v36 = vld [vmem:[#allocation10 + $0x4c] sm:$0xf0] }
 0x2a1   :  { %v6166_v37 = vadd.f32 1.0, %v5360_v46  ;;  %5363 = vpow2.f32 %v4295_v4  ;;  %v5122_v46 = vld [vmem:[#allocation10 + $0x64] sm:$0xf]  ;;  %v4351_v38 = vor.u32 %v5124_v49, %v4350_v48  ;;  %v4336_v8 = vld [vmem:[#allocation10 + $0x50] sm:$0xf0]  ;;  %v4335_v49 = vor.u32 %v5120_v36, %v4334_v40 }
 0x2a2   :  { %5365 = vrcp.f32 %v6164_v47  ;;  %v1575_v59 = vand.u32 2147483647, %v6164_v47  ;;  %v1577_v54 = vand.u32 2147483648, %v6164_v47  ;;  %vm1571_vm2 = vweird.f32 %v6164_v47  ;;  %1927 = vmatpush.bf16.msra.mxu2 %v4375_v6  ;;  %v5118_v2 = vld [vmem:[#allocation10 + $0x44] sm:$0xf] }
 0x2a3   :  { %5367 = vrcp.f32 %v6166_v37  ;;  %v1547_v5 = vpop.f32.mrf.mxu3  ;;  %v1613_v41 = vand.u32 2147483647, %v6166_v37  ;;  %v1615_v63 = vand.u32 2147483648, %v6166_v37  ;;  %vm1609_vm1 = vweird.f32 %v6166_v37  ;;  %1941 = vmatpush.bf16.msra.mxu3 %v4379_v43  ;;  %1900 = vmatpush.bf16.msra.mxu0 %v4351_v38  ;;  %v5114_v38 = vld [vmem:[#allocation10 + $0x24] sm:$0xf] }
 0x2a4   :  { %5369 = vpow2.f32 %v4297_v53  ;;  %v1557_v61 = vadd.f32 %v1547_v5, %v393_v39  ;;  %v4352_v53 = vld [vmem:[#allocation10 + $0x70] sm:$0xf0]  ;;  %vm6195_vm4 = vcmp.eq.f32.partialorder %v1575_v59, 8.507059e+37  ;;  %v1533_v39 = vpop.f32.mrf.mxu2  ;;  %v4328_v52 = vld [vmem:[#allocation10 + $0x38] sm:$0xf0] }
 0x2a5   :  { %5371 = vtanh.f32 %v1552_v56  ;;  %v4355_v34 = vor.u32 %v5122_v46, %v4352_v53  ;;  %v4360_v56 = vld [vmem:[#allocation10 + $0x78] sm:$0xf0]  ;;  %vm6208_vm6 = vcmp.eq.f32.partialorder %v1613_v41, 8.507059e+37  ;;  %v1556_v58 = vadd.f32 %v1533_v39, %v344_v13  ;;  %v4342_v13 = vld [vmem:[#allocation10 + $0x48] sm:$0xf] }
 0x2a6   :  { %v5362_v50 = vpop.eup %5361  ;;  %v4299_v19 = vmul.f32 -1.442695, %v1557_v61  ;;  %v1578_v61 = vor.u32 1.1754944e-38, %v1577_v54  ;;  %v4359_v41 = vor.u32 %v5125_v29, %v4358_v10  ;;  %v4363_v6 = vor.u32 %v5123_v3, %v4360_v56  ;;  %v4344_v10 = vld [vmem:[#allocation10 + $0x58] sm:$0xf0] }
 0x2a7   :  { %v5364_v62 = vpop.eup %5363  ;;  %v6179_v60 = vadd.f32 1.0, %v5362_v50  ;;  %v1616_v50 = vor.u32 1.1754944e-38, %v1615_v63  ;;  %1914 = vmatpush.bf16.msrb.mxu1 %v4355_v34  ;;  %v5121_v63 = vld [vmem:[#allocation10 + $0x54] sm:$0xf0]  ;;  %1901 = vmatpush.bf16.msra.mxu0 %v4335_v49  ;;  %v4320_v34 = vld [vmem:[#allocation10 + $0x30] sm:$0xf0] }
 0x2a8   :  { %v6181_v9 = vpop.eup %5365  ;;  %v6184_v12 = vadd.f32 1.0, %v5364_v62  ;;  %1928 = vmatpush.bf16.msra.mxu2 %v4359_v41  ;;  %1942 = vmatpush.bf16.msra.mxu3 %v4363_v6  ;;  %v4304_v62 = vld [vmem:[#allocation10 + $0x10] sm:$0xf0]  ;;  %v4310_v43 = vld [vmem:[#allocation10 + $0x8] sm:$0xf] }
 0x2a9   :  { %v6186_v4 = vpop.eup %5367  ;;  %v1567_v30 = vmul.f32 %v6181_v9, %v6164_v47  ;;  %vm1572_vm3 = vweird.f32 %v6181_v9 }
 0x2aa   :  { %v5370_v28 = vpop.eup %5369  ;;  %v1605_v33 = vmul.f32 %v6186_v4, %v6166_v37  ;;  %5373 = vrcp.f32 %v6184_v12  ;;  %v1592_v5 = vand.u32 2147483648, %v6184_v12  ;;  %vm1610_vm5 = vweird.f32 %v6186_v4  ;;  %vm6217_vm7 = vmor %vm1571_vm2, %vm1572_vm3 }
 0x2ab   :  { %v1568_v32 = vsub.f32 1.0, %v1567_v30  ;;  %5375 = vrcp.f32 %v6179_v60  ;;  %v6201_v42 = vadd.f32 1.0, %v5370_v28  ;;  %v5372_v0 = vpop.eup %5371  ;;  %v1590_v54 = vand.u32 2147483647, %v6184_v12  ;;  %vm6228_vm8 = vmor %vm1609_vm1, %vm1610_vm5 }
 0x2ac   :  { %v1606_v15 = vsub.f32 1.0, %v1605_v33  ;;  %5377 = vpow2.f32 %v4299_v19  ;;  %v6234_v30 = vor.u32 1.1754944e-38, %v1592_v5  ;;  %v4339_v28 = vor.u32 %v5118_v2, %v4336_v8  ;;  %v5119_v33 = vld [vmem:[#allocation10 + $0x4c] sm:$0xf] }
 0x2ad   :  { %v1569_v59 = vmul.f32 %v6181_v9, %v1568_v32  ;;  %5379 = vrcp.f32 %v6201_v42  ;;  %v1630_v48 = vand.u32 2147483648, %v6201_v42  ;;  %v4318_v32 = vld [vmem:[#allocation10 + $0x20] sm:$0xf]  ;;  %vm1586_vm9 = vweird.f32 %v6184_v12  ;;  %v5115_v2 = vld [vmem:[#allocation10 + $0x2c] sm:$0xf] }
 0x2ae   :  { %v1607_v7 = vmul.f32 %v6186_v4, %v1606_v15  ;;  %5381 = vtanh.f32 %v1556_v58  ;;  %v5116_v15 = vld [vmem:[#allocation10 + $0x2c] sm:$0xf0]  ;;  %1915 = vmatpush.bf16.msrb.mxu1 %v4339_v28  ;;  %v4331_v28 = vor.u32 %v5115_v2, %v4328_v52  ;;  %vm1591_vm13 = vcmp.eq.f32.partialorder %v1590_v54, 8.507059e+37 }
 0x2af   :  { %v1570_v1 = vadd.f32 %v6181_v9, %v1569_v59  ;;  %vm1624_vm14 = vweird.f32 %v6201_v42  ;;  %vm1649_vm2 = vweird.f32 %v6179_v60  ;;  %v1653_v52 = vand.u32 2147483647, %v6179_v60 }
 0x2b0   :  { %v6222_v19 = vpop.eup %5373  ;;  %v1608_v47 = vadd.f32 %v6186_v4, %v1607_v7 }
 0x2b1   :  { %v6236_v46 = vpop.eup %5375  ;;  %v1574_v53 = vsel %vm6217_vm7, %v6181_v9, %v1570_v1  ;;  %v1582_v37 = vmul.f32 %v6222_v19, %v6184_v12  ;;  %v4343_v9 = vor.u32 %v5121_v63, %v4342_v13  ;;  %vm1587_vm10 = vweird.f32 %v6222_v19  ;;  %v5110_v1 = vld [vmem:[#allocation10 + $0x4] sm:$0xf] }
 0x2b2   :  { %v5378_v39 = vpop.eup %5377  ;;  %v1579_v5 = vsel %vm6195_vm4, %v1578_v61, %v1574_v53  ;;  %v1612_v29 = vsel %vm6228_vm8, %v6186_v4, %v1608_v47  ;;  %v5117_v61 = vld [vmem:[#allocation10 + $0x34] sm:$0xf0]  ;;  %v1645_v7 = vmul.f32 %v6236_v46, %v6179_v60  ;;  %v4319_v13 = vor.u32 %v5116_v15, %v4318_v32  ;;  %vm1588_vm12 = vmor %vm1586_vm9, %vm1587_vm10 }
 0x2b3   :  { %v6248_v3 = vpop.eup %5379  ;;  %v1617_v56 = vsel %vm6208_vm6, %v1616_v50, %v1612_v29  ;;  %v1678_v59 = vmul.f32 %v5372_v0, %v1579_v5  ;;  %v1583_v40 = vsub.f32 1.0, %v1582_v37  ;;  %v6252_v36 = vadd.f32 1.0, %v5378_v39  ;;  %v4302_v50 = vld [vmem:[#allocation10] sm:$0xf]  ;;  %1929 = vmatpush.bf16.msra.mxu2 %v4343_v9  ;;  %v5113_v47 = vld [vmem:[#allocation10 + $0x14] sm:$0xf0] }
 0x2b4   :  { %v1676_v4 = vmul.f32 %v1617_v56, %v6126_v57  ;;  %v1620_v58 = vmul.f32 %v6248_v3, %v6201_v42  ;;  %v4347_v0 = vor.u32 %v5119_v33, %v4344_v10  ;;  %v5112_v57 = vld [vmem:[#allocation10 + $0xc] sm:$0xf0]  ;;  %v4323_v63 = vor.u32 %v5114_v38, %v4320_v34  ;;  %v5382_v39 = vpop.eup %5381  ;;  %1902 = vmatpush.bf16.msra.mxu0 %v4319_v13  ;;  %v5111_v5 = vld [vmem:[#allocation10 + $0xc] sm:$0xf]  ;;  %v4312_v29 = vld [vmem:[#allocation10 + $0x18] sm:$0xf0] }
 0x2b5   :  { %v1584_v8 = vmul.f32 %v6222_v19, %v1583_v40  ;;  %5383 = vrcp.f32 %v6252_v36  ;;  %v1628_v53 = vand.u32 2147483647, %v6201_v42  ;;  %v4327_v37 = vor.u32 %v5117_v61, %v4326_v11 }
 0x2b6   :  { %v6263_v41 = vadd.f32 %v1678_v59, %v1676_v4  ;;  %v1621_v6 = vsub.f32 1.0, %v1620_v58  ;;  %1943 = vmatpush.bf16.msra.mxu3 %v4347_v0  ;;  %vm1625_vm11 = vweird.f32 %v6248_v3  ;;  %1916 = vmatpush.bf16.msrb.mxu1 %v4323_v63  ;;  %v4303_v10 = vor.u32 %v5112_v57, %v4302_v50 }
 0x2b7   :  { %v1585_v49 = vadd.f32 %v6222_v19, %v1584_v8  ;;  %v4307_v32 = vor.u32 %v5110_v1, %v4304_v62  ;;  %v1646_v9 = vsub.f32 1.0, %v1645_v7  ;;  %1930 = vmatpush.bf16.msra.mxu2 %v4327_v37  ;;  %v4311_v38 = vor.u32 %v5113_v47, %v4310_v43  ;;  %vm1626_vm15 = vmor %vm1624_vm14, %vm1625_vm11 }
 0x2b8   :  { %v1622_v33 = vmul.f32 %v6248_v3, %v1621_v6  ;;  %v1631_v40 = vor.u32 1.1754944e-38, %v1630_v48  ;;  %vm1629_vm0 = vcmp.eq.f32.partialorder %v1628_v53, 8.507059e+37  ;;  %1903 = vmatpush.bf16.msra.mxu0 %v4303_v10  ;;  %5385 = vtanh.f32 %v6263_v41  ;;  %v4548_v10 = vld [vmem:[#allocation10 + $0xe0] sm:$0xf] }
 0x2b9   :  { %v1589_v15 = vsel %vm1588_vm12, %v6222_v19, %v1585_v49  ;;  %v4315_v19 = vor.u32 %v5111_v5, %v4312_v29  ;;  %vm1650_vm1 = vweird.f32 %v6236_v46  ;;  %v1655_v58 = vand.u32 2147483648, %v6179_v60  ;;  %v5170_v5 = vld [vmem:[#allocation10 + $0xe4] sm:$0xf]  ;;  %v4550_v29 = vld [vmem:[#allocation10 + $0xf0] sm:$0xf0] }
 0x2ba   :  { %v1594_v34 = vsel %vm1591_vm13, %v6234_v30, %v1589_v15  ;;  %v1623_v56 = vadd.f32 %v6248_v3, %v1622_v33  ;;  %1944 = vmatpush.bf16.msra.mxu3 %v4331_v28  ;;  %1917 = vmatpush.bf16.msrb.mxu1 %v4307_v32  ;;  %v1647_v30 = vmul.f32 %v6236_v46, %v1646_v9  ;;  %vm1664_vm4 = vweird.f32 %v6252_v36  ;;  %vm1651_vm5 = vmor %vm1649_vm2, %vm1650_vm1  ;;  %v5172_v32 = vld [vmem:[#allocation10 + $0xec] sm:$0xf0] }
 0x2bb   :  { %v5384_v59 = vpop.eup %5383  ;;  %v1679_v54 = vmul.f32 %v5382_v39, %v1594_v34  ;;  %1931 = vmatpush.bf16.msra.mxu2 %v4311_v38  ;;  %v1668_v50 = vand.u32 2147483647, %v6252_v36  ;;  %v1656_v1 = vor.u32 1.1754944e-38, %v1655_v58  ;;  %vm1654_vm7 = vcmp.eq.f32.partialorder %v1653_v52, 8.507059e+37  ;;  %v4556_v38 = vld [vmem:[#allocation10 + $0xe8] sm:$0xf] }
 0x2bc   :  { %v1627_v12 = vsel %vm1626_vm15, %v6248_v3, %v1623_v56  ;;  %v1660_v11 = vmul.f32 %v5384_v59, %v6252_v36  ;;  %v1648_v3 = vadd.f32 %v6236_v46, %v1647_v30  ;;  %vm1665_vm3 = vweird.f32 %v5384_v59  ;;  %v5173_v34 = vld [vmem:[#allocation10 + $0xf4] sm:$0xf0]  ;;  %v5171_v56 = vld [vmem:[#allocation10 + $0xec] sm:$0xf]  ;;  %v5168_v30 = vld [vmem:[#allocation10 + $0xcc] sm:$0xf0] }
 0x2bd   :  { %v1632_v61 = vsel %vm1629_vm0, %v1631_v40, %v1627_v12  ;;  %vm1666_vm6 = vmor %vm1664_vm4, %vm1665_vm3  ;;  %vm1669_vm8 = vcmp.eq.f32.partialorder %v1668_v50, 8.507059e+37  ;;  %v249_v60 = vadd.f32 %v5848_v14, %v5908_v45  ;;  %v4549_v9 = vor.u32 %v5172_v32, %v4548_v10  ;;  %v4540_v58 = vld [vmem:[#allocation10 + $0xc8] sm:$0xf]  ;;  %v5167_v50 = vld [vmem:[#allocation10 + $0xcc] sm:$0xf] }
 0x2be   :  { %v1677_v4 = vmul.f32 %v1632_v61, %v6142_v44  ;;  %v1661_v7 = vsub.f32 1.0, %v1660_v11  ;;  %1945 = vmatpush.bf16.msra.mxu3 %v4315_v19  ;;  %v1670_v44 = vand.u32 2147483648, %v6252_v36  ;;  %v1652_v8 = vsel %vm1651_vm5, %v6236_v46, %v1648_v3  ;;  %v5386_v57 = vpop.eup %5385  ;;  %v4532_v11 = vld [vmem:[#allocation10 + $0xc0] sm:$0xf]  ;;  %v5166_v61 = vld [vmem:[#allocation10 + $0xc4] sm:$0xf] }
 0x2bf   :  { %v1657_v13 = vsel %vm1654_vm7, %v1656_v1, %v1652_v8  ;;  %v298_v46 = vadd.f32 %v5866_v23, %v5939_v24  ;;  %v4553_v15 = vor.u32 %v5170_v5, %v4550_v29  ;;  %v396_v14 = vadd.f32 %v5854_v17, %v5935_v55  ;;  %2298 = vmatpush.bf16.msrb.mxu0 %v4549_v9  ;;  %v4534_v3 = vld [vmem:[#allocation10 + $0xd0] sm:$0xf0]  ;;  %v4542_v8 = vld [vmem:[#allocation10 + $0xd8] sm:$0xf0]  ;;  %v5165_v10 = vld [vmem:[#allocation10 + $0xb4] sm:$0xf0] }
 0x2c0   :  { %v6288_v42 = vadd.f32 %v1679_v54, %v1677_v4  ;;  %v1662_v48 = vmul.f32 %v5384_v59, %v1661_v7  ;;  %v1671_v62 = vor.u32 1.1754944e-38, %v1670_v44  ;;  %v1684_v43 = vmul.f32 %v5386_v57, %v1657_v13  ;;  %v5163_v32 = vld [vmem:[#allocation10 + $0xac] sm:$0xf]  ;;  %v4526_v5 = vld [vmem:[#allocation10 + $0xb8] sm:$0xf0] }
 0x2c1   :  { %v4557_v23 = vor.u32 %v5173_v34, %v4556_v38  ;;  %v251_v40 = vadd.f32 %v5856_v18, %v5908_v45  ;;  %v300_v19 = vadd.f32 %v5874_v27, %v5939_v24  ;;  %2312 = vmatpush.bf16.msra.mxu1 %v4553_v15  ;;  %v4533_v17 = vor.u32 %v5168_v30, %v4532_v11  ;;  %v4500_v29 = vld [vmem:[#allocation10 + $0x80] sm:$0xf] }
 0x2c2   :  { %5387 = vtanh.f32 %v6288_v42  ;;  %v1663_v2 = vadd.f32 %v5384_v59, %v1662_v48  ;;  %v4537_v52 = vor.u32 %v5166_v61, %v4534_v3  ;;  %v4545_v57 = vor.u32 %v5167_v50, %v4542_v8  ;;  %v5156_v50 = vld [vmem:[#allocation10 + $0x6c] sm:$0xf0] }
 0x2c3   :  { %2326 = vmatpush.bf16.msrb.mxu2 %v4557_v23  ;;  %2299 = vmatpush.bf16.msrb.mxu0 %v4533_v17 }
 0x2c4   :  { %v1667_v0 = vsel %vm1666_vm6, %v5384_v59, %v1663_v2  ;;  %v4558_v59 = vld [vmem:[#allocation10 + $0xf8] sm:$0xf0]  ;;  %v5169_v2 = vld [vmem:[#allocation10 + $0xd4] sm:$0xf0] }
 0x2c5   :  { %v1672_v63 = vsel %vm1669_vm8, %v1671_v62, %v1667_v0  ;;  %v4561_v54 = vor.u32 %v5171_v56, %v4558_v59  ;;  %v4541_v27 = vor.u32 %v5169_v2, %v4540_v58  ;;  %2313 = vmatpush.bf16.msra.mxu1 %v4537_v52  ;;  %v5160_v56 = vld [vmem:[#allocation10 + $0x8c] sm:$0xf0]  ;;  %v4529_v59 = vor.u32 %v5163_v32, %v4526_v5  ;;  %v5159_v2 = vld [vmem:[#allocation10 + $0x8c] sm:$0xf]  ;;  %v4510_v52 = vld [vmem:[#allocation10 + $0x98] sm:$0xf0] }
 0x2c7   :  { %2340 = vmatpush.bf16.msrb.mxu3 %v4561_v54  ;;  %2327 = vmatpush.bf16.msrb.mxu2 %v4541_v27  ;;  %v5161_v54 = vld [vmem:[#allocation10 + $0x94] sm:$0xf0]  ;;  %v4484_v27 = vld [vmem:[#allocation10 + $0x60] sm:$0xf] }
 0x2c8   :  { %v5388_v6 = vpop.eup %5387 }
 0x2c9   :  { %v1685_v47 = vmul.f32 %v5388_v6, %v1672_v63  ;;  %v4516_v6 = vld [vmem:[#allocation10 + $0xa0] sm:$0xf] }
 0x2cb   :  { %v1703_v49 = vpack.c.bf16 %v1685_v47, %v1684_v43  ;;  %v5164_v47 = vld [vmem:[#allocation10 + $0xac] sm:$0xf0]  ;;  %2341 = vmatpush.bf16.msrb.mxu3 %v4545_v57  ;;  %v5146_v57 = vld [vmem:[#allocation10 + $0x24] sm:$0xf] }
 0x2cd   :  { %1904 = vmatmul.bf16.vlgmr.msra.gmra.mxu0 %v1703_v49  ;;  %1918 = vmatmul.bf16.vlgmr.msrb.gmra.mxu1 %v1703_v49 }
 0x2ce   :  { %1932 = vmatmul.bf16.vlgmr.msra.gmra.mxu2 %v1703_v49  ;;  %1946 = vmatmul.bf16.vlgmr.msra.gmra.mxu3 %v1703_v49 }
 0x2cf   :  { %2342 = vmatpush.bf16.msrb.mxu3 %v4529_v59 }
 0x34a   :  { %v1905_v36 = vpop.f32.mrf.mxu0  ;;  %v1919_v53 = vpop.f32.mrf.mxu1 }
 0x34b   :  { %v1952_v37 = vadd.f32 %v1905_v36, %v249_v60  ;;  %v1953_v28 = vadd.f32 %v1919_v53, %v298_v46  ;;  %v4517_v46 = vor.u32 %v5164_v47, %v4516_v6  ;;  %v5162_v36 = vld [vmem:[#allocation10 + $0xa4] sm:$0xf]  ;;  %v4518_v53 = vld [vmem:[#allocation10 + $0xb0] sm:$0xf0] }
 0x34c   :  { %v4521_v34 = vor.u32 %v5162_v36, %v4518_v53  ;;  %v4486_v47 = vld [vmem:[#allocation10 + $0x70] sm:$0xf0]  ;;  %v4485_v36 = vor.u32 %v5156_v50, %v4484_v27  ;;  %v4492_v53 = vld [vmem:[#allocation10 + $0x68] sm:$0xf]  ;;  %v4478_v50 = vld [vmem:[#allocation10 + $0x58] sm:$0xf0] }
 0x34d   :  { %v4428_v39 = vmul.f32 -1.442695, %v1952_v37  ;;  %v4430_v33 = vmul.f32 -1.442695, %v1953_v28  ;;  %v347_v37 = vadd.f32 %v5852_v16, %v5931_v51  ;;  %v398_v28 = vadd.f32 %v5862_v21, %v5935_v55  ;;  %2300 = vmatpush.bf16.msrb.mxu0 %v4517_v46  ;;  %v5158_v16 = vld [vmem:[#allocation10 + $0x84] sm:$0xf] }
 0x34e   :  { %v349_v21 = vadd.f32 %v5860_v20, %v5931_v51  ;;  %2314 = vmatpush.bf16.msra.mxu1 %v4521_v34  ;;  %v4513_v46 = vor.u32 %v5159_v2, %v4510_v52  ;;  %v5151_v2 = vld [vmem:[#allocation10 + $0x4c] sm:$0xf] }
 0x34f   :  { %5389 = vpow2.f32 %v4428_v39 }
 0x350   :  { %5391 = vpow2.f32 %v4430_v33  ;;  %v4524_v33 = vld [vmem:[#allocation10 + $0xa8] sm:$0xf]  ;;  %2343 = vmatpush.bf16.msrb.mxu3 %v4513_v46 }
 0x351   :  { %v1947_v12 = vpop.f32.mrf.mxu3  ;;  %v1933_v60 = vpop.f32.mrf.mxu2  ;;  %v4525_v23 = vor.u32 %v5165_v10, %v4524_v33  ;;  %v5155_v33 = vld [vmem:[#allocation10 + $0x6c] sm:$0xf]  ;;  %v4494_v10 = vld [vmem:[#allocation10 + $0x78] sm:$0xf0] }
 0x352   :  { %v1955_v4 = vadd.f32 %v1947_v12, %v396_v14  ;;  %v1907_v7 = vpop.f32.mrf.mxu0  ;;  %v1921_v48 = vpop.f32.mrf.mxu1  ;;  %v1954_v9 = vadd.f32 %v1933_v60, %v347_v37  ;;  %v4508_v12 = vld [vmem:[#allocation10 + $0x88] sm:$0xf]  ;;  %v5157_v37 = vld [vmem:[#allocation10 + $0x74] sm:$0xf0] }
 0x353   :  { %v1956_v44 = vadd.f32 %v1907_v7, %v251_v40  ;;  %v1957_v18 = vadd.f32 %v1921_v48, %v300_v19  ;;  %v4501_v40 = vor.u32 %v5160_v56, %v4500_v29  ;;  %v4502_v19 = vld [vmem:[#allocation10 + $0x90] sm:$0xf0]  ;;  %2328 = vmatpush.bf16.msrb.mxu2 %v4525_v23  ;;  %v4509_v58 = vor.u32 %v5161_v54, %v4508_v12 }
 0x354   :  { %v4432_v0 = vmul.f32 -1.442695, %v1955_v4  ;;  %v4505_v7 = vor.u32 %v5158_v16, %v4502_v19  ;;  %v4493_v59 = vor.u32 %v5157_v37, %v4492_v53  ;;  %v5149_v53 = vld [vmem:[#allocation10 + $0x34] sm:$0xf0]  ;;  %v5147_v37 = vld [vmem:[#allocation10 + $0x2c] sm:$0xf] }
 0x355   :  { %v5390_v1 = vpop.eup %5389  ;;  %v4429_v62 = vmul.f32 -1.442695, %v1956_v44  ;;  %v4431_v43 = vmul.f32 -1.442695, %v1957_v18  ;;  %2301 = vmatpush.bf16.msrb.mxu0 %v4501_v40  ;;  %v4470_v40 = vld [vmem:[#allocation10 + $0x50] sm:$0xf0] }
 0x356   :  { %v5392_v13 = vpop.eup %5391  ;;  %v6310_v63 = vadd.f32 1.0, %v5390_v1  ;;  %5393 = vpow2.f32 %v4432_v0  ;;  %v5154_v1 = vld [vmem:[#allocation10 + $0x64] sm:$0xf]  ;;  %2315 = vmatpush.bf16.msra.mxu1 %v4505_v7 }
 0x357   :  { %v6312_v49 = vadd.f32 1.0, %v5392_v13  ;;  %5395 = vpow2.f32 %v4429_v62  ;;  %2329 = vmatpush.bf16.msrb.mxu2 %v4509_v58  ;;  %v4489_v23 = vor.u32 %v5154_v1, %v4486_v47  ;;  %v5153_v58 = vld [vmem:[#allocation10 + $0x54] sm:$0xf0] }
 0x358   :  { %5397 = vrcp.f32 %v6310_v63  ;;  %v1977_v15 = vand.u32 2147483647, %v6310_v63  ;;  %v1979_v30 = vand.u32 2147483648, %v6310_v63  ;;  %vm1973_vm10 = vweird.f32 %v6310_v63 }
 0x359   :  { %5399 = vrcp.f32 %v6312_v49  ;;  %v1949_v39 = vpop.f32.mrf.mxu3  ;;  %v2015_v61 = vand.u32 2147483647, %v6312_v49  ;;  %v2017_v17 = vand.u32 2147483648, %v6312_v49  ;;  %vm2011_vm9 = vweird.f32 %v6312_v49  ;;  %v1935_v13 = vpop.f32.mrf.mxu2  ;;  %2302 = vmatpush.bf16.msrb.mxu0 %v4485_v36  ;;  %v4460_v36 = vld [vmem:[#allocation10 + $0x28] sm:$0xf] }
 0x35a   :  { %5401 = vpow2.f32 %v4431_v43  ;;  %v1959_v38 = vadd.f32 %v1949_v39, %v398_v28  ;;  %vm6341_vm12 = vcmp.eq.f32.partialorder %v1977_v15, 8.507059e+37  ;;  %v1980_v39 = vor.u32 1.1754944e-38, %v1979_v30  ;;  %v4468_v15 = vld [vmem:[#allocation10 + $0x40] sm:$0xf]  ;;  %2316 = vmatpush.bf16.msra.mxu1 %v4489_v23 }
 0x35b   :  { %5403 = vtanh.f32 %v1954_v9  ;;  %v2018_v5 = vor.u32 1.1754944e-38, %v2017_v17  ;;  %vm6354_vm14 = vcmp.eq.f32.partialorder %v2015_v61, 8.507059e+37  ;;  %v1958_v9 = vadd.f32 %v1935_v13, %v349_v21  ;;  %v5150_v21 = vld [vmem:[#allocation10 + $0x44] sm:$0xf]  ;;  %2330 = vmatpush.bf16.msrb.mxu2 %v4493_v59 }
 0x35c   :  { %v5394_v14 = vpop.eup %5393  ;;  %v4433_v3 = vmul.f32 -1.442695, %v1959_v38  ;;  %v5152_v38 = vld [vmem:[#allocation10 + $0x4c] sm:$0xf0]  ;;  %v4497_v30 = vor.u32 %v5155_v33, %v4494_v10  ;;  %v4436_v10 = vld [vmem:[#allocation10] sm:$0xf] }
 0x35d   :  { %v5396_v11 = vpop.eup %5395  ;;  %v6325_v4 = vadd.f32 1.0, %v5394_v14  ;;  %v4469_v17 = vor.u32 %v5152_v38, %v4468_v15  ;;  %v5142_v38 = vld [vmem:[#allocation10 + $0x4] sm:$0xf] }
 0x35e   :  { %v6327_v48 = vpop.eup %5397  ;;  %v6330_v20 = vadd.f32 1.0, %v5396_v11  ;;  %2344 = vmatpush.bf16.msrb.mxu3 %v4497_v30 }
 0x35f   :  { %v6332_v44 = vpop.eup %5399  ;;  %v1969_v18 = vmul.f32 %v6327_v48, %v6310_v63  ;;  %vm1974_vm11 = vweird.f32 %v6327_v48  ;;  %2303 = vmatpush.bf16.msrb.mxu0 %v4469_v17  ;;  %v5143_v17 = vld [vmem:[#allocation10 + $0xc] sm:$0xf] }
 0x360   :  { %v5402_v8 = vpop.eup %5401  ;;  %v2007_v0 = vmul.f32 %v6332_v44, %v6312_v49  ;;  %5405 = vrcp.f32 %v6330_v20  ;;  %v1994_v43 = vand.u32 2147483648, %v6330_v20  ;;  %vm2012_vm13 = vweird.f32 %v6332_v44  ;;  %vm6363_vm15 = vmor %vm1973_vm10, %vm1974_vm11 }
 0x361   :  { %v1970_v62 = vsub.f32 1.0, %v1969_v18  ;;  %5407 = vrcp.f32 %v6325_v4  ;;  %v6347_v6 = vadd.f32 1.0, %v5402_v8  ;;  %v5404_v34 = vpop.eup %5403  ;;  %v1992_v14 = vand.u32 2147483647, %v6330_v20  ;;  %vm6374_vm0 = vmor %vm2011_vm9, %vm2012_vm13  ;;  %v4452_v8 = vld [vmem:[#allocation10 + $0x20] sm:$0xf] }
 0x362   :  { %v2008_v60 = vsub.f32 1.0, %v2007_v0  ;;  %5409 = vpow2.f32 %v4433_v3  ;;  %v6380_v11 = vor.u32 1.1754944e-38, %v1994_v43  ;;  %v4476_v3 = vld [vmem:[#allocation10 + $0x48] sm:$0xf]  ;;  %v5148_v0 = vld [vmem:[#allocation10 + $0x2c] sm:$0xf0]  ;;  %vm1988_vm1 = vweird.f32 %v6330_v20 }
 0x363   :  { %v1971_v28 = vmul.f32 %v6327_v48, %v1970_v62  ;;  %5411 = vrcp.f32 %v6347_v6  ;;  %v2032_v54 = vand.u32 2147483648, %v6347_v6  ;;  %v4477_v33 = vor.u32 %v5153_v58, %v4476_v3  ;;  %v4446_v3 = vld [vmem:[#allocation10 + $0x18] sm:$0xf0] }
 0x364   :  { %v2009_v32 = vmul.f32 %v6332_v44, %v2008_v60  ;;  %5413 = vtanh.f32 %v1958_v9  ;;  %v4454_v60 = vld [vmem:[#allocation10 + $0x30] sm:$0xf0]  ;;  %v4481_v9 = vor.u32 %v5151_v2, %v4478_v50  ;;  %v4453_v15 = vor.u32 %v5148_v0, %v4452_v8 }
 0x365   :  { %v1972_v56 = vadd.f32 %v6327_v48, %v1971_v28  ;;  %v2030_v23 = vand.u32 2147483647, %v6347_v6  ;;  %2331 = vmatpush.bf16.msrb.mxu2 %v4477_v33  ;;  %v4457_v59 = vor.u32 %v5146_v57, %v4454_v60  ;;  %vm1993_vm5 = vcmp.eq.f32.partialorder %v1992_v14, 8.507059e+37 }
 0x366   :  { %v6368_v19 = vpop.eup %5405  ;;  %v2010_v63 = vadd.f32 %v6332_v44, %v2009_v32  ;;  %v5144_v32 = vld [vmem:[#allocation10 + $0xc] sm:$0xf0]  ;;  %2345 = vmatpush.bf16.msrb.mxu3 %v4481_v9  ;;  %2304 = vmatpush.bf16.msrb.mxu0 %v4453_v15  ;;  %vm2026_vm6 = vweird.f32 %v6347_v6  ;;  %v2033_v50 = vor.u32 1.1754944e-38, %v2032_v54  ;;  %v4449_v8 = vor.u32 %v5143_v17, %v4446_v3  ;;  %v4692_v17 = vld [vmem:[#allocation10 + $0xf8] sm:$0xf0] }
 0x367   :  { %v6382_v61 = vpop.eup %5407  ;;  %v1976_v7 = vsel %vm6363_vm15, %v6327_v48, %v1972_v56  ;;  %v1984_v49 = vmul.f32 %v6368_v19, %v6330_v20  ;;  %v4473_v48 = vor.u32 %v5150_v21, %v4470_v40  ;;  %vm1989_vm2 = vweird.f32 %v6368_v19  ;;  %v4444_v40 = vld [vmem:[#allocation10 + $0x8] sm:$0xf] }
 0x368   :  { %v5410_v18 = vpop.eup %5409  ;;  %v1981_v52 = vsel %vm6341_vm12, %v1980_v39, %v1976_v7  ;;  %v2014_v27 = vsel %vm6374_vm0, %v6332_v44, %v2010_v63  ;;  %v2047_v28 = vmul.f32 %v6382_v61, %v6325_v4  ;;  %vm6416_vm3 = vmor %vm1988_vm1, %vm1989_vm2  ;;  %v4461_v21 = vor.u32 %v5149_v53, %v4460_v36 }
 0x369   :  { %v6394_v1 = vpop.eup %5411  ;;  %v2019_v62 = vsel %vm6354_vm14, %v2018_v5, %v2014_v27  ;;  %v2080_v13 = vmul.f32 %v5404_v34, %v1981_v52  ;;  %v1985_v43 = vsub.f32 1.0, %v1984_v49  ;;  %v6398_v47 = vadd.f32 1.0, %v5410_v18  ;;  %2317 = vmatpush.bf16.msra.mxu1 %v4473_v48  ;;  %v4438_v34 = vld [vmem:[#allocation10 + $0x10] sm:$0xf0]  ;;  %v5145_v49 = vld [vmem:[#allocation10 + $0x14] sm:$0xf0] }
 0x36a   :  { %v2078_v44 = vmul.f32 %v2019_v62, %v6263_v41  ;;  %v2022_v46 = vmul.f32 %v6394_v1, %v6347_v6  ;;  %v4462_v41 = vld [vmem:[#allocation10 + $0x38] sm:$0xf0]  ;;  %v5414_v12 = vpop.eup %5413  ;;  %vm2027_vm4 = vweird.f32 %v6394_v1  ;;  %v4437_v7 = vor.u32 %v5144_v32, %v4436_v10  ;;  %2332 = vmatpush.bf16.msrb.mxu2 %v4461_v21  ;;  %v5202_v21 = vld [vmem:[#allocation10 + $0xe4] sm:$0xf] }
 0x36b   :  { %v1986_v39 = vmul.f32 %v6368_v19, %v1985_v43  ;;  %5415 = vrcp.f32 %v6398_v47  ;;  %v4465_v30 = vor.u32 %v5147_v37, %v4462_v41  ;;  %v2048_v58 = vsub.f32 1.0, %v2047_v28  ;;  %vm2028_vm7 = vmor %vm2026_vm6, %vm2027_vm4 }
 0x36c   :  { %v6409_v5 = vadd.f32 %v2080_v13, %v2078_v44  ;;  %v2023_v29 = vsub.f32 1.0, %v2022_v46  ;;  %v4441_v18 = vor.u32 %v5142_v38, %v4438_v34  ;;  %vm2031_vm8 = vcmp.eq.f32.partialorder %v2030_v23, 8.507059e+37  ;;  %2305 = vmatpush.bf16.msrb.mxu0 %v4437_v7  ;;  %v4682_v23 = vld [vmem:[#allocation10 + $0xe0] sm:$0xf] }
 0x36d   :  { %v1987_v56 = vadd.f32 %v6368_v19, %v1986_v39  ;;  %2318 = vmatpush.bf16.msra.mxu1 %v4457_v59  ;;  %2346 = vmatpush.bf16.msrb.mxu3 %v4465_v30  ;;  %vm2052_vm9 = vweird.f32 %v6382_v61  ;;  %vm2051_vm10 = vweird.f32 %v6325_v4  ;;  %v2057_v57 = vand.u32 2147483648, %v6325_v4  ;;  %v5204_v59 = vld [vmem:[#allocation10 + $0xec] sm:$0xf0]  ;;  %v5205_v30 = vld [vmem:[#allocation10 + $0xf4] sm:$0xf0] }
 0x36e   :  { %v2024_v63 = vmul.f32 %v6394_v1, %v2023_v29  ;;  %5417 = vtanh.f32 %v6409_v5  ;;  %v2072_v60 = vand.u32 2147483648, %v6398_v47  ;;  %vm2066_vm12 = vweird.f32 %v6398_v47  ;;  %vm2053_vm13 = vmor %vm2051_vm10, %vm2052_vm9 }
 0x36f   :  { %v1991_v2 = vsel %vm6416_vm3, %v6368_v19, %v1987_v56  ;;  %v4445_v19 = vor.u32 %v5145_v49, %v4444_v40  ;;  %v2055_v44 = vand.u32 2147483647, %v6325_v4  ;;  %v2070_v46 = vand.u32 2147483647, %v6398_v47  ;;  %v5203_v49 = vld [vmem:[#allocation10 + $0xec] sm:$0xf] }
 0x370   :  { %v1996_v52 = vsel %vm1993_vm5, %v6380_v11, %v1991_v2  ;;  %v2025_v27 = vadd.f32 %v6394_v1, %v2024_v63  ;;  %v2049_v11 = vmul.f32 %v6382_v61, %v2048_v58  ;;  %v2058_v28 = vor.u32 1.1754944e-38, %v2057_v57  ;;  %v4690_v63 = vld [vmem:[#allocation10 + $0xe8] sm:$0xf] }
 0x371   :  { %v5416_v48 = vpop.eup %5415  ;;  %v2081_v14 = vmul.f32 %v5414_v12, %v1996_v52  ;;  %2319 = vmatpush.bf16.msra.mxu1 %v4441_v18  ;;  %2333 = vmatpush.bf16.msrb.mxu2 %v4445_v19  ;;  %v2073_v39 = vor.u32 1.1754944e-38, %v2072_v60  ;;  %vm2056_vm15 = vcmp.eq.f32.partialorder %v2055_v44, 8.507059e+37  ;;  %vm2071_vm0 = vcmp.eq.f32.partialorder %v2070_v46, 8.507059e+37  ;;  %v4684_v12 = vld [vmem:[#allocation10 + $0xf0] sm:$0xf0] }
 0x372   :  { %v2029_v20 = vsel %vm2028_vm7, %v6394_v1, %v2025_v27  ;;  %v2062_v0 = vmul.f32 %v5416_v48, %v6398_v47  ;;  %2347 = vmatpush.bf16.msrb.mxu3 %v4449_v8  ;;  %v2050_v1 = vadd.f32 %v6382_v61, %v2049_v11  ;;  %vm2067_vm11 = vweird.f32 %v5416_v48  ;;  %v5198_v19 = vld [vmem:[#allocation10 + $0xc4] sm:$0xf]  ;;  %v5201_v11 = vld [vmem:[#allocation10 + $0xd4] sm:$0xf0] }
 0x373   :  { %v2034_v62 = vsel %vm2031_vm8, %v2033_v50, %v2029_v20  ;;  %vm2068_vm14 = vmor %vm2066_vm12, %vm2067_vm11  ;;  %v254_v4 = vadd.f32 %v5864_v22, %v5908_v45  ;;  %v4683_v40 = vor.u32 %v5204_v59, %v4682_v23  ;;  %v401_v22 = vadd.f32 %v5870_v25, %v5935_v55  ;;  %v4666_v25 = vld [vmem:[#allocation10 + $0xc0] sm:$0xf]  ;;  %v5200_v50 = vld [vmem:[#allocation10 + $0xcc] sm:$0xf0] }
 0x374   :  { %v2079_v13 = vmul.f32 %v2034_v62, %v6288_v42  ;;  %v2063_v43 = vsub.f32 1.0, %v2062_v0  ;;  %v2054_v36 = vsel %vm2053_vm13, %v6382_v61, %v2050_v1  ;;  %v5418_v37 = vpop.eup %5417  ;;  %v303_v61 = vadd.f32 %v5882_v31, %v5939_v24  ;;  %v4668_v0 = vld [vmem:[#allocation10 + $0xd0] sm:$0xf0]  ;;  %v5192_v23 = vld [vmem:[#allocation10 + $0x8c] sm:$0xf0] }
 0x375   :  { %v2059_v41 = vsel %vm2056_vm15, %v2058_v28, %v2054_v36  ;;  %v4687_v7 = vor.u32 %v5202_v21, %v4684_v12  ;;  %v4691_v31 = vor.u32 %v5205_v30, %v4690_v63  ;;  %v256_v3 = vadd.f32 %v5872_v26, %v5908_v45  ;;  %2700 = vmatpush.bf16.msra.mxu0 %v4683_v40  ;;  %v4674_v26 = vld [vmem:[#allocation10 + $0xc8] sm:$0xf]  ;;  %v4650_v36 = vld [vmem:[#allocation10 + $0xa0] sm:$0xf]  ;;  %v5190_v30 = vld [vmem:[#allocation10 + $0x84] sm:$0xf] }
 0x376   :  { %v6440_v6 = vadd.f32 %v2081_v14, %v2079_v13  ;;  %v2064_v54 = vmul.f32 %v5416_v48, %v2063_v43  ;;  %v2086_v32 = vmul.f32 %v5418_v37, %v2059_v41  ;;  %v305_v58 = vadd.f32 %v5890_v35, %v5939_v24  ;;  %v5199_v43 = vld [vmem:[#allocation10 + $0xcc] sm:$0xf]  ;;  %v4652_v41 = vld [vmem:[#allocation10 + $0xb0] sm:$0xf0] }
 0x377   :  { %v4695_v18 = vor.u32 %v5203_v49, %v4692_v17  ;;  %2714 = vmatpush.bf16.msrb.mxu1 %v4687_v7  ;;  %2728 = vmatpush.bf16.msra.mxu2 %v4691_v31  ;;  %v4667_v14 = vor.u32 %v5200_v50, %v4666_v25  ;;  %v4671_v35 = vor.u32 %v5198_v19, %v4668_v0  ;;  %v4642_v7 = vld [vmem:[#allocation10 + $0x88] sm:$0xf] }
 0x378   :  { %5419 = vtanh.f32 %v6440_v6  ;;  %v2065_v42 = vadd.f32 %v5416_v48, %v2064_v54  ;;  %v4675_v13 = vor.u32 %v5201_v11, %v4674_v26  ;;  %v4676_v54 = vld [vmem:[#allocation10 + $0xd8] sm:$0xf0] }
 0x379   :  { %2742 = vmatpush.bf16.msra.mxu3 %v4695_v18  ;;  %2701 = vmatpush.bf16.msra.mxu0 %v4667_v14  ;;  %v4679_v60 = vor.u32 %v5199_v43, %v4676_v54 }
 0x37a   :  { %v2069_v53 = vsel %vm2068_vm14, %v5416_v48, %v2065_v42 }
 0x37b   :  { %v2074_v10 = vsel %vm2071_vm0, %v2073_v39, %v2069_v53  ;;  %2715 = vmatpush.bf16.msrb.mxu1 %v4671_v35  ;;  %2729 = vmatpush.bf16.msra.mxu2 %v4675_v13  ;;  %v5196_v53 = vld [vmem:[#allocation10 + $0xac] sm:$0xf0] }
 0x37c   :  { %v4651_v39 = vor.u32 %v5196_v53, %v4650_v36  ;;  %v6997_v35 = vld [vmem:[#allocation22_spill] sm:$0xff] }
 0x37d   :  { %2743 = vmatpush.bf16.msra.mxu3 %v4679_v60  ;;  %v354_v13 = vadd.f32 %v6997_v35, %v5931_v51 }
 0x37e   :  { %v5420_v33 = vpop.eup %5419  ;;  %2702 = vmatpush.bf16.msra.mxu0 %v4651_v39  ;;  %v5186_v39 = vld [vmem:[#allocation10 + $0x64] sm:$0xf] }
 0x37f   :  { %v2087_v29 = vmul.f32 %v5420_v33, %v2074_v10  ;;  %v5194_v33 = vld [vmem:[#allocation10 + $0xa4] sm:$0xf]  ;;  %v4658_v10 = vld [vmem:[#allocation10 + $0xa8] sm:$0xf] }
 0x381   :  { %v2105_v9 = vpack.c.bf16 %v2087_v29, %v2086_v32  ;;  %v5197_v32 = vld [vmem:[#allocation10 + $0xb4] sm:$0xf0]  ;;  %v6993_v29 = vld [vmem:[#allocation21_spill] sm:$0xff] }
 0x382   :  { %v4659_v40 = vor.u32 %v5197_v32, %v4658_v10 }
 0x383   :  { %2306 = vmatmul.bf16.vlgmr.msrb.gmra.mxu0 %v2105_v9  ;;  %2320 = vmatmul.bf16.vlgmr.msra.gmra.mxu1 %v2105_v9 }
 0x384   :  { %2334 = vmatmul.bf16.vlgmr.msrb.gmra.mxu2 %v2105_v9  ;;  %2348 = vmatmul.bf16.vlgmr.msrb.gmra.mxu3 %v2105_v9  ;;  %v352_v9 = vadd.f32 %v6993_v29, %v5931_v51  ;;  %v4626_v29 = vld [vmem:[#allocation10 + $0x68] sm:$0xf] }
 0x385   :  { %2730 = vmatpush.bf16.msra.mxu2 %v4659_v40  ;;  %v4602_v40 = vld [vmem:[#allocation10 + $0x40] sm:$0xf] }
 0x400   :  { %v2307_v47 = vpop.f32.mrf.mxu0  ;;  %v2321_v15 = vpop.f32.mrf.mxu1 }
 0x401   :  { %v2354_v38 = vadd.f32 %v2307_v47, %v254_v4  ;;  %v2355_v34 = vadd.f32 %v2321_v15, %v303_v61  ;;  %v5195_v61 = vld [vmem:[#allocation10 + $0xac] sm:$0xf]  ;;  %v4660_v47 = vld [vmem:[#allocation10 + $0xb8] sm:$0xf0]  ;;  %v6994_v15 = vld [vmem:[#allocation23_spill] sm:$0xff] }
 0x402   :  { %v4663_v12 = vor.u32 %v5195_v61, %v4660_v47  ;;  %v4596_v61 = vld [vmem:[#allocation10 + $0x38] sm:$0xf0]  ;;  %v5176_v47 = vld [vmem:[#allocation10 + $0xc] sm:$0xf0] }
 0x403   :  { %v4562_v56 = vmul.f32 -1.442695, %v2354_v38  ;;  %v4564_v16 = vmul.f32 -1.442695, %v2355_v34  ;;  %v403_v38 = vadd.f32 %v6994_v15, %v5935_v55 }
 0x404   :  { %2744 = vmatpush.bf16.msra.mxu3 %v4663_v12  ;;  %v5184_v12 = vld [vmem:[#allocation10 + $0x4c] sm:$0xf0] }
 0x405   :  { %5421 = vpow2.f32 %v4562_v56  ;;  %v4655_v56 = vor.u32 %v5194_v33, %v4652_v41  ;;  %v4620_v33 = vld [vmem:[#allocation10 + $0x70] sm:$0xf0] }
 0x406   :  { %5423 = vpow2.f32 %v4564_v16  ;;  %v4634_v16 = vld [vmem:[#allocation10 + $0x80] sm:$0xf] }
 0x407   :  { %v2349_v2 = vpop.f32.mrf.mxu3  ;;  %v2335_v28 = vpop.f32.mrf.mxu2  ;;  %v4635_v63 = vor.u32 %v5192_v23, %v4634_v16  ;;  %2716 = vmatpush.bf16.msrb.mxu1 %v4655_v56 }
 0x408   :  { %v2357_v52 = vadd.f32 %v2349_v2, %v401_v22  ;;  %v2309_v27 = vpop.f32.mrf.mxu0  ;;  %v2323_v48 = vpop.f32.mrf.mxu1  ;;  %v2356_v21 = vadd.f32 %v2335_v28, %v352_v9  ;;  %v4636_v22 = vld [vmem:[#allocation10 + $0x90] sm:$0xf0]  ;;  %v5188_v28 = vld [vmem:[#allocation10 + $0x6c] sm:$0xf0]  ;;  %v5189_v9 = vld [vmem:[#allocation10 + $0x74] sm:$0xf0] }
 0x409   :  { %v2358_v8 = vadd.f32 %v2309_v27, %v256_v3  ;;  %v2359_v20 = vadd.f32 %v2323_v48, %v305_v58  ;;  %v4639_v17 = vor.u32 %v5190_v30, %v4636_v22  ;;  %v5193_v3 = vld [vmem:[#allocation10 + $0x94] sm:$0xf0]  ;;  %2703 = vmatpush.bf16.msra.mxu0 %v4635_v63 }
 0x40a   :  { %v4566_v62 = vmul.f32 -1.442695, %v2357_v52  ;;  %v4643_v27 = vor.u32 %v5193_v3, %v4642_v7 }
 0x40b   :  { %v5422_v1 = vpop.eup %5421  ;;  %v4563_v57 = vmul.f32 -1.442695, %v2358_v8  ;;  %v4565_v42 = vmul.f32 -1.442695, %v2359_v20  ;;  %2717 = vmatpush.bf16.msrb.mxu1 %v4639_v17  ;;  %v4610_v17 = vld [vmem:[#allocation10 + $0x48] sm:$0xf] }
 0x40c   :  { %v5424_v44 = vpop.eup %5423  ;;  %v6462_v46 = vadd.f32 1.0, %v5422_v1  ;;  %5425 = vpow2.f32 %v4566_v62  ;;  %2731 = vmatpush.bf16.msra.mxu2 %v4643_v27  ;;  %v5191_v1 = vld [vmem:[#allocation10 + $0x8c] sm:$0xf]  ;;  %v4627_v27 = vor.u32 %v5189_v9, %v4626_v29 }
 0x40d   :  { %v6464_v37 = vadd.f32 1.0, %v5424_v44  ;;  %5427 = vpow2.f32 %v4563_v57  ;;  %v4644_v57 = vld [vmem:[#allocation10 + $0x98] sm:$0xf0]  ;;  %v4618_v44 = vld [vmem:[#allocation10 + $0x60] sm:$0xf] }
 0x40e   :  { %5429 = vrcp.f32 %v6462_v46  ;;  %v2379_v34 = vand.u32 2147483647, %v6462_v46  ;;  %v2381_v2 = vand.u32 2147483648, %v6462_v46  ;;  %vm2375_vm4 = vweird.f32 %v6462_v46 }
 0x40f   :  { %5431 = vrcp.f32 %v6464_v37  ;;  %v2351_v4 = vpop.f32.mrf.mxu3  ;;  %v2419_v50 = vand.u32 2147483648, %v6464_v37  ;;  %v2417_v14 = vand.u32 2147483647, %v6464_v37  ;;  %v2337_v11 = vpop.f32.mrf.mxu2  ;;  %v4647_v32 = vor.u32 %v5191_v1, %v4644_v57  ;;  %v5178_v1 = vld [vmem:[#allocation10 + $0x24] sm:$0xf] }
 0x410   :  { %5433 = vpow2.f32 %v4565_v42  ;;  %v2361_v49 = vadd.f32 %v2351_v4, %v403_v38  ;;  %vm6487_vm1 = vcmp.eq.f32.partialorder %v2379_v34, 8.507059e+37  ;;  %v2382_v54 = vor.u32 1.1754944e-38, %v2381_v2  ;;  %v5187_v38 = vld [vmem:[#allocation10 + $0x6c] sm:$0xf]  ;;  %v4628_v34 = vld [vmem:[#allocation10 + $0x78] sm:$0xf0]  ;;  %2732 = vmatpush.bf16.msra.mxu2 %v4627_v27 }
 0x411   :  { %5435 = vtanh.f32 %v2356_v21  ;;  %v2420_v42 = vor.u32 1.1754944e-38, %v2419_v50  ;;  %v2360_v53 = vadd.f32 %v2337_v11, %v354_v13  ;;  %vm2413_vm5 = vweird.f32 %v6464_v37  ;;  %2745 = vmatpush.bf16.msra.mxu3 %v4647_v32  ;;  %v4612_v50 = vld [vmem:[#allocation10 + $0x58] sm:$0xf0]  ;;  %v5180_v11 = vld [vmem:[#allocation10 + $0x2c] sm:$0xf0] }
 0x412   :  { %v5426_v59 = vpop.eup %5425  ;;  %v4567_v62 = vmul.f32 -1.442695, %v2361_v49  ;;  %vm6514_vm7 = vcmp.eq.f32.partialorder %v2417_v14, 8.507059e+37  ;;  %v4623_v21 = vor.u32 %v5186_v39, %v4620_v33  ;;  %v4604_v49 = vld [vmem:[#allocation10 + $0x50] sm:$0xf0]  ;;  %v4631_v13 = vor.u32 %v5187_v38, %v4628_v34 }
 0x413   :  { %v5428_v31 = vpop.eup %5427  ;;  %v6476_v18 = vadd.f32 1.0, %v5426_v59  ;;  %v4619_v59 = vor.u32 %v5188_v28, %v4618_v44  ;;  %v4588_v57 = vld [vmem:[#allocation10 + $0x30] sm:$0xf0]  ;;  %v4594_v44 = vld [vmem:[#allocation10 + $0x28] sm:$0xf] }
 0x414   :  { %v6473_v58 = vpop.eup %5429  ;;  %v6478_v52 = vadd.f32 1.0, %v5428_v31  ;;  %v5182_v31 = vld [vmem:[#allocation10 + $0x44] sm:$0xf]  ;;  %2718 = vmatpush.bf16.msrb.mxu1 %v4623_v21  ;;  %v5181_v33 = vld [vmem:[#allocation10 + $0x34] sm:$0xf0] }
 0x415   :  { %v6480_v48 = vpop.eup %5431  ;;  %v2371_v25 = vmul.f32 %v6473_v58, %v6462_v46  ;;  %vm2376_vm2 = vweird.f32 %v6473_v58  ;;  %2704 = vmatpush.bf16.msra.mxu0 %v4619_v59  ;;  %2746 = vmatpush.bf16.msra.mxu3 %v4631_v13  ;;  %v4824_v38 = vld [vmem:[#allocation10 + $0xe8] sm:$0xf] }
 0x416   :  { %v5434_v19 = vpop.eup %5433  ;;  %v2409_v8 = vmul.f32 %v6480_v48, %v6464_v37  ;;  %5437 = vrcp.f32 %v6478_v52  ;;  %vm2414_vm3 = vweird.f32 %v6480_v48  ;;  %v2394_v10 = vand.u32 2147483647, %v6478_v52  ;;  %vm6509_vm6 = vmor %vm2375_vm4, %vm2376_vm2  ;;  %v5174_v37 = vld [vmem:[#allocation10 + $0x4] sm:$0xf] }
 0x417   :  { %v2372_v0 = vsub.f32 1.0, %v2371_v25  ;;  %v6493_v26 = vadd.f32 1.0, %v5434_v19  ;;  %5439 = vrcp.f32 %v6476_v18  ;;  %v5436_v4 = vpop.eup %5435  ;;  %vm6523_vm8 = vmor %vm2413_vm5, %vm2414_vm3  ;;  %vm2390_vm9 = vweird.f32 %v6478_v52  ;;  %v5185_v25 = vld [vmem:[#allocation10 + $0x54] sm:$0xf0] }
 0x418   :  { %v2410_v43 = vsub.f32 1.0, %v2409_v8  ;;  %v2396_v14 = vand.u32 2147483648, %v6478_v52  ;;  %vm2395_vm14 = vcmp.eq.f32.partialorder %v2394_v10, 8.507059e+37  ;;  %vm2453_vm2 = vweird.f32 %v6476_v18 }
 0x419   :  { %v2373_v60 = vmul.f32 %v6473_v58, %v2372_v0  ;;  %5441 = vrcp.f32 %v6493_v26  ;;  %v2434_v15 = vand.u32 2147483648, %v6493_v26  ;;  %v2432_v23 = vand.u32 2147483647, %v6493_v26  ;;  %v4586_v0 = vld [vmem:[#allocation10 + $0x20] sm:$0xf] }
 0x41a   :  { %v2411_v36 = vmul.f32 %v6480_v48, %v2410_v43  ;;  %5443 = vpow2.f32 %v4567_v62  ;;  %v4603_v43 = vor.u32 %v5184_v12, %v4602_v40  ;;  %v4587_v39 = vor.u32 %v5180_v11, %v4586_v0 }
 0x41b   :  { %v2374_v41 = vadd.f32 %v6473_v58, %v2373_v60  ;;  %5445 = vtanh.f32 %v2360_v53  ;;  %v4611_v53 = vor.u32 %v5185_v25, %v4610_v17  ;;  %vm2428_vm12 = vweird.f32 %v6493_v26 }
 0x41c   :  { %v2412_v46 = vadd.f32 %v6480_v48, %v2411_v36  ;;  %v6519_v56 = vpop.eup %5437  ;;  %2705 = vmatpush.bf16.msra.mxu0 %v4603_v43  ;;  %v2397_v34 = vor.u32 1.1754944e-38, %v2396_v14  ;;  %v4595_v12 = vor.u32 %v5181_v33, %v4594_v44  ;;  %vm2433_vm0 = vcmp.eq.f32.partialorder %v2432_v23, 8.507059e+37 }
 0x41d   :  { %v2378_v16 = vsel %vm6509_vm6, %v6473_v58, %v2374_v41  ;;  %v6531_v63 = vpop.eup %5439  ;;  %v2386_v7 = vmul.f32 %v6519_v56, %v6478_v52  ;;  %vm2391_vm10 = vweird.f32 %v6519_v56  ;;  %v5179_v41 = vld [vmem:[#allocation10 + $0x2c] sm:$0xf]  ;;  %2733 = vmatpush.bf16.msra.mxu2 %v4611_v53  ;;  %v2435_v52 = vor.u32 1.1754944e-38, %v2434_v15 }
 0x41e   :  { %v2383_v30 = vsel %vm6487_vm1, %v2382_v54, %v2378_v16  ;;  %v2416_v22 = vsel %vm6523_vm8, %v6480_v48, %v2412_v46  ;;  %v5183_v48 = vld [vmem:[#allocation10 + $0x4c] sm:$0xf]  ;;  %v2449_v35 = vmul.f32 %v6531_v63, %v6476_v18  ;;  %v4607_v54 = vor.u32 %v5182_v31, %v4604_v49  ;;  %v4570_v46 = vld [vmem:[#allocation10] sm:$0xf]  ;;  %vm6565_vm13 = vmor %vm2390_vm9, %vm2391_vm10 }
 0x41f   :  { %v6540_v3 = vpop.eup %5441  ;;  %v2421_v58 = vsel %vm6514_vm7, %v2420_v42, %v2416_v22  ;;  %v2482_v2 = vmul.f32 %v5436_v4, %v2383_v30  ;;  %v2387_v8 = vsub.f32 1.0, %v2386_v7  ;;  %v4615_v28 = vor.u32 %v5183_v48, %v4612_v50  ;;  %v4572_v16 = vld [vmem:[#allocation10 + $0x10] sm:$0xf0]  ;;  %v4578_v30 = vld [vmem:[#allocation10 + $0x8] sm:$0xf] }
 0x420   :  { %v2480_v19 = vmul.f32 %v2421_v58, %v6409_v5  ;;  %v2424_v20 = vmul.f32 %v6540_v3, %v6493_v26  ;;  %v5444_v62 = vpop.eup %5443  ;;  %vm2429_vm11 = vweird.f32 %v6540_v3  ;;  %2719 = vmatpush.bf16.msrb.mxu1 %v4607_v54  ;;  %v4591_v4 = vor.u32 %v5178_v1, %v4588_v57  ;;  %v5177_v22 = vld [vmem:[#allocation10 + $0x14] sm:$0xf0]  ;;  %2706 = vmatpush.bf16.msra.mxu0 %v4587_v39  ;;  %v5175_v58 = vld [vmem:[#allocation10 + $0xc] sm:$0xf] }
 0x421   :  { %v2388_v60 = vmul.f32 %v6519_v56, %v2387_v8  ;;  %v6555_v36 = vadd.f32 1.0, %v5444_v62  ;;  %v5446_v32 = vpop.eup %5445  ;;  %v2450_v59 = vsub.f32 1.0, %v2449_v35  ;;  %vm2430_vm15 = vmor %vm2428_vm12, %vm2429_vm11  ;;  %2747 = vmatpush.bf16.msra.mxu3 %v4615_v28  ;;  %v4599_v7 = vor.u32 %v5179_v41, %v4596_v61  ;;  %2734 = vmatpush.bf16.msra.mxu2 %v4595_v12  ;;  %v7007_v28 = vld [vmem:[#allocation31_spill] sm:$0xff] }
 0x422   :  { %v6551_v42 = vadd.f32 %v2482_v2, %v2480_v19  ;;  %v2425_v5 = vsub.f32 1.0, %v2424_v20  ;;  %v4571_v31 = vor.u32 %v5176_v47, %v4570_v46  ;;  %v4575_v17 = vor.u32 %v5174_v37, %v4572_v16  ;;  %v4580_v2 = vld [vmem:[#allocation10 + $0x18] sm:$0xf0]  ;;  %v4818_v47 = vld [vmem:[#allocation10 + $0xf0] sm:$0xf0] }
 0x423   :  { %v2389_v9 = vadd.f32 %v6519_v56, %v2388_v60  ;;  %5447 = vrcp.f32 %v6555_v36  ;;  %v4579_v25 = vor.u32 %v5177_v22, %v4578_v30  ;;  %v2451_v15 = vmul.f32 %v6531_v63, %v2450_v59  ;;  %v5235_v59 = vld [vmem:[#allocation10 + $0xec] sm:$0xf]  ;;  %v4800_v22 = vld [vmem:[#allocation10 + $0xc0] sm:$0xf] }
 0x424   :  { %v2426_v29 = vmul.f32 %v6540_v3, %v2425_v5  ;;  %2720 = vmatpush.bf16.msrb.mxu1 %v4591_v4  ;;  %2707 = vmatpush.bf16.msra.mxu0 %v4571_v31  ;;  %v4583_v19 = vor.u32 %v5175_v58, %v4580_v2  ;;  %5449 = vtanh.f32 %v6551_v42  ;;  %vm2454_vm1 = vweird.f32 %v6531_v63  ;;  %v4802_v31 = vld [vmem:[#allocation10 + $0xd0] sm:$0xf0] }
 0x425   :  { %v2393_v21 = vsel %vm6565_vm13, %v6519_v56, %v2389_v9  ;;  %2748 = vmatpush.bf16.msra.mxu3 %v4599_v7  ;;  %2735 = vmatpush.bf16.msra.mxu2 %v4579_v25  ;;  %v2452_v23 = vadd.f32 %v6531_v63, %v2451_v15  ;;  %v2474_v20 = vand.u32 2147483648, %v6555_v36  ;;  %v2457_v14 = vand.u32 2147483647, %v6476_v18  ;;  %vm2455_vm4 = vmor %vm2453_vm2, %vm2454_vm1  ;;  %v5234_v9 = vld [vmem:[#allocation10 + $0xe4] sm:$0xf] }
 0x426   :  { %v2427_v40 = vadd.f32 %v6540_v3, %v2426_v29  ;;  %v2398_v10 = vsel %vm2395_vm14, %v2397_v34, %v2393_v21  ;;  %v2472_v11 = vand.u32 2147483647, %v6555_v36  ;;  %vm2468_vm5 = vweird.f32 %v6555_v36  ;;  %v5236_v29 = vld [vmem:[#allocation10 + $0xec] sm:$0xf0]  ;;  %v5237_v34 = vld [vmem:[#allocation10 + $0xf4] sm:$0xf0] }
 0x427   :  { %v2483_v56 = vmul.f32 %v5446_v32, %v2398_v10  ;;  %v2456_v35 = vsel %vm2455_vm4, %v6531_v63, %v2452_v23  ;;  %v2475_v54 = vor.u32 1.1754944e-38, %v2474_v20  ;;  %vm2458_vm7 = vcmp.eq.f32.partialorder %v2457_v14, 8.507059e+37  ;;  %v4816_v32 = vld [vmem:[#allocation10 + $0xe0] sm:$0xf]  ;;  %v4826_v21 = vld [vmem:[#allocation10 + $0xf8] sm:$0xf0] }
 0x428   :  { %v2431_v49 = vsel %vm2430_vm15, %v6540_v3, %v2427_v40  ;;  %2721 = vmatpush.bf16.msrb.mxu1 %v4575_v17  ;;  %vm2473_vm8 = vcmp.eq.f32.partialorder %v2472_v11, 8.507059e+37  ;;  %v308_v39 = vadd.f32 %v7007_v28, %v5939_v24  ;;  %v4817_v46 = vor.u32 %v5236_v29, %v4816_v32  ;;  %v5230_v10 = vld [vmem:[#allocation10 + $0xc4] sm:$0xf]  ;;  %v7008_v17 = vld [vmem:[#allocation26_spill] sm:$0xff]  ;;  %v4810_v15 = vld [vmem:[#allocation10 + $0xd8] sm:$0xf0] }
 0x429   :  { %v2436_v27 = vsel %vm2433_vm0, %v2435_v52, %v2431_v49  ;;  %v5448_v50 = vpop.eup %5447  ;;  %2749 = vmatpush.bf16.msra.mxu3 %v4583_v19  ;;  %v4821_v37 = vor.u32 %v5234_v9, %v4818_v47  ;;  %v4825_v16 = vor.u32 %v5237_v34, %v4824_v38  ;;  %v4829_v30 = vor.u32 %v5235_v59, %v4826_v21  ;;  %v5232_v52 = vld [vmem:[#allocation10 + $0xcc] sm:$0xf0]  ;;  %v4808_v49 = vld [vmem:[#allocation10 + $0xc8] sm:$0xf]  ;;  %v5231_v25 = vld [vmem:[#allocation10 + $0xcc] sm:$0xf] }
 0x42a   :  { %v2481_v48 = vmul.f32 %v2436_v27, %v6440_v6  ;;  %v2464_v26 = vmul.f32 %v5448_v50, %v6555_v36  ;;  %v2459_v6 = vand.u32 2147483648, %v6476_v18  ;;  %vm2469_vm3 = vweird.f32 %v5448_v50  ;;  %v5450_v13 = vpop.eup %5449  ;;  %v7006_v36 = vld [vmem:[#allocation24_spill] sm:$0xff]  ;;  %3102 = vmatpush.bf16.msrb.mxu0 %v4817_v46  ;;  %v7010_v19 = vld [vmem:[#allocation35_spill] sm:$0xff]  ;;  %v5228_v11 = vld [vmem:[#allocation10 + $0xac] sm:$0xf0] }
 0x42b   :  { %vm2470_vm6 = vmor %vm2468_vm5, %vm2469_vm3  ;;  %v259_v63 = vadd.f32 %v7006_v36, %v5908_v45  ;;  %3130 = vmatpush.bf16.msrb.mxu2 %v4825_v16  ;;  %v4801_v7 = vor.u32 %v5232_v52, %v4800_v22  ;;  %v406_v58 = vadd.f32 %v7008_v17, %v5935_v55  ;;  %v4805_v2 = vor.u32 %v5230_v10, %v4802_v31  ;;  %v4768_v32 = vld [vmem:[#allocation10 + $0x80] sm:$0xf]  ;;  %v5224_v29 = vld [vmem:[#allocation10 + $0x8c] sm:$0xf0] }
 0x42c   :  { %v6585_v3 = vadd.f32 %v2483_v56, %v2481_v48  ;;  %v2465_v8 = vsub.f32 1.0, %v2464_v26  ;;  %v2460_v43 = vor.u32 1.1754944e-38, %v2459_v6  ;;  %3116 = vmatpush.bf16.msra.mxu1 %v4821_v37  ;;  %v5233_v56 = vld [vmem:[#allocation10 + $0xd4] sm:$0xf0]  ;;  %v310_v26 = vadd.f32 %v7010_v19, %v5939_v24  ;;  %v5222_v46 = vld [vmem:[#allocation10 + $0x84] sm:$0xf] }
 0x42d   :  { %3144 = vmatpush.bf16.msrb.mxu3 %v4829_v30  ;;  %v4809_v27 = vor.u32 %v5233_v56, %v4808_v49  ;;  %v7009_v48 = vld [vmem:[#allocation27_spill] sm:$0xff]  ;;  %v4776_v38 = vld [vmem:[#allocation10 + $0x88] sm:$0xf]  ;;  %v5223_v21 = vld [vmem:[#allocation10 + $0x8c] sm:$0xf] }
 0x42e   :  { %5451 = vtanh.f32 %v6585_v3  ;;  %v2466_v0 = vmul.f32 %v5448_v50, %v2465_v8  ;;  %v2461_v5 = vsel %vm2458_vm7, %v2460_v43, %v2456_v35  ;;  %3103 = vmatpush.bf16.msrb.mxu0 %v4801_v7  ;;  %v4813_v8 = vor.u32 %v5231_v25, %v4810_v15  ;;  %v4770_v47 = vld [vmem:[#allocation10 + $0x90] sm:$0xf0]  ;;  %v5225_v34 = vld [vmem:[#allocation10 + $0x94] sm:$0xf0]  ;;  %v7011_v37 = vld [vmem:[#allocation25_spill] sm:$0xff] }
 0x42f   :  { %v2488_v60 = vmul.f32 %v5450_v13, %v2461_v5  ;;  %3131 = vmatpush.bf16.msrb.mxu2 %v4809_v27  ;;  %v357_v16 = vadd.f32 %v7011_v37, %v5931_v51  ;;  %v4773_v52 = vor.u32 %v5222_v46, %v4770_v47  ;;  %v4752_v10 = vld [vmem:[#allocation10 + $0x60] sm:$0xf]  ;;  %v5220_v7 = vld [vmem:[#allocation10 + $0x6c] sm:$0xf0]  ;;  %v4777_v56 = vor.u32 %v5225_v34, %v4776_v38  ;;  %v4754_v27 = vld [vmem:[#allocation10 + $0x70] sm:$0xf0] }
 0x430   :  { %v2467_v62 = vadd.f32 %v5448_v50, %v2466_v0  ;;  %3117 = vmatpush.bf16.msra.mxu1 %v4805_v2  ;;  %v4784_v0 = vld [vmem:[#allocation10 + $0xa0] sm:$0xf]  ;;  %v5218_v2 = vld [vmem:[#allocation10 + $0x64] sm:$0xf]  ;;  %v4760_v25 = vld [vmem:[#allocation10 + $0x68] sm:$0xf] }
 0x431   :  { %3145 = vmatpush.bf16.msrb.mxu3 %v4813_v8  ;;  %v4785_v43 = vor.u32 %v5228_v11, %v4784_v0  ;;  %v5221_v19 = vld [vmem:[#allocation10 + $0x74] sm:$0xf0]  ;;  %v4738_v46 = vld [vmem:[#allocation10 + $0x50] sm:$0xf0]  ;;  %v4744_v37 = vld [vmem:[#allocation10 + $0x48] sm:$0xf] }
 0x432   :  { %v2471_v57 = vsel %vm2470_vm6, %v5448_v50, %v2467_v62  ;;  %v261_v50 = vadd.f32 %v7009_v48, %v5908_v45  ;;  %v5226_v62 = vld [vmem:[#allocation10 + $0xa4] sm:$0xf] }
 0x433   :  { %v2476_v18 = vsel %vm2473_vm8, %v2475_v54, %v2471_v57  ;;  %v4786_v54 = vld [vmem:[#allocation10 + $0xb0] sm:$0xf0]  ;;  %v5229_v57 = vld [vmem:[#allocation10 + $0xb4] sm:$0xf0]  ;;  %3104 = vmatpush.bf16.msrb.mxu0 %v4785_v43 }
 0x434   :  { %v5452_v1 = vpop.eup %5451 }
 0x435   :  { %v2489_v44 = vmul.f32 %v5452_v1, %v2476_v18  ;;  %v4792_v1 = vld [vmem:[#allocation10 + $0xa8] sm:$0xf]  ;;  %v4789_v18 = vor.u32 %v5226_v62, %v4786_v54 }
 0x437   :  { %v2507_v53 = vpack.c.bf16 %v2489_v44, %v2488_v60  ;;  %v4793_v60 = vor.u32 %v5229_v57, %v4792_v1  ;;  %v5227_v44 = vld [vmem:[#allocation10 + $0xac] sm:$0xf]  ;;  %3118 = vmatpush.bf16.msra.mxu1 %v4789_v18  ;;  %v7015_v18 = vld [vmem:[#allocation28_spill] sm:$0xff] }
 0x439   :  { %2708 = vmatmul.bf16.vlgmr.msra.gmra.mxu0 %v2507_v53  ;;  %2722 = vmatmul.bf16.vlgmr.msrb.gmra.mxu1 %v2507_v53 }
 0x43a   :  { %2736 = vmatmul.bf16.vlgmr.msra.gmra.mxu2 %v2507_v53  ;;  %2750 = vmatmul.bf16.vlgmr.msra.gmra.mxu3 %v2507_v53  ;;  %v4794_v53 = vld [vmem:[#allocation10 + $0xb8] sm:$0xf0] }
 0x43b   :  { %3132 = vmatpush.bf16.msrb.mxu2 %v4793_v60  ;;  %3119 = vmatpush.bf16.msra.mxu1 %v4773_v52  ;;  %v359_v60 = vadd.f32 %v7015_v18, %v5931_v51 }
 0x43f   :  { %3133 = vmatpush.bf16.msrb.mxu2 %v4777_v56  ;;  %v4720_v56 = vld [vmem:[#allocation10 + $0x20] sm:$0xf] }
 0x4b6   :  { %v2709_v33 = vpop.f32.mrf.mxu0  ;;  %v2723_v41 = vpop.f32.mrf.mxu1 }
 0x4b7   :  { %v2756_v4 = vadd.f32 %v2709_v33, %v259_v63  ;;  %v2757_v61 = vadd.f32 %v2723_v41, %v308_v39  ;;  %v4797_v39 = vor.u32 %v5227_v44, %v4794_v53 }
 0x4b9   :  { %v4696_v40 = vmul.f32 -1.442695, %v2756_v4  ;;  %v4698_v12 = vmul.f32 -1.442695, %v2757_v61  ;;  %3146 = vmatpush.bf16.msrb.mxu3 %v4797_v39  ;;  %v4769_v61 = vor.u32 %v5224_v29, %v4768_v32 }
 0x4bb   :  { %5453 = vpow2.f32 %v4696_v40  ;;  %3105 = vmatpush.bf16.msrb.mxu0 %v4769_v61  ;;  %v4778_v40 = vld [vmem:[#allocation10 + $0x98] sm:$0xf0]  ;;  %v5214_v61 = vld [vmem:[#allocation10 + $0x44] sm:$0xf] }
 0x4bc   :  { %5455 = vpow2.f32 %v4698_v12  ;;  %v7012_v12 = vld [vmem:[#allocation29_spill] sm:$0xff]  ;;  %v4781_v17 = vor.u32 %v5223_v21, %v4778_v40  ;;  %v4714_v21 = vld [vmem:[#allocation10 + $0x18] sm:$0xf0] }
 0x4bd   :  { %v2751_v23 = vpop.f32.mrf.mxu3  ;;  %v2737_v4 = vpop.f32.mrf.mxu2  ;;  %v408_v30 = vadd.f32 %v7012_v12, %v5935_v55 }
 0x4be   :  { %v2759_v6 = vadd.f32 %v2751_v23, %v406_v58  ;;  %v2711_v20 = vpop.f32.mrf.mxu0  ;;  %v2725_v14 = vpop.f32.mrf.mxu1  ;;  %v2758_v49 = vadd.f32 %v2737_v4, %v357_v16  ;;  %v4753_v58 = vor.u32 %v5220_v7, %v4752_v10  ;;  %3147 = vmatpush.bf16.msrb.mxu3 %v4781_v17  ;;  %v5216_v4 = vld [vmem:[#allocation10 + $0x4c] sm:$0xf0]  ;;  %v5217_v16 = vld [vmem:[#allocation10 + $0x54] sm:$0xf0] }
 0x4bf   :  { %v2760_v35 = vadd.f32 %v2711_v20, %v261_v50  ;;  %v2761_v13 = vadd.f32 %v2725_v14, %v310_v26  ;;  %v4757_v50 = vor.u32 %v5218_v2, %v4754_v27  ;;  %v4761_v20 = vor.u32 %v5221_v19, %v4760_v25  ;;  %v5212_v17 = vld [vmem:[#allocation10 + $0x2c] sm:$0xf0] }
 0x4c0   :  { %v4700_v5 = vmul.f32 -1.442695, %v2759_v6  ;;  %3106 = vmatpush.bf16.msrb.mxu0 %v4753_v58 }
 0x4c1   :  { %v5454_v36 = vpop.eup %5453  ;;  %v4697_v63 = vmul.f32 -1.442695, %v2760_v35  ;;  %v4699_v28 = vmul.f32 -1.442695, %v2761_v13  ;;  %3120 = vmatpush.bf16.msra.mxu1 %v4757_v50  ;;  %3134 = vmatpush.bf16.msrb.mxu2 %v4761_v20  ;;  %v4728_v50 = vld [vmem:[#allocation10 + $0x28] sm:$0xf]  ;;  %v4745_v20 = vor.u32 %v5217_v16, %v4744_v37 }
 0x4c2   :  { %v5456_v33 = vpop.eup %5455  ;;  %v6609_v41 = vadd.f32 1.0, %v5454_v36  ;;  %5457 = vpow2.f32 %v4700_v5  ;;  %v5219_v36 = vld [vmem:[#allocation10 + $0x6c] sm:$0xf] }
 0x4c3   :  { %v6611_v9 = vadd.f32 1.0, %v5456_v33  ;;  %5459 = vpow2.f32 %v4697_v63  ;;  %v4762_v63 = vld [vmem:[#allocation10 + $0x78] sm:$0xf0]  ;;  %v4736_v33 = vld [vmem:[#allocation10 + $0x40] sm:$0xf] }
 0x4c4   :  { %5461 = vrcp.f32 %v6609_v41  ;;  %v2781_v22 = vand.u32 2147483647, %v6609_v41  ;;  %v2783_v23 = vand.u32 2147483648, %v6609_v41  ;;  %vm2777_vm12 = vweird.f32 %v6609_v41 }
 0x4c5   :  { %5463 = vrcp.f32 %v6611_v9  ;;  %v2753_v59 = vpop.f32.mrf.mxu3  ;;  %v2821_v11 = vand.u32 2147483648, %v6611_v9  ;;  %v2819_v43 = vand.u32 2147483647, %v6611_v9  ;;  %v2739_v57 = vpop.f32.mrf.mxu2  ;;  %v4765_v34 = vor.u32 %v5219_v36, %v4762_v63  ;;  %3135 = vmatpush.bf16.msrb.mxu2 %v4745_v20  ;;  %v5206_v36 = vld [vmem:[#allocation10 + $0x4] sm:$0xf] }
 0x4c6   :  { %5465 = vpow2.f32 %v4699_v28  ;;  %v2763_v48 = vadd.f32 %v2753_v59, %v408_v30  ;;  %vm6634_vm9 = vcmp.eq.f32.partialorder %v2781_v22, 8.507059e+37  ;;  %v2784_v53 = vor.u32 1.1754944e-38, %v2783_v23  ;;  %v5215_v30 = vld [vmem:[#allocation10 + $0x4c] sm:$0xf]  ;;  %v4746_v22 = vld [vmem:[#allocation10 + $0x58] sm:$0xf0] }
 0x4c7   :  { %5467 = vtanh.f32 %v2758_v49  ;;  %v2822_v28 = vor.u32 1.1754944e-38, %v2821_v11  ;;  %v2762_v29 = vadd.f32 %v2739_v57, %v359_v60  ;;  %vm2815_vm13 = vweird.f32 %v6611_v9  ;;  %3148 = vmatpush.bf16.msrb.mxu3 %v4765_v34  ;;  %v4730_v11 = vld [vmem:[#allocation10 + $0x38] sm:$0xf0]  ;;  %v5208_v57 = vld [vmem:[#allocation10 + $0xc] sm:$0xf0] }
 0x4c8   :  { %v5458_v31 = vpop.eup %5457  ;;  %v4701_v5 = vmul.f32 -1.442695, %v2763_v48  ;;  %vm6661_vm15 = vcmp.eq.f32.partialorder %v2819_v43, 8.507059e+37  ;;  %v4741_v49 = vor.u32 %v5214_v61, %v4738_v46  ;;  %v4722_v48 = vld [vmem:[#allocation10 + $0x30] sm:$0xf0]  ;;  %v4749_v60 = vor.u32 %v5215_v30, %v4746_v22 }
 0x4c9   :  { %v5460_v15 = vpop.eup %5459  ;;  %v6623_v8 = vadd.f32 1.0, %v5458_v31  ;;  %v4737_v31 = vor.u32 %v5216_v4, %v4736_v33  ;;  %v4706_v63 = vld [vmem:[#allocation10 + $0x10] sm:$0xf0]  ;;  %v4712_v61 = vld [vmem:[#allocation10 + $0x8] sm:$0xf] }
 0x4ca   :  { %v6620_v26 = vpop.eup %5461  ;;  %v6625_v6 = vadd.f32 1.0, %v5460_v15  ;;  %v5210_v15 = vld [vmem:[#allocation10 + $0x24] sm:$0xf]  ;;  %3121 = vmatpush.bf16.msra.mxu1 %v4741_v49  ;;  %v5209_v46 = vld [vmem:[#allocation10 + $0x14] sm:$0xf0]  ;;  %v4709_v16 = vor.u32 %v5206_v36, %v4706_v63  ;;  %v7023_v63 = vld [vmem:[#allocation38_spill] sm:$0xff] }
 0x4cb   :  { %v6627_v14 = vpop.eup %5463  ;;  %v2773_v0 = vmul.f32 %v6620_v26, %v6609_v41  ;;  %vm2778_vm10 = vweird.f32 %v6620_v26  ;;  %3107 = vmatpush.bf16.msrb.mxu0 %v4737_v31  ;;  %3149 = vmatpush.bf16.msrb.mxu3 %v4749_v60  ;;  %v4958_v60 = vld [vmem:[#allocation10 + $0xe8] sm:$0xf] }
 0x4cc   :  { %v5466_v62 = vpop.eup %5465  ;;  %v2811_v35 = vmul.f32 %v6627_v14, %v6611_v9  ;;  %5469 = vrcp.f32 %v6625_v6  ;;  %vm2816_vm11 = vweird.f32 %v6627_v14  ;;  %v2796_v38 = vand.u32 2147483647, %v6625_v6  ;;  %vm6656_vm14 = vmor %vm2777_vm12, %vm2778_vm10 }
 0x4cd   :  { %v2774_v54 = vsub.f32 1.0, %v2773_v0  ;;  %v6640_v1 = vadd.f32 1.0, %v5466_v62  ;;  %5471 = vrcp.f32 %v6623_v8  ;;  %v5468_v59 = vpop.eup %5467  ;;  %vm6670_vm0 = vmor %vm2815_vm13, %vm2816_vm11  ;;  %vm2792_vm1 = vweird.f32 %v6625_v6  ;;  %v5213_v0 = vld [vmem:[#allocation10 + $0x34] sm:$0xf0] }
 0x4ce   :  { %v2812_v44 = vsub.f32 1.0, %v2811_v35  ;;  %v2798_v43 = vand.u32 2147483648, %v6625_v6  ;;  %vm2797_vm6 = vcmp.eq.f32.partialorder %v2796_v38, 8.507059e+37  ;;  %v4713_v9 = vor.u32 %v5209_v46, %v4712_v61 }
 0x4cf   :  { %v2775_v39 = vmul.f32 %v6620_v26, %v2774_v54  ;;  %5473 = vrcp.f32 %v6640_v1  ;;  %v2836_v12 = vand.u32 2147483648, %v6640_v1  ;;  %v2834_v7 = vand.u32 2147483647, %v6640_v1  ;;  %v4704_v54 = vld [vmem:[#allocation10] sm:$0xf] }
 0x4d0   :  { %v2813_v32 = vmul.f32 %v6627_v14, %v2812_v44  ;;  %5475 = vpow2.f32 %v4701_v5  ;;  %v4721_v44 = vor.u32 %v5212_v17, %v4720_v56  ;;  %v4705_v4 = vor.u32 %v5208_v57, %v4704_v54  ;;  %v4950_v54 = vld [vmem:[#allocation10 + $0xe0] sm:$0xf]  ;;  %v5268_v57 = vld [vmem:[#allocation10 + $0xec] sm:$0xf0] }
 0x4d1   :  { %v2776_v47 = vadd.f32 %v6620_v26, %v2775_v39  ;;  %5477 = vtanh.f32 %v2762_v29  ;;  %vm2830_vm4 = vweird.f32 %v6640_v1  ;;  %vm2835_vm8 = vcmp.eq.f32.partialorder %v2834_v7, 8.507059e+37 }
 0x4d2   :  { %v2814_v41 = vadd.f32 %v6627_v14, %v2813_v32  ;;  %v6666_v52 = vpop.eup %5469  ;;  %3108 = vmatpush.bf16.msrb.mxu0 %v4721_v44  ;;  %v4729_v32 = vor.u32 %v5213_v0, %v4728_v50  ;;  %vm2855_vm10 = vweird.f32 %v6623_v8  ;;  %v2861_v7 = vand.u32 2147483648, %v6623_v8  ;;  %v5269_v44 = vld [vmem:[#allocation10 + $0xf4] sm:$0xf0] }
 0x4d3   :  { %v2780_v10 = vsel %vm6656_vm14, %v6620_v26, %v2776_v47  ;;  %v6678_v58 = vpop.eup %5471  ;;  %v2788_v25 = vmul.f32 %v6666_v52, %v6625_v6  ;;  %vm2793_vm2 = vweird.f32 %v6666_v52 }
 0x4d4   :  { %v2785_v2 = vsel %vm6634_vm9, %v2784_v53, %v2780_v10  ;;  %v2818_v27 = vsel %vm6670_vm0, %v6627_v14, %v2814_v41  ;;  %v5211_v14 = vld [vmem:[#allocation10 + $0x2c] sm:$0xf]  ;;  %v2851_v18 = vmul.f32 %v6678_v58, %v6623_v8  ;;  %v4725_v53 = vor.u32 %v5210_v15, %v4722_v48  ;;  %vm2794_vm5 = vmor %vm2792_vm1, %vm2793_vm2  ;;  %3136 = vmatpush.bf16.msrb.mxu2 %v4729_v32 }
 0x4d5   :  { %v6687_v19 = vpop.eup %5473  ;;  %v2823_v26 = vsel %vm6661_vm15, %v2822_v28, %v2818_v27  ;;  %v2884_v23 = vmul.f32 %v5468_v59, %v2785_v2  ;;  %v2789_v35 = vsub.f32 1.0, %v2788_v25  ;;  %v4733_v29 = vor.u32 %v5211_v14, %v4730_v11  ;;  %v5207_v59 = vld [vmem:[#allocation10 + $0xc] sm:$0xf] }
 0x4d6   :  { %v2882_v62 = vmul.f32 %v2823_v26, %v6551_v42  ;;  %v2826_v13 = vmul.f32 %v6687_v19, %v6640_v1  ;;  %v5476_v5 = vpop.eup %5475  ;;  %vm2831_vm3 = vweird.f32 %v6687_v19  ;;  %3122 = vmatpush.bf16.msra.mxu1 %v4725_v53  ;;  %v2799_v41 = vor.u32 1.1754944e-38, %v2798_v43  ;;  %3109 = vmatpush.bf16.msrb.mxu0 %v4705_v4  ;;  %v7022_v53 = vld [vmem:[#allocation30_spill] sm:$0xff] }
 0x4d7   :  { %v2790_v39 = vmul.f32 %v6666_v52, %v2789_v35  ;;  %v6702_v33 = vadd.f32 1.0, %v5476_v5  ;;  %v5478_v47 = vpop.eup %5477  ;;  %v2852_v40 = vsub.f32 1.0, %v2851_v18  ;;  %vm2832_vm7 = vmor %vm2830_vm4, %vm2831_vm3  ;;  %v2837_v10 = vor.u32 1.1754944e-38, %v2836_v12  ;;  %3150 = vmatpush.bf16.msrb.mxu3 %v4733_v29  ;;  %v4952_v18 = vld [vmem:[#allocation10 + $0xf0] sm:$0xf0] }
 0x4d8   :  { %v6698_v28 = vadd.f32 %v2884_v23, %v2882_v62  ;;  %v2827_v42 = vsub.f32 1.0, %v2826_v13  ;;  %v4717_v6 = vor.u32 %v5207_v59, %v4714_v21  ;;  %3137 = vmatpush.bf16.msrb.mxu2 %v4713_v9  ;;  %vm2856_vm9 = vweird.f32 %v6678_v58  ;;  %v5267_v32 = vld [vmem:[#allocation10 + $0xec] sm:$0xf]  ;;  %v4960_v29 = vld [vmem:[#allocation10 + $0xf8] sm:$0xf0] }
 0x4d9   :  { %v2791_v37 = vadd.f32 %v6666_v52, %v2790_v39  ;;  %5479 = vrcp.f32 %v6702_v33  ;;  %v2853_v56 = vmul.f32 %v6678_v58, %v2852_v40  ;;  %v2859_v15 = vand.u32 2147483647, %v6623_v8  ;;  %vm2857_vm12 = vmor %vm2855_vm10, %vm2856_vm9  ;;  %v5262_v59 = vld [vmem:[#allocation10 + $0xc4] sm:$0xf]  ;;  %v4942_v40 = vld [vmem:[#allocation10 + $0xc8] sm:$0xf] }
 0x4da   :  { %v2828_v34 = vmul.f32 %v6687_v19, %v2827_v42  ;;  %3123 = vmatpush.bf16.msra.mxu1 %v4709_v16  ;;  %5481 = vtanh.f32 %v6698_v28  ;;  %v2874_v50 = vand.u32 2147483647, %v6702_v33  ;;  %vm2870_vm13 = vweird.f32 %v6702_v33  ;;  %v5264_v16 = vld [vmem:[#allocation10 + $0xcc] sm:$0xf0] }
 0x4db   :  { %v2795_v30 = vsel %vm2794_vm5, %v6666_v52, %v2791_v37  ;;  %3151 = vmatpush.bf16.msrb.mxu3 %v4717_v6  ;;  %v2854_v25 = vadd.f32 %v6678_v58, %v2853_v56  ;;  %v2862_v20 = vor.u32 1.1754944e-38, %v2861_v7  ;;  %vm2860_vm15 = vcmp.eq.f32.partialorder %v2859_v15, 8.507059e+37  ;;  %v4934_v37 = vld [vmem:[#allocation10 + $0xc0] sm:$0xf]  ;;  %v5263_v6 = vld [vmem:[#allocation10 + $0xcc] sm:$0xf] }
 0x4dc   :  { %v2829_v22 = vadd.f32 %v6687_v19, %v2828_v34  ;;  %v2800_v31 = vsel %vm2797_vm6, %v2799_v41, %v2795_v30  ;;  %vm2875_vm0 = vcmp.eq.f32.partialorder %v2874_v50, 8.507059e+37  ;;  %v4951_v5 = vor.u32 %v5268_v57, %v4950_v54  ;;  %v4936_v41 = vld [vmem:[#allocation10 + $0xd0] sm:$0xf0]  ;;  %v5265_v30 = vld [vmem:[#allocation10 + $0xd4] sm:$0xf0]  ;;  %v7025_v15 = vld [vmem:[#allocation34_spill] sm:$0xff] }
 0x4dd   :  { %v2885_v49 = vmul.f32 %v5478_v47, %v2800_v31  ;;  %v2858_v26 = vsel %vm2857_vm12, %v6678_v58, %v2854_v25  ;;  %v5266_v58 = vld [vmem:[#allocation10 + $0xe4] sm:$0xf]  ;;  %v264_v36 = vadd.f32 %v7022_v53, %v5908_v45  ;;  %v313_v42 = vadd.f32 %v7023_v63, %v5939_v24  ;;  %v5260_v56 = vld [vmem:[#allocation10 + $0xac] sm:$0xf0]  ;;  %v4926_v7 = vld [vmem:[#allocation10 + $0xa8] sm:$0xf] }
 0x4de   :  { %v2833_v38 = vsel %vm2832_vm7, %v6687_v19, %v2829_v22  ;;  %v2863_v62 = vsel %vm2860_vm15, %v2862_v20, %v2858_v26  ;;  %v4955_v39 = vor.u32 %v5266_v58, %v4952_v18  ;;  %3504 = vmatpush.bf16.msra.mxu0 %v4951_v5  ;;  %v4963_v46 = vor.u32 %v5267_v32, %v4960_v29  ;;  %v7026_v50 = vld [vmem:[#allocation41_spill] sm:$0xff]  ;;  %v4902_v54 = vld [vmem:[#allocation10 + $0x80] sm:$0xf]  ;;  %v5256_v57 = vld [vmem:[#allocation10 + $0x8c] sm:$0xf0] }
 0x4df   :  { %v2838_v52 = vsel %vm2835_vm8, %v2837_v10, %v2833_v38  ;;  %v5480_v2 = vpop.eup %5479  ;;  %v4935_v21 = vor.u32 %v5264_v16, %v4934_v37  ;;  %v4939_v10 = vor.u32 %v5262_v59, %v4936_v41  ;;  %v4943_v31 = vor.u32 %v5265_v30, %v4942_v40  ;;  %v4944_v38 = vld [vmem:[#allocation10 + $0xd8] sm:$0xf0]  ;;  %v5254_v58 = vld [vmem:[#allocation10 + $0x84] sm:$0xf]  ;;  %v4886_v37 = vld [vmem:[#allocation10 + $0x60] sm:$0xf] }
 0x4e0   :  { %v2883_v17 = vmul.f32 %v2838_v52, %v6585_v3  ;;  %v2866_v27 = vmul.f32 %v5480_v2, %v6702_v33  ;;  %v2876_v3 = vand.u32 2147483648, %v6702_v33  ;;  %vm2871_vm11 = vweird.f32 %v5480_v2  ;;  %v5482_v23 = vpop.eup %5481  ;;  %3518 = vmatpush.bf16.msrb.mxu1 %v4955_v39  ;;  %3546 = vmatpush.bf16.msra.mxu3 %v4963_v46  ;;  %v4918_v52 = vld [vmem:[#allocation10 + $0xa0] sm:$0xf]  ;;  %v5257_v39 = vld [vmem:[#allocation10 + $0x94] sm:$0xf0] }
 0x4e1   :  { %vm2872_vm14 = vmor %vm2870_vm13, %vm2871_vm11  ;;  %v2890_v35 = vmul.f32 %v5482_v23, %v2863_v62  ;;  %v4959_v33 = vor.u32 %v5269_v44, %v4958_v60  ;;  %v4919_v25 = vor.u32 %v5260_v56, %v4918_v52  ;;  %v4903_v18 = vor.u32 %v5256_v57, %v4902_v54  ;;  %v4904_v60 = vld [vmem:[#allocation10 + $0x90] sm:$0xf0]  ;;  %v4910_v44 = vld [vmem:[#allocation10 + $0x88] sm:$0xf] }
 0x4e2   :  { %v6726_v12 = vadd.f32 %v2885_v49, %v2883_v17  ;;  %v2867_v1 = vsub.f32 1.0, %v2866_v27  ;;  %v2877_v0 = vor.u32 1.1754944e-38, %v2876_v3  ;;  %3505 = vmatpush.bf16.msra.mxu0 %v4935_v21  ;;  %v4947_v49 = vor.u32 %v5263_v6, %v4944_v38  ;;  %v5258_v17 = vld [vmem:[#allocation10 + $0xa4] sm:$0xf]  ;;  %v5261_v3 = vld [vmem:[#allocation10 + $0xb4] sm:$0xf0] }
 0x4e3   :  { %3532 = vmatpush.bf16.msra.mxu2 %v4959_v33  ;;  %v4927_v20 = vor.u32 %v5261_v3, %v4926_v7  ;;  %v4911_v29 = vor.u32 %v5257_v39, %v4910_v44  ;;  %v5252_v16 = vld [vmem:[#allocation10 + $0x6c] sm:$0xf0]  ;;  %v5250_v59 = vld [vmem:[#allocation10 + $0x64] sm:$0xf]  ;;  %v4888_v21 = vld [vmem:[#allocation10 + $0x70] sm:$0xf0] }
 0x4e4   :  { %5483 = vtanh.f32 %v6726_v12  ;;  %v2868_v48 = vmul.f32 %v5480_v2, %v2867_v1  ;;  %3519 = vmatpush.bf16.msrb.mxu1 %v4939_v10  ;;  %v4920_v1 = vld [vmem:[#allocation10 + $0xb0] sm:$0xf0]  ;;  %3547 = vmatpush.bf16.msra.mxu3 %v4947_v49  ;;  %v7027_v41 = vld [vmem:[#allocation32_spill] sm:$0xff]  ;;  %v7028_v10 = vld [vmem:[#allocation37_spill] sm:$0xff]  ;;  %v4887_v6 = vor.u32 %v5252_v16, %v4886_v37 }
 0x4e5   :  { %v4923_v23 = vor.u32 %v5258_v17, %v4920_v1  ;;  %v362_v40 = vadd.f32 %v7027_v41, %v5931_v51  ;;  %v5251_v38 = vld [vmem:[#allocation10 + $0x6c] sm:$0xf]  ;;  %v4896_v49 = vld [vmem:[#allocation10 + $0x78] sm:$0xf0]  ;;  %v4891_v17 = vor.u32 %v5250_v59, %v4888_v21  ;;  %v5248_v1 = vld [vmem:[#allocation10 + $0x4c] sm:$0xf0] }
 0x4e6   :  { %v2869_v19 = vadd.f32 %v5480_v2, %v2868_v48  ;;  %v266_v48 = vadd.f32 %v7025_v15, %v5908_v45  ;;  %3506 = vmatpush.bf16.msra.mxu0 %v4919_v25  ;;  %v4870_v25 = vld [vmem:[#allocation10 + $0x40] sm:$0xf]  ;;  %v5246_v7 = vld [vmem:[#allocation10 + $0x44] sm:$0xf] }
 0x4e7   :  { %3533 = vmatpush.bf16.msra.mxu2 %v4943_v31  ;;  %v413_v31 = vadd.f32 %v7028_v10, %v5935_v55  ;;  %v5242_v41 = vld [vmem:[#allocation10 + $0x24] sm:$0xf] }
 0x4e8   :  { %v2873_v11 = vsel %vm2872_vm14, %v5480_v2, %v2869_v19  ;;  %v7024_v2 = vld [vmem:[#allocation33_spill] sm:$0xff]  ;;  %v315_v19 = vadd.f32 %v7026_v50, %v5939_v24  ;;  %3520 = vmatpush.bf16.msrb.mxu1 %v4923_v23  ;;  %v4872_v50 = vld [vmem:[#allocation10 + $0x50] sm:$0xf0] }
 0x4e9   :  { %v2878_v8 = vsel %vm2875_vm0, %v2877_v0, %v2873_v11  ;;  %v411_v27 = vadd.f32 %v7024_v2, %v5935_v55  ;;  %v5259_v0 = vld [vmem:[#allocation10 + $0xac] sm:$0xf] }
 0x4ea   :  { %v5484_v14 = vpop.eup %5483  ;;  %3507 = vmatpush.bf16.msra.mxu0 %v4903_v18 }
 0x4eb   :  { %v2891_v13 = vmul.f32 %v5484_v14, %v2878_v8  ;;  %v4928_v14 = vld [vmem:[#allocation10 + $0xb8] sm:$0xf0]  ;;  %3534 = vmatpush.bf16.msra.mxu2 %v4927_v20 }
 0x4ed   :  { %v2909_v43 = vpack.c.bf16 %v2891_v13, %v2890_v35  ;;  %v4931_v35 = vor.u32 %v5259_v0, %v4928_v14  ;;  %v4875_v0 = vor.u32 %v5246_v7, %v4872_v50 }
 0x4ee   :  { %3508 = vmatpush.bf16.msra.mxu0 %v4887_v6 }
 0x4ef   :  { %3110 = vmatmul.bf16.vlgmr.msrb.gmra.mxu0 %v2909_v43  ;;  %3124 = vmatmul.bf16.vlgmr.msra.gmra.mxu1 %v2909_v43 }
 0x4f0   :  { %3138 = vmatmul.bf16.vlgmr.msrb.gmra.mxu2 %v2909_v43  ;;  %3152 = vmatmul.bf16.vlgmr.msrb.gmra.mxu3 %v2909_v43 }
 0x4f1   :  { %3548 = vmatpush.bf16.msra.mxu3 %v4931_v35  ;;  %3535 = vmatpush.bf16.msra.mxu2 %v4911_v29 }
 0x56c   :  { %v3111_v4 = vpop.f32.mrf.mxu0  ;;  %v3125_v61 = vpop.f32.mrf.mxu1 }
 0x56d   :  { %v3158_v47 = vadd.f32 %v3111_v4, %v264_v36  ;;  %v3159_v34 = vadd.f32 %v3125_v61, %v313_v42  ;;  %v4907_v42 = vor.u32 %v5254_v58, %v4904_v60  ;;  %v5255_v4 = vld [vmem:[#allocation10 + $0x8c] sm:$0xf]  ;;  %v4912_v61 = vld [vmem:[#allocation10 + $0x98] sm:$0xf0] }
 0x56f   :  { %v4830_v22 = vmul.f32 -1.442695, %v3158_v47  ;;  %v4832_v9 = vmul.f32 -1.442695, %v3159_v34  ;;  %3521 = vmatpush.bf16.msrb.mxu1 %v4907_v42  ;;  %v4915_v34 = vor.u32 %v5255_v4, %v4912_v61  ;;  %v4880_v61 = vld [vmem:[#allocation10 + $0x58] sm:$0xf0] }
 0x571   :  { %5485 = vpow2.f32 %v4830_v22  ;;  %3549 = vmatpush.bf16.msra.mxu3 %v4915_v34  ;;  %v4894_v22 = vld [vmem:[#allocation10 + $0x68] sm:$0xf]  ;;  %v5244_v34 = vld [vmem:[#allocation10 + $0x2c] sm:$0xf0] }
 0x572   :  { %5487 = vpow2.f32 %v4832_v9  ;;  %v5253_v9 = vld [vmem:[#allocation10 + $0x74] sm:$0xf0] }
 0x573   :  { %v3153_v26 = vpop.f32.mrf.mxu3  ;;  %v3139_v47 = vpop.f32.mrf.mxu2  ;;  %v4895_v2 = vor.u32 %v5253_v9, %v4894_v22  ;;  %3522 = vmatpush.bf16.msrb.mxu1 %v4891_v17  ;;  %v5243_v17 = vld [vmem:[#allocation10 + $0x2c] sm:$0xf] }
 0x574   :  { %v3161_v11 = vadd.f32 %v3153_v26, %v411_v27  ;;  %v3113_v62 = vpop.f32.mrf.mxu0  ;;  %v3127_v8 = vpop.f32.mrf.mxu1  ;;  %v3160_v56 = vadd.f32 %v3139_v47, %v362_v40  ;;  %v4899_v27 = vor.u32 %v5251_v38, %v4896_v49  ;;  %v4854_v47 = vld [vmem:[#allocation10 + $0x20] sm:$0xf]  ;;  %v4856_v40 = vld [vmem:[#allocation10 + $0x30] sm:$0xf0] }
 0x575   :  { %v3162_v13 = vadd.f32 %v3113_v62, %v266_v48  ;;  %v3163_v43 = vadd.f32 %v3127_v8, %v315_v19  ;;  %v4871_v48 = vor.u32 %v5248_v1, %v4870_v25  ;;  %3536 = vmatpush.bf16.msra.mxu2 %v4895_v2  ;;  %v4864_v2 = vld [vmem:[#allocation10 + $0x38] sm:$0xf0] }
 0x576   :  { %v4834_v5 = vmul.f32 -1.442695, %v3161_v11  ;;  %v7029_v11 = vld [vmem:[#allocation36_spill] sm:$0xff]  ;;  %3550 = vmatpush.bf16.msra.mxu3 %v4899_v27 }
 0x577   :  { %v5486_v53 = vpop.eup %5485  ;;  %v4831_v36 = vmul.f32 -1.442695, %v3162_v13  ;;  %v4833_v63 = vmul.f32 -1.442695, %v3163_v43  ;;  %v364_v62 = vadd.f32 %v7029_v11, %v5931_v51  ;;  %3509 = vmatpush.bf16.msra.mxu0 %v4871_v48  ;;  %3523 = vmatpush.bf16.msrb.mxu1 %v4875_v0  ;;  %v5238_v48 = vld [vmem:[#allocation10 + $0x4] sm:$0xf]  ;;  %v4859_v0 = vor.u32 %v5242_v41, %v4856_v40 }
 0x578   :  { %v5488_v33 = vpop.eup %5487  ;;  %v6750_v32 = vadd.f32 1.0, %v5486_v53  ;;  %5489 = vpow2.f32 %v4834_v5  ;;  %v4840_v11 = vld [vmem:[#allocation10 + $0x10] sm:$0xf0] }
 0x579   :  { %v6752_v46 = vadd.f32 1.0, %v5488_v33  ;;  %5491 = vpow2.f32 %v4831_v36  ;;  %v4878_v36 = vld [vmem:[#allocation10 + $0x48] sm:$0xf]  ;;  %v5247_v33 = vld [vmem:[#allocation10 + $0x4c] sm:$0xf] }
 0x57a   :  { %5493 = vrcp.f32 %v6750_v32  ;;  %v3183_v26 = vand.u32 2147483647, %v6750_v32  ;;  %v3185_v35 = vand.u32 2147483648, %v6750_v32  ;;  %vm3179_vm5 = vweird.f32 %v6750_v32 }
 0x57b   :  { %5495 = vrcp.f32 %v6752_v46  ;;  %v3155_v30 = vpop.f32.mrf.mxu3  ;;  %v3223_v54 = vand.u32 2147483648, %v6752_v46  ;;  %v3221_v57 = vand.u32 2147483647, %v6752_v46  ;;  %v3141_v18 = vpop.f32.mrf.mxu2  ;;  %vm3217_vm4 = vweird.f32 %v6752_v46  ;;  %3524 = vmatpush.bf16.msrb.mxu1 %v4859_v0  ;;  %v5277_v0 = vld [vmem:[#allocation13 + $0x38] sm:$0xff] }
 0x57c   :  { %5497 = vpow2.f32 %v4833_v63  ;;  %v3165_v15 = vadd.f32 %v3155_v30, %v413_v31  ;;  %vm6782_vm2 = vcmp.eq.f32.partialorder %v3183_v26, 8.507059e+37  ;;  %v5249_v63 = vld [vmem:[#allocation10 + $0x54] sm:$0xf0]  ;;  %v3186_v39 = vor.u32 1.1754944e-38, %v3185_v35  ;;  %v4862_v31 = vld [vmem:[#allocation10 + $0x28] sm:$0xf] }
 0x57d   :  { %5499 = vtanh.f32 %v3160_v56  ;;  %v3164_v4 = vadd.f32 %v3141_v18, %v364_v62  ;;  %v3224_v37 = vor.u32 1.1754944e-38, %v3223_v54  ;;  %v4879_v21 = vor.u32 %v5249_v63, %v4878_v36  ;;  %v5245_v56 = vld [vmem:[#allocation10 + $0x34] sm:$0xf0]  ;;  %v4846_v62 = vld [vmem:[#allocation10 + $0x8] sm:$0xf] }
 0x57e   :  { %v5490_v52 = vpop.eup %5489  ;;  %v4835_v60 = vmul.f32 -1.442695, %v3165_v15  ;;  %vm6807_vm8 = vcmp.eq.f32.partialorder %v3221_v57, 8.507059e+37  ;;  %v4883_v49 = vor.u32 %v5247_v33, %v4880_v61  ;;  %v5240_v15 = vld [vmem:[#allocation10 + $0xc] sm:$0xf0] }
 0x57f   :  { %v5492_v3 = vpop.eup %5491  ;;  %v6763_v23 = vadd.f32 1.0, %v5490_v52  ;;  %3537 = vmatpush.bf16.msra.mxu2 %v4879_v21  ;;  %v4855_v52 = vor.u32 %v5244_v34, %v4854_v47  ;;  %v5239_v54 = vld [vmem:[#allocation10 + $0xc] sm:$0xf]  ;;  %v4848_v57 = vld [vmem:[#allocation10 + $0x18] sm:$0xf0] }
 0x580   :  { %v6760_v19 = vpop.eup %5493  ;;  %v6765_v20 = vadd.f32 1.0, %v5492_v3  ;;  %v4838_v3 = vld [vmem:[#allocation10] sm:$0xf]  ;;  %3551 = vmatpush.bf16.msra.mxu3 %v4883_v49 }
 0x581   :  { %v6767_v14 = vpop.eup %5495  ;;  %v3175_v8 = vmul.f32 %v6760_v19, %v6750_v32  ;;  %vm3180_vm1 = vweird.f32 %v6760_v19  ;;  %3510 = vmatpush.bf16.msra.mxu0 %v4855_v52  ;;  %v4839_v53 = vor.u32 %v5240_v15, %v4838_v3 }
 0x582   :  { %v5498_v13 = vpop.eup %5497  ;;  %v3213_v43 = vmul.f32 %v6767_v14, %v6752_v46  ;;  %5501 = vrcp.f32 %v6765_v20  ;;  %vm3218_vm3 = vweird.f32 %v6767_v14  ;;  %vm6796_vm6 = vmor %vm3179_vm5, %vm3180_vm1  ;;  %v3198_v10 = vand.u32 2147483647, %v6765_v20 }
 0x583   :  { %v3176_v58 = vsub.f32 1.0, %v3175_v8  ;;  %v6779_v5 = vadd.f32 1.0, %v5498_v13  ;;  %5503 = vrcp.f32 %v6763_v23  ;;  %v5500_v46 = vpop.eup %5499  ;;  %vm6802_vm7 = vmor %vm3217_vm4, %vm3218_vm3  ;;  %vm3194_vm9 = vweird.f32 %v6765_v20 }
 0x584   :  { %v3214_v44 = vsub.f32 1.0, %v3213_v43  ;;  %v3200_v43 = vand.u32 2147483648, %v6765_v20  ;;  %vm3199_vm14 = vcmp.eq.f32.partialorder %v3198_v10, 8.507059e+37  ;;  %v3263_v10 = vand.u32 2147483648, %v6763_v23 }
 0x585   :  { %v3177_v42 = vmul.f32 %v6760_v19, %v3176_v58  ;;  %5505 = vrcp.f32 %v6779_v5  ;;  %v3238_v9 = vand.u32 2147483648, %v6779_v5  ;;  %v3236_v34 = vand.u32 2147483647, %v6779_v5  ;;  %3511 = vmatpush.bf16.msra.mxu0 %v4839_v53  ;;  %v7041_v53 = vld [vmem:[#allocation20_spill] sm:$0xff] }
 0x586   :  { %v3215_v29 = vmul.f32 %v6767_v14, %v3214_v44  ;;  %5507 = vpow2.f32 %v4835_v60  ;;  %v4863_v60 = vor.u32 %v5245_v56, %v4862_v31  ;;  %v4867_v44 = vor.u32 %v5243_v17, %v4864_v2 }
 0x587   :  { %v3178_v16 = vadd.f32 %v6760_v19, %v3177_v42  ;;  %5509 = vtanh.f32 %v3164_v4  ;;  %vm3232_vm12 = vweird.f32 %v6779_v5  ;;  %v3239_v41 = vor.u32 1.1754944e-38, %v3238_v9 }
 0x588   :  { %v3216_v30 = vadd.f32 %v6767_v14, %v3215_v29  ;;  %v6813_v6 = vpop.eup %5501  ;;  %3538 = vmatpush.bf16.msra.mxu2 %v4863_v60  ;;  %3552 = vmatpush.bf16.msra.mxu3 %v4867_v44  ;;  %v4851_v29 = vor.u32 %v5239_v54, %v4848_v57  ;;  %vm3237_vm0 = vcmp.eq.f32.partialorder %v3236_v34, 8.507059e+37  ;;  %v5276_v54 = vld [vmem:[#allocation13 + $0x30] sm:$0xff]  ;;  %v5275_v44 = vld [vmem:[#allocation13 + $0x28] sm:$0xff] }
 0x589   :  { %v3182_v38 = vsel %vm6796_vm6, %v6760_v19, %v3178_v16  ;;  %v6818_v27 = vpop.eup %5503  ;;  %v3190_v7 = vmul.f32 %v6813_v6, %v6765_v20  ;;  %vm3195_vm10 = vweird.f32 %v6813_v6  ;;  %3774 = vmatpush.bf16.msrb.mxu0 %v5277_v0 }
 0x58a   :  { %v3187_v25 = vsel %vm6782_vm2, %v3186_v39, %v3182_v38  ;;  %v3220_v1 = vsel %vm6802_vm7, %v6767_v14, %v3216_v30  ;;  %v5241_v14 = vld [vmem:[#allocation10 + $0x14] sm:$0xf0]  ;;  %v3253_v18 = vmul.f32 %v6818_v27, %v6763_v23  ;;  %v4843_v39 = vor.u32 %v5238_v48, %v4840_v11  ;;  %vm3196_vm13 = vmor %vm3194_vm9, %vm3195_vm10 }
 0x58b   :  { %v5506_v50 = vpop.eup %5505  ;;  %v3225_v19 = vsel %vm6807_vm8, %v3224_v37, %v3220_v1  ;;  %v3286_v26 = vmul.f32 %v5500_v46, %v3187_v25  ;;  %v3191_v35 = vsub.f32 1.0, %v3190_v7  ;;  %v4847_v33 = vor.u32 %v5241_v14, %v4846_v62  ;;  %v7039_v62 = vld [vmem:[#allocation44_spill] sm:$0xff] }
 0x58c   :  { %v3284_v8 = vmul.f32 %v3225_v19, %v6698_v28  ;;  %v3228_v13 = vmul.f32 %v5506_v50, %v6779_v5  ;;  %v5508_v58 = vpop.eup %5507  ;;  %vm3233_vm11 = vweird.f32 %v5506_v50  ;;  %v3201_v37 = vor.u32 1.1754944e-38, %v3200_v43  ;;  %3525 = vmatpush.bf16.msrb.mxu1 %v4843_v39  ;;  %3553 = vmatpush.bf16.msra.mxu3 %v4851_v29 }
 0x58d   :  { %v3192_v28 = vmul.f32 %v6813_v6, %v3191_v35  ;;  %v3251_v42 = vadd.f32 1.0, %v5508_v58  ;;  %v5510_v4 = vpop.eup %5509  ;;  %v3254_v16 = vsub.f32 1.0, %v3253_v18  ;;  %vm3234_vm15 = vmor %vm3232_vm12, %vm3233_vm11  ;;  %3539 = vmatpush.bf16.msra.mxu2 %v4847_v33  ;;  %vm3258_vm1 = vweird.f32 %v6818_v27  ;;  %3775 = vmatpush.bf16.msrb.mxu0 %v5276_v54  ;;  %v7040_v18 = vld [vmem:[#allocation40_spill] sm:$0xff] }
 0x58e   :  { %v6835_v36 = vadd.f32 %v3286_v26, %v3284_v8  ;;  %v3229_v63 = vsub.f32 1.0, %v3228_v13  ;;  %vm3257_vm2 = vweird.f32 %v6763_v23  ;;  %v3264_v1 = vor.u32 1.1754944e-38, %v3263_v10 }
 0x58f   :  { %v3193_v47 = vadd.f32 %v6813_v6, %v3192_v28  ;;  %5511 = vrcp.f32 %v3251_v42  ;;  %v3255_v22 = vmul.f32 %v6818_v27, %v3254_v16  ;;  %v3278_v49 = vand.u32 2147483648, %v3251_v42  ;;  %vm3259_vm4 = vmor %vm3257_vm2, %vm3258_vm1  ;;  %v7042_v28 = vld [vmem:[#allocation45_spill] sm:$0xff] }
 0x590   :  { %v3230_v61 = vmul.f32 %v5506_v50, %v3229_v63  ;;  %5513 = vtanh.f32 %v6835_v36  ;;  %v3276_v56 = vand.u32 2147483647, %v3251_v42  ;;  %vm3272_vm5 = vweird.f32 %v3251_v42 }
 0x591   :  { %v3197_v59 = vsel %vm3196_vm13, %v6813_v6, %v3193_v47  ;;  %v3256_v5 = vadd.f32 %v6818_v27, %v3255_v22  ;;  %v3279_v7 = vor.u32 1.1754944e-38, %v3278_v49  ;;  %v318_v14 = vadd.f32 %v7039_v62, %v5939_v24  ;;  %3776 = vmatpush.bf16.msrb.mxu0 %v5275_v44 }
 0x592   :  { %v3231_v21 = vadd.f32 %v5506_v50, %v3230_v61  ;;  %v3202_v40 = vsel %vm3199_vm14, %v3201_v37, %v3197_v59  ;;  %vm3277_vm8 = vcmp.eq.f32.partialorder %v3276_v56, 8.507059e+37  ;;  %v416_v60 = vadd.f32 %v7040_v18, %v5935_v55  ;;  %v5274_v37 = vld [vmem:[#allocation13 + $0x20] sm:$0xff] }
 0x593   :  { %v3287_v32 = vmul.f32 %v5510_v4, %v3202_v40  ;;  %v3260_v2 = vsel %vm3259_vm4, %v6818_v27, %v3256_v5  ;;  %v7038_v27 = vld [vmem:[#allocation19_spill] sm:$0xff]  ;;  %v271_v63 = vadd.f32 %v7041_v53, %v5908_v45 }
 0x594   :  { %v3235_v46 = vsel %vm3234_vm15, %v5506_v50, %v3231_v21  ;;  %v269_v11 = vadd.f32 %v7038_v27, %v5908_v45 }
 0x595   :  { %v3240_v30 = vsel %vm3237_vm0, %v3239_v41, %v3235_v46  ;;  %v5512_v6 = vpop.eup %5511  ;;  %3777 = vmatpush.bf16.msrb.mxu0 %v5274_v37  ;;  %v5273_v46 = vld [vmem:[#allocation13 + $0x18] sm:$0xff] }
 0x596   :  { %v3285_v31 = vmul.f32 %v3240_v30, %v6726_v12  ;;  %v3268_v20 = vmul.f32 %v5512_v6, %v3251_v42  ;;  %v3261_v12 = vand.u32 2147483647, %v6763_v23  ;;  %vm3273_vm3 = vweird.f32 %v5512_v6  ;;  %v5514_v25 = vpop.eup %5513 }
 0x597   :  { %vm3274_vm6 = vmor %vm3272_vm5, %vm3273_vm3  ;;  %v320_v42 = vadd.f32 %v7042_v28, %v5939_v24 }
 0x598   :  { %v6851_v38 = vadd.f32 %v3287_v32, %v3285_v31  ;;  %v3269_v9 = vsub.f32 1.0, %v3268_v20  ;;  %vm3262_vm7 = vcmp.eq.f32.partialorder %v3261_v12, 8.507059e+37  ;;  %v7043_v32 = vld [vmem:[#allocation39_spill] sm:$0xff] }
 0x599   :  { %v3265_v48 = vsel %vm3262_vm7, %v3264_v1, %v3260_v2  ;;  %v367_v30 = vadd.f32 %v7043_v32, %v5931_v51  ;;  %3778 = vmatpush.bf16.msrb.mxu0 %v5273_v46  ;;  %v7044_v31 = vld [vmem:[#allocation43_spill] sm:$0xff] }
 0x59a   :  { %5515 = vtanh.f32 %v6851_v38  ;;  %v3270_v52 = vmul.f32 %v5512_v6, %v3269_v9  ;;  %v3292_v19 = vmul.f32 %v5514_v25, %v3265_v48  ;;  %v5272_v9 = vld [vmem:[#allocation13 + $0x10] sm:$0xff] }
 0x59c   :  { %v3271_v17 = vadd.f32 %v5512_v6, %v3270_v52 }
 0x59d   :  { %3779 = vmatpush.bf16.msrb.mxu0 %v5272_v9 }
 0x59e   :  { %v3275_v15 = vsel %vm3274_vm6, %v5512_v6, %v3271_v17  ;;  %v418_v6 = vadd.f32 %v7044_v31, %v5935_v55  ;;  %v5271_v17 = vld [vmem:[#allocation13 + $0x8] sm:$0xff] }
 0x59f   :  { %v3280_v50 = vsel %vm3277_vm8, %v3279_v7, %v3275_v15  ;;  %v7045_v55 = vld [vmem:[#allocation42_spill] sm:$0xff] }
 0x5a0   :  { %v5516_v3 = vpop.eup %5515  ;;  %v369_v7 = vadd.f32 %v7045_v55, %v5931_v51 }
 0x5a1   :  { %v3293_v23 = vmul.f32 %v5516_v3, %v3280_v50  ;;  %3780 = vmatpush.bf16.msrb.mxu0 %v5271_v17 }
 0x5a3   :  { %v3311_v26 = vpack.c.bf16 %v3293_v23, %v3292_v19 }
 0x5a5   :  { %3512 = vmatmul.bf16.vlgmr.msra.gmra.mxu0 %v3311_v26  ;;  %3526 = vmatmul.bf16.vlgmr.msrb.gmra.mxu1 %v3311_v26 }
 0x5a6   :  { %3540 = vmatmul.bf16.vlgmr.msra.gmra.mxu2 %v3311_v26  ;;  %3554 = vmatmul.bf16.vlgmr.msra.gmra.mxu3 %v3311_v26 }
 0x622   :  { %v3513_v8 = vpop.f32.mrf.mxu0  ;;  %v3527_v35 = vpop.f32.mrf.mxu1 }
 0x623   :  { %v3560_v13 = vadd.f32 %v3513_v8, %v269_v11  ;;  %v3561_v43 = vadd.f32 %v3527_v35, %v318_v14  ;;  %v5270_v11 = vld [vmem:[#allocation13] sm:$0xff] }
 0x624   :  { %3781 = vmatpush.bf16.msrb.mxu0 %v5270_v11 }
 0x625   :  { %v4964_v57 = vmul.f32 -1.442695, %v3560_v13  ;;  %v4966_v58 = vmul.f32 -1.442695, %v3561_v43 }
 0x627   :  { %5517 = vpow2.f32 %v4964_v57 }
 0x628   :  { %5519 = vpow2.f32 %v4966_v58 }
 0x629   :  { %v3555_v39 = vpop.f32.mrf.mxu3  ;;  %v3541_v24 = vpop.f32.mrf.mxu2 }
 0x62a   :  { %v3563_v33 = vadd.f32 %v3555_v39, %v416_v60  ;;  %v3515_v29 = vpop.f32.mrf.mxu0  ;;  %v3529_v4 = vpop.f32.mrf.mxu1  ;;  %v3562_v5 = vadd.f32 %v3541_v24, %v367_v30 }
 0x62b   :  { %v3564_v61 = vadd.f32 %v3515_v29, %v271_v63  ;;  %v3565_v47 = vadd.f32 %v3529_v4, %v320_v42 }
 0x62c   :  { %v4968_v34 = vmul.f32 -1.442695, %v3563_v33 }
 0x62d   :  { %v5518_v16 = vpop.eup %5517  ;;  %v4965_v59 = vmul.f32 -1.442695, %v3564_v61  ;;  %v4967_v40 = vmul.f32 -1.442695, %v3565_v47 }
 0x62e   :  { %v5520_v21 = vpop.eup %5519  ;;  %v6871_v41 = vadd.f32 1.0, %v5518_v16  ;;  %5521 = vpow2.f32 %v4968_v34 }
 0x62f   :  { %v3612_v45 = vadd.f32 1.0, %v5520_v21  ;;  %5523 = vpow2.f32 %v4965_v59 }
 0x630   :  { %5525 = vrcp.f32 %v6871_v41  ;;  %v3585_v26 = vand.u32 2147483647, %v6871_v41  ;;  %v3587_v0 = vand.u32 2147483648, %v6871_v41  ;;  %vm3581_vm11 = vweird.f32 %v6871_v41 }
 0x631   :  { %5527 = vrcp.f32 %v3612_v45  ;;  %v3557_v22 = vpop.f32.mrf.mxu3  ;;  %v3625_v23 = vand.u32 2147483648, %v3612_v45  ;;  %v3543_v27 = vpop.f32.mrf.mxu2  ;;  %v3623_v51 = vand.u32 2147483647, %v3612_v45  ;;  %vm3619_vm12 = vweird.f32 %v3612_v45 }
 0x632   :  { %5529 = vpow2.f32 %v4967_v40  ;;  %v3567_v12 = vadd.f32 %v3557_v22, %v418_v6  ;;  %v3566_v13 = vadd.f32 %v3543_v27, %v369_v7  ;;  %v3588_v54 = vor.u32 1.1754944e-38, %v3587_v0 }
 0x633   :  { %v3626_v60 = vor.u32 1.1754944e-38, %v3625_v23  ;;  %vm3586_vm15 = vcmp.eq.f32.partialorder %v3585_v26, 8.507059e+37  ;;  %vm3624_vm0 = vcmp.eq.f32.partialorder %v3623_v51, 8.507059e+37 }
 0x634   :  { %v5522_v20 = vpop.eup %5521  ;;  %v4969_v50 = vmul.f32 -1.442695, %v3567_v12 }
 0x635   :  { %v5524_v10 = vpop.eup %5523  ;;  %v6878_v49 = vadd.f32 1.0, %v5522_v20 }
 0x636   :  { %v5526_v52 = vpop.eup %5525  ;;  %v6880_v56 = vadd.f32 1.0, %v5524_v10 }
 0x637   :  { %v5528_v2 = vpop.eup %5527  ;;  %v3577_v25 = vmul.f32 %v5526_v52, %v6871_v41  ;;  %5531 = vrcp.f32 %v6878_v49  ;;  %vm3582_vm9 = vweird.f32 %v5526_v52  ;;  %v3665_v4 = vand.u32 2147483648, %v6878_v49 }
 0x638   :  { %v5530_v1 = vpop.eup %5529  ;;  %v3615_v3 = vmul.f32 %v5528_v2, %v3612_v45  ;;  %5533 = vtanh.f32 %v3562_v5  ;;  %vm3620_vm10 = vweird.f32 %v5528_v2  ;;  %vm3583_vm13 = vmor %vm3581_vm11, %vm3582_vm9  ;;  %vm3596_vm1 = vweird.f32 %v6880_v56 }
 0x639   :  { %v3578_v15 = vsub.f32 1.0, %v3577_v25  ;;  %5535 = vrcp.f32 %v6880_v56  ;;  %v6887_v48 = vadd.f32 1.0, %v5530_v1  ;;  %vm3621_vm14 = vmor %vm3619_vm12, %vm3620_vm10  ;;  %v3600_v21 = vand.u32 2147483647, %v6880_v56 }
 0x63a   :  { %v3616_v19 = vsub.f32 1.0, %v3615_v3  ;;  %v3602_v41 = vand.u32 2147483648, %v6880_v56  ;;  %vm3659_vm5 = vweird.f32 %v6878_v49  ;;  %v3663_v6 = vand.u32 2147483647, %v6878_v49 }
 0x63b   :  { %v3579_v62 = vmul.f32 %v5526_v52, %v3578_v15  ;;  %5537 = vrcp.f32 %v6887_v48  ;;  %v3640_v59 = vand.u32 2147483648, %v6887_v48  ;;  %v3638_v46 = vand.u32 2147483647, %v6887_v48 }
 0x63c   :  { %v3617_v14 = vmul.f32 %v5528_v2, %v3616_v19  ;;  %5539 = vpow2.f32 %v4969_v50  ;;  %v3603_v20 = vor.u32 1.1754944e-38, %v3602_v41  ;;  %vm3634_vm8 = vweird.f32 %v6887_v48 }
 0x63d   :  { %v6892_v8 = vpop.eup %5531  ;;  %v3580_v35 = vadd.f32 %v5526_v52, %v3579_v62  ;;  %5541 = vtanh.f32 %v3566_v13  ;;  %vm3601_vm9 = vcmp.eq.f32.partialorder %v3600_v21, 8.507059e+37  ;;  %v3641_v12 = vor.u32 1.1754944e-38, %v3640_v59 }
 0x63e   :  { %v5534_v43 = vpop.eup %5533  ;;  %v3618_v57 = vadd.f32 %v5528_v2, %v3617_v14  ;;  %v3655_v58 = vmul.f32 %v6892_v8, %v6878_v49  ;;  %vm3660_vm3 = vweird.f32 %v6892_v8  ;;  %vm3639_vm11 = vcmp.eq.f32.partialorder %v3638_v46, 8.507059e+37 }
 0x63f   :  { %v5536_v18 = vpop.eup %5535  ;;  %v3584_v44 = vsel %vm3583_vm13, %v5526_v52, %v3580_v35  ;;  %vm6913_vm7 = vmor %vm3659_vm5, %vm3660_vm3  ;;  %vm3664_vm12 = vcmp.eq.f32.partialorder %v3663_v6, 8.507059e+37  ;;  %v5292_v35 = vld [vmem:[%s6933_s5] ss:$0 sm:$0xff] }
 0x640   :  { %v3589_v53 = vsel %vm3586_vm15, %v3588_v54, %v3584_v44  ;;  %v3622_v63 = vsel %vm3621_vm14, %v5528_v2, %v3618_v57  ;;  %v3656_v28 = vsub.f32 1.0, %v3655_v58  ;;  %v3592_v42 = vmul.f32 %v5536_v18, %v6880_v56 }
 0x641   :  { %v5538_v39 = vpop.eup %5537  ;;  %v3627_v33 = vsel %vm3624_vm0, %v3626_v60, %v3622_v63  ;;  %v3688_v29 = vmul.f32 %v5534_v43, %v3589_v53  ;;  %vm3597_vm2 = vweird.f32 %v5536_v18  ;;  %v3666_v56 = vor.u32 1.1754944e-38, %v3665_v4 }
 0x642   :  { %v3686_v61 = vmul.f32 %v3627_v33, %v6835_v36  ;;  %v3657_v47 = vmul.f32 %v6892_v8, %v3656_v28  ;;  %v3593_v34 = vsub.f32 1.0, %v3592_v42  ;;  %v3630_v37 = vmul.f32 %v5538_v39, %v6887_v48  ;;  %v5540_v16 = vpop.eup %5539  ;;  %vm3598_vm6 = vmor %vm3596_vm1, %vm3597_vm2 }
 0x643   :  { %v3653_v32 = vadd.f32 1.0, %v5540_v16  ;;  %vm3635_vm4 = vweird.f32 %v5538_v39  ;;  %v5542_v31 = vpop.eup %5541 }
 0x644   :  { %v3690_v40 = vadd.f32 %v3688_v29, %v3686_v61  ;;  %v3631_v45 = vsub.f32 1.0, %v3630_v37  ;;  %v3594_v24 = vmul.f32 %v5536_v18, %v3593_v34  ;;  %v3658_v36 = vadd.f32 %v6892_v8, %v3657_v47  ;;  %vm3636_vm10 = vmor %vm3634_vm8, %vm3635_vm4 }
 0x645   :  { %v3680_v23 = vand.u32 2147483648, %v3653_v32  ;;  %v3678_v0 = vand.u32 2147483647, %v3653_v32  ;;  %vm3674_vm14 = vweird.f32 %v3653_v32 }
 0x646   :  { %5543 = vtanh.f32 %v3690_v40  ;;  %v3632_v30 = vmul.f32 %v5538_v39, %v3631_v45  ;;  %v3595_v22 = vadd.f32 %v5536_v18, %v3594_v24  ;;  %v3662_v49 = vsel %vm6913_vm7, %v6892_v8, %v3658_v36 }
 0x647   :  { %5545 = vrcp.f32 %v3653_v32  ;;  %v3667_v7 = vsel %vm3664_vm12, %v3666_v56, %v3662_v49  ;;  %v3681_v11 = vor.u32 1.1754944e-38, %v3680_v23  ;;  %vm3679_vm0 = vcmp.eq.f32.partialorder %v3678_v0, 8.507059e+37 }
 0x648   :  { %v3599_v9 = vsel %vm3598_vm6, %v5536_v18, %v3595_v22  ;;  %v3633_v10 = vadd.f32 %v5538_v39, %v3632_v30 }
 0x649   :  { %v3604_v52 = vsel %vm3601_vm9, %v3603_v20, %v3599_v9 }
 0x64a   :  { %v3637_v17 = vsel %vm3636_vm10, %v5538_v39, %v3633_v10  ;;  %v3689_v2 = vmul.f32 %v5542_v31, %v3604_v52 }
 0x64b   :  { %v3642_v25 = vsel %vm3639_vm11, %v3641_v12, %v3637_v17 }
 0x64c   :  { %v5544_v1 = vpop.eup %5543  ;;  %v3687_v55 = vmul.f32 %v3642_v25, %v6851_v38 }
 0x64d   :  { %v5546_v3 = vpop.eup %5545  ;;  %v3694_v15 = vmul.f32 %v5544_v1, %v3667_v7 }
 0x64e   :  { %v3691_v48 = vadd.f32 %v3689_v2, %v3687_v55  ;;  %v3670_v50 = vmul.f32 %v5546_v3, %v3653_v32  ;;  %vm3675_vm13 = vweird.f32 %v5546_v3 }
 0x64f   :  { %vm3676_vm15 = vmor %vm3674_vm14, %vm3675_vm13 }
 0x650   :  { %5547 = vtanh.f32 %v3691_v48  ;;  %v3671_v19 = vsub.f32 1.0, %v3670_v50 }
 0x652   :  { %v3672_v26 = vmul.f32 %v5546_v3, %v3671_v19 }
 0x654   :  { %v3673_v27 = vadd.f32 %v5546_v3, %v3672_v26 }
 0x656   :  { %v5548_v62 = vpop.eup %5547  ;;  %v3677_v51 = vsel %vm3676_vm15, %v5546_v3, %v3673_v27 }
 0x657   :  { %v3682_v14 = vsel %vm3679_vm0, %v3681_v11, %v3677_v51 }
 0x658   :  { %v3695_v38 = vmul.f32 %v5548_v62, %v3682_v14 }
 0x65a   :  { %v3705_v8 = vpack.c.bf16 %v3695_v38, %v3694_v15 }
 0x65c   :  { %3782 = vmatmul.bf16.vlgmr.msrb.gmra.mxu0 %v3705_v8 }
 0x6d9   :  { %v3783_v13 = vpop.f32.mrf.mxu0 }
 0x6da   :  { %v3784_v43 = vadd.f32 %v5292_v35, %v3783_v13 }
 0x6dc   :  { %3788 = vst [vmem:[#allocation14] sm:$0xff] %v3784_v43 }
 0x6e1   :  { %v3785_v54 = vpop.f32.mrf.mxu0 }
 0x6e2   :  { %v3786_v57 = vadd.f32 %v5292_v35, %v3785_v54 }
 0x6e4   :  { %3789 = vst [vmem:[#allocation14 + $0x8] sm:$0xff] %v3786_v57 }
 0x6e5   :  { %3802 = dma.vmem_to_hbm [thread:$0]  %s3795_s24, 256, %s3797_s27, [#allocation7], %s5712_s28, %s5712_s28, %s5713_s29  }
 0x6e6   :  { %5699 = dma.done.wait [#allocation7], 256  }
 0x6e7   :  { %5700 = vsyncadd [#allocation7], 4294967040 }
 0x6e8   :  { %3807 = vsyncpa [#allocation6], 1 }
 0x6e9   :  { %3808 = vsyncpa [#allocation9], 1 }
 0x6ea   :  { %3809 = vsyncpa [#allocation12], 1 }
 0x6eb   :  { %3810 = vsyncpa [#allocation7], 1 }

</bundles_post_ra>
